<compile_context>
chip_gen: v7x
topology: tpu7x:2x2x1
jax: 0.10.0
libtpu: 0.0.40
codegen_flags: <defaults>
</compile_context>

<pallas_src>
import numpy as np

import jax
import jax.numpy as jnp
from jax.experimental import pallas as pl
from jax.experimental.pallas import tpu as pltpu

_BT_MAX = 256          # max batch rows per grid step (f32 scratch ~9 MB at 256)

_H1_ROW = 256          # conv1 out row stride: 14 cols x 16 ch = 224 valid + 32 zero pad
_P1_ROW = 256          # pool1 out row stride: 13 cols x 16 ch = 208 valid + 48 pad
_H2_ROW = 256          # conv2 out row stride:  5 cols x 32 ch = 160 valid + 96 zero pad
_P2_ROW = 128          # pool2 out row stride:  4 cols x 32 ch = 128 (exact, fc1 input)


def _round_up(x, m):
    return (x + m - 1) // m * m


# ---------------------------------------------------------------------------
# Fused forward kernel.
# Activations live in VMEM scratch as (batch_tile, rows * row_stride) f32 slabs,
# channels fastest, row strides 128-aligned.  Every conv / fc is a 2-D MXU matmul
# (bf16 operands, f32 accumulation) with the batch tile on sublanes; pools and
# ReLU are dense, lane-aligned VPU ops.
# ---------------------------------------------------------------------------
def _fused_forward_kernel(x_ref, w1_ref, b1_ref, w2_ref, b2_ref,
                          wf1_ref, bf1_ref, wf2_ref, bf2_ref,
                          out_ref, h1_ref, p1_ref, h2_ref, p2_ref):
    f32 = jnp.float32
    bf16 = jnp.bfloat16
    bt = x_ref.shape[0]

    # ---- conv1 (8x8, stride 2, pad 3) + bias + ReLU -----------------------------
    # For each of the 14 output rows, an 8-input-row (bt, 224) window of the raw
    # 28x28 image is one MXU matmul against a per-row Toeplitz weight block; zero
    # taps in the packed weight encode the spatial zero-padding, so no padded /
    # relaid-out input ever exists.  h1 rows are stored 256-lane aligned and the
    # 32 pad lanes are exact zeros (zero weight cols + zero bias) => h1 is fully
    # written and finite everywhere.
    b1b = jnp.broadcast_to(b1_ref[...], (bt, 256))        # hoisted: one broadcast total
    for oh in range(14):
        r0 = min(max(2 * oh - 3, 0), 20)                  # first raw input row of window
        xs = x_ref[:, r0 * 28: r0 * 28 + 224].astype(bf16)
        r = jnp.dot(xs, w1_ref[oh * 224:(oh + 1) * 224, :],
                    preferred_element_type=f32) + b1b
        h1_ref[:, oh * _H1_ROW:(oh + 1) * _H1_ROW] = jnp.maximum(r, 0.0)

    # ---- max_pool2d(2, stride 1): 14x14x16 -> pool rows, two-pass -----------------
    # Pass 1 (horizontal): m_i = max(row_i, row_i shifted left by 16 lanes), written
    # back over h1 row i (reads only already-written, finite lanes).  Pass 2
    # (vertical): p1_i = max(m_i, m_{i+1}).  Only the 12 pool rows that conv2
    # consumes are produced (pool row/col 12 never reach the output in the module).
    for i in range(13):
        a = h1_ref[:, i * _H1_ROW: i * _H1_ROW + 256]
        b = h1_ref[:, i * _H1_ROW + 16: i * _H1_ROW + 272]   # 16-lane peek into row i+1 (finite)
        h1_ref[:, i * _H1_ROW:(i + 1) * _H1_ROW] = jnp.maximum(a, b)
    for i in range(12):
        p1_ref[:, i * _P1_ROW:(i + 1) * _P1_ROW] = jnp.maximum(
            h1_ref[:, i * _H1_ROW:(i + 1) * _H1_ROW],
            h1_ref[:, (i + 1) * _H1_ROW:(i + 2) * _H1_ROW])

    # ---- conv2 (4x4, stride 2) + bias + ReLU --------------------------------------
    # Each output row reads one aligned (bt, 1024) window (4 pool rows x 256 lanes);
    # the shared packed weight has zero rows over the 48 pad lanes of each pool row,
    # and those lanes hold finite (written) values, so the zeros are exact.
    b2b = jnp.broadcast_to(b2_ref[...], (bt, 256))
    w2 = w2_ref[...]
    for oh in range(5):
        xs = p1_ref[:, (2 * oh) * _P1_ROW: (2 * oh) * _P1_ROW + 1024].astype(bf16)
        r = jnp.dot(xs, w2, preferred_element_type=f32) + b2b
        h2_ref[:, oh * _H2_ROW:(oh + 1) * _H2_ROW] = jnp.maximum(r, 0.0)

    # ---- max_pool2d(2, stride 1): 5x5x32 -> 4x4x32, two-pass -----------------------
    for i in range(5):
        row = h2_ref[:, i * _H2_ROW: i * _H2_ROW + 160]
        h2_ref[:, i * _H2_ROW: i * _H2_ROW + 128] = jnp.maximum(row[:, :128], row[:, 32:160])
    for i in range(4):
        p2_ref[:, i * _P2_ROW:(i + 1) * _P2_ROW] = jnp.maximum(
            h2_ref[:, i * _H2_ROW: i * _H2_ROW + 128],
            h2_ref[:, (i + 1) * _H2_ROW: (i + 1) * _H2_ROW + 128])

    # ---- fc1 + ReLU, fc2 ------------------------------------------------------------
    # PyTorch's (C,H,W) flatten order is folded into wf1's row order at pack time;
    # fc1/fc2 outputs are zero-padded to 128 lanes -> dense unmasked HBM store.
    z = jnp.maximum(
        jnp.dot(p2_ref[...].astype(bf16), wf1_ref[...], preferred_element_type=f32)
        + bf1_ref[...], 0.0)
    out_ref[...] = (jnp.dot(z.astype(bf16), wf2_ref[...], preferred_element_type=f32)
                    + bf2_ref[...])


def _fused_forward_call(xf, kp, bt):
    n_pad = xf.shape[0]
    assert n_pad % bt == 0
    const = lambda i: (0, 0)

    flops_per_sample = 2 * (14 * 224 * 256 + 5 * 1024 * 256 + 512 * 128 + 128 * 128)
    weight_bytes = ((3136 * 256 + 1024 * 256 + 512 * 128 + 128 * 128) * 2
                    + (256 + 256 + 128 + 128) * 4)
    cost = pl.CostEstimate(
        flops=flops_per_sample * n_pad,
        transcendentals=0,
        bytes_accessed=n_pad * (784 * 4 + 128 * 4) + weight_bytes)

    return pl.pallas_call(
        _fused_forward_kernel,
        out_shape=jax.ShapeDtypeStruct((n_pad, 128), jnp.float32),
        grid_spec=pltpu.PrefetchScalarGridSpec(
            num_scalar_prefetch=0,
            grid=(n_pad // bt,),
            in_specs=[
                pl.BlockSpec((bt, 784), lambda i: (i, 0)),    # raw image tile (only HBM stream)
                pl.BlockSpec((3136, 256), const),             # conv1 Toeplitz blocks (bf16, resident)
                pl.BlockSpec((1, 256), const),                # conv1 bias, tiled per ow, zero-padded
                pl.BlockSpec((1024, 256), const),             # conv2 Toeplitz block (bf16, resident)
                pl.BlockSpec((1, 256), const),                # conv2 bias
                pl.BlockSpec((512, 128), const),              # fc1 (flatten perm folded, N padded)
                pl.BlockSpec((1, 128), const),
                pl.BlockSpec((128, 128), const),              # fc2 (K/N zero-padded to 128)
                pl.BlockSpec((1, 128), const),
            ],
            out_specs=pl.BlockSpec((bt, 128), lambda i: (i, 0)),
            scratch_shapes=[
                pltpu.VMEM((bt, 14 * _H1_ROW), jnp.float32),  # conv1+relu output (aligned rows)
                pltpu.VMEM((bt, 12 * _P1_ROW), jnp.float32),  # pool1 output (only rows conv2 uses)
                pltpu.VMEM((bt, 5 * _H2_ROW), jnp.float32),   # conv2+relu output
                pltpu.VMEM((bt, 4 * _P2_ROW), jnp.float32),   # pool2 output = fc1 input
            ],
        ),
        compiler_params=pltpu.CompilerParams(
            dimension_semantics=("parallel",),                # batch tiles shard over v7x TCs
            vmem_limit_bytes=40 * 1024 * 1024,                # > ~16 MB used, < v7x 64 MiB physical
        ),
        cost_estimate=cost,
    )(xf, kp["w1b"], kp["b1r"], kp["w2b"], kp["b2r"],
      kp["wf1"], kp["bf1"], kp["wf2"], kp["bf2"])


# ---------------------------------------------------------------------------
# Parameters: PyTorch-default-style init, then one-time packing into the
# kernel's Toeplitz / lane-padded matmul layouts (weights stored bf16).
# ---------------------------------------------------------------------------
def init_params(key):
    def uniform(k, shape, fan_in):
        bound = 1.0 / jnp.sqrt(jnp.float32(fan_in))
        return jax.random.uniform(k, shape, jnp.float32, -bound, bound)

    ks = jax.random.split(key, 8)
    return {
        "conv1_w": uniform(ks[0], (16, 1, 8, 8), 1 * 8 * 8),
        "conv1_b": uniform(ks[1], (16,), 1 * 8 * 8),
        "conv2_w": uniform(ks[2], (32, 16, 4, 4), 16 * 4 * 4),
        "conv2_b": uniform(ks[3], (32,), 16 * 4 * 4),
        "fc1_w": uniform(ks[4], (32, 32 * 4 * 4), 32 * 4 * 4),   # PyTorch (out, in)
        "fc1_b": uniform(ks[5], (32,), 32 * 4 * 4),
        "fc2_w": uniform(ks[6], (10, 32), 32),
        "fc2_b": uniform(ks[7], (10,), 32),
    }


def pack_params(params):
    w1 = np.asarray(params["conv1_w"], np.float32)    # (16, 1, 8, 8)
    b1 = np.asarray(params["conv1_b"], np.float32)
    w2 = np.asarray(params["conv2_w"], np.float32)    # (32, 16, 4, 4)
    b2 = np.asarray(params["conv2_b"], np.float32)
    fw1 = np.asarray(params["fc1_w"], np.float32)     # (32, 512)
    fb1 = np.asarray(params["fc1_b"], np.float32)
    fw2 = np.asarray(params["fc2_w"], np.float32)     # (10, 32)
    fb2 = np.asarray(params["fc2_b"], np.float32)

    # conv1: per-output-row blocks over the raw 28x28 image.  Window for output row
    # oh = 8 raw rows starting at r0 = clamp(2*oh-3, 0, 20); zero entries encode the
    # spatial padding and the clamp offset.  Lane layout of the output: ow*16 + oc.
    w1b = np.zeros((14, 8, 28, 256), np.float32)      # (oh, dr, iw, out)
    for oh in range(14):
        r0 = min(max(2 * oh - 3, 0), 20)
        for dr in range(8):
            ki = (r0 + dr) - (2 * oh - 3)
            if not (0 <= ki < 8):
                continue
            for ow in range(14):
                for kj in range(8):
                    iw = 2 * ow - 3 + kj
                    if 0 <= iw < 28:
                        w1b[oh, dr, iw, ow * 16:(ow + 1) * 16] = w1[:, 0, ki, kj]
    w1b = w1b.reshape(14 * 224, 256)
    b1r = np.zeros((1, 256), np.float32)
    b1r[0, :224] = np.tile(b1, 14)

    # conv2: one shared block over a 4-row (4 x 256-lane) window of the pool1 slab.
    # Window lane index = dr*256 + iw*16 + c; pad lanes (iw >= 12) stay zero rows.
    w2b = np.zeros((4, 16, 16, 256), np.float32)      # (dr, iw, c, out)
    for ow in range(5):
        for kj in range(4):
            iw = 2 * ow + kj
            for dr in range(4):
                w2b[dr, iw, :, ow * 32:(ow + 1) * 32] = w2[:, :, dr, kj].T   # (16, 32)
    w2b = w2b.reshape(1024, 256)
    b2r = np.zeros((1, 256), np.float32)
    b2r[0, :160] = np.tile(b2, 5)

    # fc1: fold PyTorch's (C,H,W) flatten order into the kernel's (H,W,C) p2 layout;
    # pad output channels 32 -> 128 for dense lanes.
    wf1 = np.zeros((512, 128), np.float32)
    wf1[:, :32] = fw1.reshape(32, 32, 4, 4).transpose(2, 3, 1, 0).reshape(512, 32)
    bf1 = np.zeros((1, 128), np.float32)
    bf1[0, :32] = fb1

    # fc2: (in, out) layout, K/N zero-padded to 128 lanes for dense stores.
    wf2 = np.zeros((128, 128), np.float32)
    wf2[:32, :10] = fw2.T
    bf2 = np.zeros((1, 128), np.float32)
    bf2[0, :10] = fb2

    as_bf16 = lambda a: jnp.asarray(a, jnp.bfloat16)
    as_f32 = lambda a: jnp.asarray(a, jnp.float32)
    return {"w1b": as_bf16(w1b), "b1r": as_f32(b1r),
            "w2b": as_bf16(w2b), "b2r": as_f32(b2r),
            "wf1": as_bf16(wf1), "bf1": as_f32(bf1),
            "wf2": as_bf16(wf2), "bf2": as_f32(bf2)}


# ---------------------------------------------------------------------------
# Public forward (mirrors SampleConvNet.forward).
# ---------------------------------------------------------------------------
@jax.jit
def sample_convnet_forward(x_nchw, kparams):
    assert x_nchw.shape[1:] == (1, 28, 28), "SampleConvNet is MNIST-shaped (1,28,28)"
    n = x_nchw.shape[0]
    # Adaptive batch tile: multiple of 8, capped, and sized so the grid has >=2
    # steps whenever possible (keeps both v7x TensorCores busy, limits pad waste).
    bt = min(_BT_MAX, max(8, _round_up((n + 1) // 2, 8)))
    n_pad = _round_up(n, bt)
    xf = x_nchw.astype(jnp.float32).reshape(n, 784)    # free bitcast: raw image is the kernel input
    if n_pad > n:
        xf = jnp.pad(xf, ((0, n_pad - n), (0, 0)))
    out = _fused_forward_call(xf, kparams, bt)         # (n_pad, 128) f32
    return out[:n, :10]


# ---------------------------------------------------------------------------
# Pure-JAX reference (high precision) for the correctness check in __main__.
# ---------------------------------------------------------------------------
def reference_forward(x, params):
    hp = jax.lax.Precision.HIGHEST
    dn = ("NCHW", "OIHW", "NCHW")
    y = jax.lax.conv_general_dilated(x, params["conv1_w"], (2, 2), [(3, 3), (3, 3)],
                                     dimension_numbers=dn, precision=hp)
    y = jax.nn.relu(y + params["conv1_b"][None, :, None, None])
    y = jax.lax.reduce_window(y, -jnp.inf, jax.lax.max, (1, 1, 2, 2), (1, 1, 1, 1), "VALID")
    y = jax.lax.conv_general_dilated(y, params["conv2_w"], (2, 2), [(0, 0), (0, 0)],
                                     dimension_numbers=dn, precision=hp)
    y = jax.nn.relu(y + params["conv2_b"][None, :, None, None])
    y = jax.lax.reduce_window(y, -jnp.inf, jax.lax.max, (1, 1, 2, 2), (1, 1, 1, 1), "VALID")
    y = y.reshape(y.shape[0], 512)                     # PyTorch x.view(-1, 512): (C,H,W) order
    y = jax.nn.relu(jnp.dot(y, params["fc1_w"].T, precision=hp) + params["fc1_b"])
    y = jnp.dot(y, params["fc2_w"].T, precision=hp) + params["fc2_b"]
    return y


if __name__ == "__main__":
    key = jax.random.PRNGKey(0)
    k_x, k_p = jax.random.split(key)
    # MNIST-shaped input is required by the fixed 32*4*4 flatten in the module.
    x = jax.random.normal(k_x, (2, 1, 28, 28), dtype=jnp.float32)
    params = init_params(k_p)
    kparams = pack_params(params)

    out = jax.block_until_ready(sample_convnet_forward(x, kparams))
    assert out.shape == (2, 10), out.shape
    assert out.dtype == jnp.float32

    ref = jax.block_until_ready(reference_forward(x, params))
    max_err = float(jnp.max(jnp.abs(out - ref)))
    assert jnp.allclose(out, ref, atol=5e-2, rtol=5e-2), f"max abs err {max_err}"

    print("KERNEL_OK")
</pallas_src>

<mosaic_0001>
module attributes {stable_mosaic.version = 11 : i64} {
  func.func @_fused_forward_kernel(%arg0: i32, %arg1: memref<8x784xf32, #tpu.memory_space<vmem>>, %arg2: memref<3136x256xbf16, #tpu.memory_space<vmem>>, %arg3: memref<1x256xf32, #tpu.memory_space<vmem>>, %arg4: memref<1024x256xbf16, #tpu.memory_space<vmem>>, %arg5: memref<1x256xf32, #tpu.memory_space<vmem>>, %arg6: memref<512x128xbf16, #tpu.memory_space<vmem>>, %arg7: memref<1x128xf32, #tpu.memory_space<vmem>>, %arg8: memref<128x128xbf16, #tpu.memory_space<vmem>>, %arg9: memref<1x128xf32, #tpu.memory_space<vmem>>, %arg10: memref<8x128xf32, #tpu.memory_space<vmem>>, %arg11: memref<8x3584xf32, #tpu.memory_space<vmem>>, %arg12: memref<8x3072xf32, #tpu.memory_space<vmem>>, %arg13: memref<8x1280xf32, #tpu.memory_space<vmem>>, %arg14: memref<8x512xf32, #tpu.memory_space<vmem>>) attributes {dimension_semantics = [#tpu.dimension_semantics<parallel>], iteration_bounds = array<i64: 1>, scalar_prefetch = 0 : i64, scratch_operands = 4 : i64, tpu.core_type = #tpu.core_type<tc>, window_params = [{transform_indices = @transform_0, window_bounds = array<i64: 8, 784>}, {pipeline_mode = #tpu.pipeline_mode<synchronous>, transform_indices = @transform_1, window_bounds = array<i64: 3136, 256>}, {pipeline_mode = #tpu.pipeline_mode<synchronous>, transform_indices = @transform_2, window_bounds = array<i64: 1, 256>}, {pipeline_mode = #tpu.pipeline_mode<synchronous>, transform_indices = @transform_3, window_bounds = array<i64: 1024, 256>}, {pipeline_mode = #tpu.pipeline_mode<synchronous>, transform_indices = @transform_4, window_bounds = array<i64: 1, 256>}, {pipeline_mode = #tpu.pipeline_mode<synchronous>, transform_indices = @transform_5, window_bounds = array<i64: 512, 128>}, {pipeline_mode = #tpu.pipeline_mode<synchronous>, transform_indices = @transform_6, window_bounds = array<i64: 1, 128>}, {pipeline_mode = #tpu.pipeline_mode<synchronous>, transform_indices = @transform_7, window_bounds = array<i64: 128, 128>}, {pipeline_mode = #tpu.pipeline_mode<synchronous>, transform_indices = @transform_8, window_bounds = array<i64: 1, 128>}, {transform_indices = @transform_9, window_bounds = array<i64: 8, 128>}]} {
    %c0 = arith.constant 0 : index
    %c0_0 = arith.constant 0 : index
    %0 = vector.load %arg3[%c0, %c0_0] : memref<1x256xf32, #tpu.memory_space<vmem>>, vector<1x256xf32>
    %1 = vector.shape_cast %0 : vector<1x256xf32> to vector<1x256xf32>
    %2 = vector.broadcast %1 : vector<1x256xf32> to vector<8x256xf32>
    %c0_1 = arith.constant 0 : index
    %c0_2 = arith.constant 0 : index
    %3 = vector.load %arg1[%c0_1, %c0_2] : memref<8x784xf32, #tpu.memory_space<vmem>>, vector<8x224xf32>
    %4 = arith.truncf %3 : vector<8x224xf32> to vector<8x224xbf16>
    %c0_3 = arith.constant 0 : index
    %c0_4 = arith.constant 0 : index
    %5 = vector.load %arg2[%c0_3, %c0_4] : memref<3136x256xbf16, #tpu.memory_space<vmem>>, vector<224x256xbf16>
    %cst = arith.constant dense<0.000000e+00> : vector<8x256xf32>
    %6 = tpu.matmul %4, %5, %cst {dimension_numbers = #tpu.dot_dimension_numbers<[1], [0], [0], [1], [0, 0, 1, 1], [], []>} : vector<8x224xbf16>, vector<224x256xbf16>, vector<8x256xf32> -> vector<8x256xf32>
    %7 = arith.addf %6, %2 : vector<8x256xf32>
    %cst_5 = arith.constant 0.000000e+00 : f32
    %8 = vector.broadcast %cst_5 : f32 to vector<8x256xf32>
    %9 = arith.maximumf %7, %8 : vector<8x256xf32>
    %c0_6 = arith.constant 0 : index
    %c0_7 = arith.constant 0 : index
    %10 = vector.load %arg11[%c0_6, %c0_7] : memref<8x3584xf32, #tpu.memory_space<vmem>>, vector<8x256xf32>
    tpu.vector_store %arg11[%c0_6, %c0_7], %9 {strides = array<i32>} : memref<8x3584xf32, #tpu.memory_space<vmem>>, vector<8x256xf32>,
    %c0_8 = arith.constant 0 : index
    %c0_9 = arith.constant 0 : index
    %11 = vector.load %arg1[%c0_8, %c0_9] : memref<8x784xf32, #tpu.memory_space<vmem>>, vector<8x224xf32>
    %12 = arith.truncf %11 : vector<8x224xf32> to vector<8x224xbf16>
    %c224 = arith.constant 224 : index
    %c0_10 = arith.constant 0 : index
    %13 = vector.load %arg2[%c224, %c0_10] : memref<3136x256xbf16, #tpu.memory_space<vmem>>, vector<224x256xbf16>
    %cst_11 = arith.constant dense<0.000000e+00> : vector<8x256xf32>
    %14 = tpu.matmul %12, %13, %cst_11 {dimension_numbers = #tpu.dot_dimension_numbers<[1], [0], [0], [1], [0, 0, 1, 1], [], []>} : vector<8x224xbf16>, vector<224x256xbf16>, vector<8x256xf32> -> vector<8x256xf32>
    %15 = arith.addf %14, %2 : vector<8x256xf32>
    %cst_12 = arith.constant 0.000000e+00 : f32
    %16 = vector.broadcast %cst_12 : f32 to vector<8x256xf32>
    %17 = arith.maximumf %15, %16 : vector<8x256xf32>
    %c0_13 = arith.constant 0 : index
    %c256 = arith.constant 256 : index
    %18 = vector.load %arg11[%c0_13, %c256] : memref<8x3584xf32, #tpu.memory_space<vmem>>, vector<8x256xf32>
    tpu.vector_store %arg11[%c0_13, %c256], %17 {strides = array<i32>} : memref<8x3584xf32, #tpu.memory_space<vmem>>, vector<8x256xf32>,
    %c0_14 = arith.constant 0 : index
    %c28 = arith.constant 28 : index
    %19 = vector.load %arg1[%c0_14, %c28] : memref<8x784xf32, #tpu.memory_space<vmem>>, vector<8x224xf32>
    %20 = arith.truncf %19 : vector<8x224xf32> to vector<8x224xbf16>
    %c448 = arith.constant 448 : index
    %c0_15 = arith.constant 0 : index
    %21 = vector.load %arg2[%c448, %c0_15] : memref<3136x256xbf16, #tpu.memory_space<vmem>>, vector<224x256xbf16>
    %cst_16 = arith.constant dense<0.000000e+00> : vector<8x256xf32>
    %22 = tpu.matmul %20, %21, %cst_16 {dimension_numbers = #tpu.dot_dimension_numbers<[1], [0], [0], [1], [0, 0, 1, 1], [], []>} : vector<8x224xbf16>, vector<224x256xbf16>, vector<8x256xf32> -> vector<8x256xf32>
    %23 = arith.addf %22, %2 : vector<8x256xf32>
    %cst_17 = arith.constant 0.000000e+00 : f32
    %24 = vector.broadcast %cst_17 : f32 to vector<8x256xf32>
    %25 = arith.maximumf %23, %24 : vector<8x256xf32>
    %c0_18 = arith.constant 0 : index
    %c512 = arith.constant 512 : index
    %26 = vector.load %arg11[%c0_18, %c512] : memref<8x3584xf32, #tpu.memory_space<vmem>>, vector<8x256xf32>
    tpu.vector_store %arg11[%c0_18, %c512], %25 {strides = array<i32>} : memref<8x3584xf32, #tpu.memory_space<vmem>>, vector<8x256xf32>,
    %c0_19 = arith.constant 0 : index
    %c84 = arith.constant 84 : index
    %27 = vector.load %arg1[%c0_19, %c84] : memref<8x784xf32, #tpu.memory_space<vmem>>, vector<8x224xf32>
    %28 = arith.truncf %27 : vector<8x224xf32> to vector<8x224xbf16>
    %c672 = arith.constant 672 : index
    %c0_20 = arith.constant 0 : index
    %29 = vector.load %arg2[%c672, %c0_20] : memref<3136x256xbf16, #tpu.memory_space<vmem>>, vector<224x256xbf16>
    %cst_21 = arith.constant dense<0.000000e+00> : vector<8x256xf32>
    %30 = tpu.matmul %28, %29, %cst_21 {dimension_numbers = #tpu.dot_dimension_numbers<[1], [0], [0], [1], [0, 0, 1, 1], [], []>} : vector<8x224xbf16>, vector<224x256xbf16>, vector<8x256xf32> -> vector<8x256xf32>
    %31 = arith.addf %30, %2 : vector<8x256xf32>
    %cst_22 = arith.constant 0.000000e+00 : f32
    %32 = vector.broadcast %cst_22 : f32 to vector<8x256xf32>
    %33 = arith.maximumf %31, %32 : vector<8x256xf32>
    %c0_23 = arith.constant 0 : index
    %c768 = arith.constant 768 : index
    %34 = vector.load %arg11[%c0_23, %c768] : memref<8x3584xf32, #tpu.memory_space<vmem>>, vector<8x256xf32>
    tpu.vector_store %arg11[%c0_23, %c768], %33 {strides = array<i32>} : memref<8x3584xf32, #tpu.memory_space<vmem>>, vector<8x256xf32>,
    %c0_24 = arith.constant 0 : index
    %c140 = arith.constant 140 : index
    %35 = vector.load %arg1[%c0_24, %c140] : memref<8x784xf32, #tpu.memory_space<vmem>>, vector<8x224xf32>
    %36 = arith.truncf %35 : vector<8x224xf32> to vector<8x224xbf16>
    %c896 = arith.constant 896 : index
    %c0_25 = arith.constant 0 : index
    %37 = vector.load %arg2[%c896, %c0_25] : memref<3136x256xbf16, #tpu.memory_space<vmem>>, vector<224x256xbf16>
    %cst_26 = arith.constant dense<0.000000e+00> : vector<8x256xf32>
    %38 = tpu.matmul %36, %37, %cst_26 {dimension_numbers = #tpu.dot_dimension_numbers<[1], [0], [0], [1], [0, 0, 1, 1], [], []>} : vector<8x224xbf16>, vector<224x256xbf16>, vector<8x256xf32> -> vector<8x256xf32>
    %39 = arith.addf %38, %2 : vector<8x256xf32>
    %cst_27 = arith.constant 0.000000e+00 : f32
    %40 = vector.broadcast %cst_27 : f32 to vector<8x256xf32>
    %41 = arith.maximumf %39, %40 : vector<8x256xf32>
    %c0_28 = arith.constant 0 : index
    %c1024 = arith.constant 1024 : index
    %42 = vector.load %arg11[%c0_28, %c1024] : memref<8x3584xf32, #tpu.memory_space<vmem>>, vector<8x256xf32>
    tpu.vector_store %arg11[%c0_28, %c1024], %41 {strides = array<i32>} : memref<8x3584xf32, #tpu.memory_space<vmem>>, vector<8x256xf32>,
    %c0_29 = arith.constant 0 : index
    %c196 = arith.constant 196 : index
    %43 = vector.load %arg1[%c0_29, %c196] : memref<8x784xf32, #tpu.memory_space<vmem>>, vector<8x224xf32>
    %44 = arith.truncf %43 : vector<8x224xf32> to vector<8x224xbf16>
    %c1120 = arith.constant 1120 : index
    %c0_30 = arith.constant 0 : index
    %45 = vector.load %arg2[%c1120, %c0_30] : memref<3136x256xbf16, #tpu.memory_space<vmem>>, vector<224x256xbf16>
    %cst_31 = arith.constant dense<0.000000e+00> : vector<8x256xf32>
    %46 = tpu.matmul %44, %45, %cst_31 {dimension_numbers = #tpu.dot_dimension_numbers<[1], [0], [0], [1], [0, 0, 1, 1], [], []>} : vector<8x224xbf16>, vector<224x256xbf16>, vector<8x256xf32> -> vector<8x256xf32>
    %47 = arith.addf %46, %2 : vector<8x256xf32>
    %cst_32 = arith.constant 0.000000e+00 : f32
    %48 = vector.broadcast %cst_32 : f32 to vector<8x256xf32>
    %49 = arith.maximumf %47, %48 : vector<8x256xf32>
    %c0_33 = arith.constant 0 : index
    %c1280 = arith.constant 1280 : index
    %50 = vector.load %arg11[%c0_33, %c1280] : memref<8x3584xf32, #tpu.memory_space<vmem>>, vector<8x256xf32>
    tpu.vector_store %arg11[%c0_33, %c1280], %49 {strides = array<i32>} : memref<8x3584xf32, #tpu.memory_space<vmem>>, vector<8x256xf32>,
    %c0_34 = arith.constant 0 : index
    %c252 = arith.constant 252 : index
    %51 = vector.load %arg1[%c0_34, %c252] : memref<8x784xf32, #tpu.memory_space<vmem>>, vector<8x224xf32>
    %52 = arith.truncf %51 : vector<8x224xf32> to vector<8x224xbf16>
    %c1344 = arith.constant 1344 : index
    %c0_35 = arith.constant 0 : index
    %53 = vector.load %arg2[%c1344, %c0_35] : memref<3136x256xbf16, #tpu.memory_space<vmem>>, vector<224x256xbf16>
    %cst_36 = arith.constant dense<0.000000e+00> : vector<8x256xf32>
    %54 = tpu.matmul %52, %53, %cst_36 {dimension_numbers = #tpu.dot_dimension_numbers<[1], [0], [0], [1], [0, 0, 1, 1], [], []>} : vector<8x224xbf16>, vector<224x256xbf16>, vector<8x256xf32> -> vector<8x256xf32>
    %55 = arith.addf %54, %2 : vector<8x256xf32>
    %cst_37 = arith.constant 0.000000e+00 : f32
    %56 = vector.broadcast %cst_37 : f32 to vector<8x256xf32>
    %57 = arith.maximumf %55, %56 : vector<8x256xf32>
    %c0_38 = arith.constant 0 : index
    %c1536 = arith.constant 1536 : index
    %58 = vector.load %arg11[%c0_38, %c1536] : memref<8x3584xf32, #tpu.memory_space<vmem>>, vector<8x256xf32>
    tpu.vector_store %arg11[%c0_38, %c1536], %57 {strides = array<i32>} : memref<8x3584xf32, #tpu.memory_space<vmem>>, vector<8x256xf32>,
    %c0_39 = arith.constant 0 : index
    %c308 = arith.constant 308 : index
    %59 = vector.load %arg1[%c0_39, %c308] : memref<8x784xf32, #tpu.memory_space<vmem>>, vector<8x224xf32>
    %60 = arith.truncf %59 : vector<8x224xf32> to vector<8x224xbf16>
    %c1568 = arith.constant 1568 : index
    %c0_40 = arith.constant 0 : index
    %61 = vector.load %arg2[%c1568, %c0_40] : memref<3136x256xbf16, #tpu.memory_space<vmem>>, vector<224x256xbf16>
    %cst_41 = arith.constant dense<0.000000e+00> : vector<8x256xf32>
    %62 = tpu.matmul %60, %61, %cst_41 {dimension_numbers = #tpu.dot_dimension_numbers<[1], [0], [0], [1], [0, 0, 1, 1], [], []>} : vector<8x224xbf16>, vector<224x256xbf16>, vector<8x256xf32> -> vector<8x256xf32>
    %63 = arith.addf %62, %2 : vector<8x256xf32>
    %cst_42 = arith.constant 0.000000e+00 : f32
    %64 = vector.broadcast %cst_42 : f32 to vector<8x256xf32>
    %65 = arith.maximumf %63, %64 : vector<8x256xf32>
    %c0_43 = arith.constant 0 : index
    %c1792 = arith.constant 1792 : index
    %66 = vector.load %arg11[%c0_43, %c1792] : memref<8x3584xf32, #tpu.memory_space<vmem>>, vector<8x256xf32>
    tpu.vector_store %arg11[%c0_43, %c1792], %65 {strides = array<i32>} : memref<8x3584xf32, #tpu.memory_space<vmem>>, vector<8x256xf32>,
    %c0_44 = arith.constant 0 : index
    %c364 = arith.constant 364 : index
    %67 = vector.load %arg1[%c0_44, %c364] : memref<8x784xf32, #tpu.memory_space<vmem>>, vector<8x224xf32>
    %68 = arith.truncf %67 : vector<8x224xf32> to vector<8x224xbf16>
    %c1792_45 = arith.constant 1792 : index
    %c0_46 = arith.constant 0 : index
    %69 = vector.load %arg2[%c1792_45, %c0_46] : memref<3136x256xbf16, #tpu.memory_space<vmem>>, vector<224x256xbf16>
    %cst_47 = arith.constant dense<0.000000e+00> : vector<8x256xf32>
    %70 = tpu.matmul %68, %69, %cst_47 {dimension_numbers = #tpu.dot_dimension_numbers<[1], [0], [0], [1], [0, 0, 1, 1], [], []>} : vector<8x224xbf16>, vector<224x256xbf16>, vector<8x256xf32> -> vector<8x256xf32>
    %71 = arith.addf %70, %2 : vector<8x256xf32>
    %cst_48 = arith.constant 0.000000e+00 : f32
    %72 = vector.broadcast %cst_48 : f32 to vector<8x256xf32>
    %73 = arith.maximumf %71, %72 : vector<8x256xf32>
    %c0_49 = arith.constant 0 : index
    %c2048 = arith.constant 2048 : index
    %74 = vector.load %arg11[%c0_49, %c2048] : memref<8x3584xf32, #tpu.memory_space<vmem>>, vector<8x256xf32>
    tpu.vector_store %arg11[%c0_49, %c2048], %73 {strides = array<i32>} : memref<8x3584xf32, #tpu.memory_space<vmem>>, vector<8x256xf32>,
    %c0_50 = arith.constant 0 : index
    %c420 = arith.constant 420 : index
    %75 = vector.load %arg1[%c0_50, %c420] : memref<8x784xf32, #tpu.memory_space<vmem>>, vector<8x224xf32>
    %76 = arith.truncf %75 : vector<8x224xf32> to vector<8x224xbf16>
    %c2016 = arith.constant 2016 : index
    %c0_51 = arith.constant 0 : index
    %77 = vector.load %arg2[%c2016, %c0_51] : memref<3136x256xbf16, #tpu.memory_space<vmem>>, vector<224x256xbf16>
    %cst_52 = arith.constant dense<0.000000e+00> : vector<8x256xf32>
    %78 = tpu.matmul %76, %77, %cst_52 {dimension_numbers = #tpu.dot_dimension_numbers<[1], [0], [0], [1], [0, 0, 1, 1], [], []>} : vector<8x224xbf16>, vector<224x256xbf16>, vector<8x256xf32> -> vector<8x256xf32>
    %79 = arith.addf %78, %2 : vector<8x256xf32>
    %cst_53 = arith.constant 0.000000e+00 : f32
    %80 = vector.broadcast %cst_53 : f32 to vector<8x256xf32>
    %81 = arith.maximumf %79, %80 : vector<8x256xf32>
    %c0_54 = arith.constant 0 : index
    %c2304 = arith.constant 2304 : index
    %82 = vector.load %arg11[%c0_54, %c2304] : memref<8x3584xf32, #tpu.memory_space<vmem>>, vector<8x256xf32>
    tpu.vector_store %arg11[%c0_54, %c2304], %81 {strides = array<i32>} : memref<8x3584xf32, #tpu.memory_space<vmem>>, vector<8x256xf32>,
    %c0_55 = arith.constant 0 : index
    %c476 = arith.constant 476 : index
    %83 = vector.load %arg1[%c0_55, %c476] : memref<8x784xf32, #tpu.memory_space<vmem>>, vector<8x224xf32>
    %84 = arith.truncf %83 : vector<8x224xf32> to vector<8x224xbf16>
    %c2240 = arith.constant 2240 : index
    %c0_56 = arith.constant 0 : index
    %85 = vector.load %arg2[%c2240, %c0_56] : memref<3136x256xbf16, #tpu.memory_space<vmem>>, vector<224x256xbf16>
    %cst_57 = arith.constant dense<0.000000e+00> : vector<8x256xf32>
    %86 = tpu.matmul %84, %85, %cst_57 {dimension_numbers = #tpu.dot_dimension_numbers<[1], [0], [0], [1], [0, 0, 1, 1], [], []>} : vector<8x224xbf16>, vector<224x256xbf16>, vector<8x256xf32> -> vector<8x256xf32>
    %87 = arith.addf %86, %2 : vector<8x256xf32>
    %cst_58 = arith.constant 0.000000e+00 : f32
    %88 = vector.broadcast %cst_58 : f32 to vector<8x256xf32>
    %89 = arith.maximumf %87, %88 : vector<8x256xf32>
    %c0_59 = arith.constant 0 : index
    %c2560 = arith.constant 2560 : index
    %90 = vector.load %arg11[%c0_59, %c2560] : memref<8x3584xf32, #tpu.memory_space<vmem>>, vector<8x256xf32>
    tpu.vector_store %arg11[%c0_59, %c2560], %89 {strides = array<i32>} : memref<8x3584xf32, #tpu.memory_space<vmem>>, vector<8x256xf32>,
    %c0_60 = arith.constant 0 : index
    %c532 = arith.constant 532 : index
    %91 = vector.load %arg1[%c0_60, %c532] : memref<8x784xf32, #tpu.memory_space<vmem>>, vector<8x224xf32>
    %92 = arith.truncf %91 : vector<8x224xf32> to vector<8x224xbf16>
    %c2464 = arith.constant 2464 : index
    %c0_61 = arith.constant 0 : index
    %93 = vector.load %arg2[%c2464, %c0_61] : memref<3136x256xbf16, #tpu.memory_space<vmem>>, vector<224x256xbf16>
    %cst_62 = arith.constant dense<0.000000e+00> : vector<8x256xf32>
    %94 = tpu.matmul %92, %93, %cst_62 {dimension_numbers = #tpu.dot_dimension_numbers<[1], [0], [0], [1], [0, 0, 1, 1], [], []>} : vector<8x224xbf16>, vector<224x256xbf16>, vector<8x256xf32> -> vector<8x256xf32>
    %95 = arith.addf %94, %2 : vector<8x256xf32>
    %cst_63 = arith.constant 0.000000e+00 : f32
    %96 = vector.broadcast %cst_63 : f32 to vector<8x256xf32>
    %97 = arith.maximumf %95, %96 : vector<8x256xf32>
    %c0_64 = arith.constant 0 : index
    %c2816 = arith.constant 2816 : index
    %98 = vector.load %arg11[%c0_64, %c2816] : memref<8x3584xf32, #tpu.memory_space<vmem>>, vector<8x256xf32>
    tpu.vector_store %arg11[%c0_64, %c2816], %97 {strides = array<i32>} : memref<8x3584xf32, #tpu.memory_space<vmem>>, vector<8x256xf32>,
    %c0_65 = arith.constant 0 : index
    %c560 = arith.constant 560 : index
    %99 = vector.load %arg1[%c0_65, %c560] : memref<8x784xf32, #tpu.memory_space<vmem>>, vector<8x224xf32>
    %100 = arith.truncf %99 : vector<8x224xf32> to vector<8x224xbf16>
    %c2688 = arith.constant 2688 : index
    %c0_66 = arith.constant 0 : index
    %101 = vector.load %arg2[%c2688, %c0_66] : memref<3136x256xbf16, #tpu.memory_space<vmem>>, vector<224x256xbf16>
    %cst_67 = arith.constant dense<0.000000e+00> : vector<8x256xf32>
    %102 = tpu.matmul %100, %101, %cst_67 {dimension_numbers = #tpu.dot_dimension_numbers<[1], [0], [0], [1], [0, 0, 1, 1], [], []>} : vector<8x224xbf16>, vector<224x256xbf16>, vector<8x256xf32> -> vector<8x256xf32>
    %103 = arith.addf %102, %2 : vector<8x256xf32>
    %cst_68 = arith.constant 0.000000e+00 : f32
    %104 = vector.broadcast %cst_68 : f32 to vector<8x256xf32>
    %105 = arith.maximumf %103, %104 : vector<8x256xf32>
    %c0_69 = arith.constant 0 : index
    %c3072 = arith.constant 3072 : index
    %106 = vector.load %arg11[%c0_69, %c3072] : memref<8x3584xf32, #tpu.memory_space<vmem>>, vector<8x256xf32>
    tpu.vector_store %arg11[%c0_69, %c3072], %105 {strides = array<i32>} : memref<8x3584xf32, #tpu.memory_space<vmem>>, vector<8x256xf32>,
    %c0_70 = arith.constant 0 : index
    %c560_71 = arith.constant 560 : index
    %107 = vector.load %arg1[%c0_70, %c560_71] : memref<8x784xf32, #tpu.memory_space<vmem>>, vector<8x224xf32>
    %108 = arith.truncf %107 : vector<8x224xf32> to vector<8x224xbf16>
    %c2912 = arith.constant 2912 : index
    %c0_72 = arith.constant 0 : index
    %109 = vector.load %arg2[%c2912, %c0_72] : memref<3136x256xbf16, #tpu.memory_space<vmem>>, vector<224x256xbf16>
    %cst_73 = arith.constant dense<0.000000e+00> : vector<8x256xf32>
    %110 = tpu.matmul %108, %109, %cst_73 {dimension_numbers = #tpu.dot_dimension_numbers<[1], [0], [0], [1], [0, 0, 1, 1], [], []>} : vector<8x224xbf16>, vector<224x256xbf16>, vector<8x256xf32> -> vector<8x256xf32>
    %111 = arith.addf %110, %2 : vector<8x256xf32>
    %cst_74 = arith.constant 0.000000e+00 : f32
    %112 = vector.broadcast %cst_74 : f32 to vector<8x256xf32>
    %113 = arith.maximumf %111, %112 : vector<8x256xf32>
    %c0_75 = arith.constant 0 : index
    %c3328 = arith.constant 3328 : index
    %114 = vector.load %arg11[%c0_75, %c3328] : memref<8x3584xf32, #tpu.memory_space<vmem>>, vector<8x256xf32>
    tpu.vector_store %arg11[%c0_75, %c3328], %113 {strides = array<i32>} : memref<8x3584xf32, #tpu.memory_space<vmem>>, vector<8x256xf32>,
    %c0_76 = arith.constant 0 : index
    %c0_77 = arith.constant 0 : index
    %115 = vector.load %arg11[%c0_76, %c0_77] : memref<8x3584xf32, #tpu.memory_space<vmem>>, vector<8x256xf32>
    %c0_78 = arith.constant 0 : index
    %c16 = arith.constant 16 : index
    %116 = vector.load %arg11[%c0_78, %c16] : memref<8x3584xf32, #tpu.memory_space<vmem>>, vector<8x256xf32>
    %117 = arith.maximumf %115, %116 : vector<8x256xf32>
    %c0_79 = arith.constant 0 : index
    %c0_80 = arith.constant 0 : index
    %118 = vector.load %arg11[%c0_79, %c0_80] : memref<8x3584xf32, #tpu.memory_space<vmem>>, vector<8x256xf32>
    tpu.vector_store %arg11[%c0_79, %c0_80], %117 {strides = array<i32>} : memref<8x3584xf32, #tpu.memory_space<vmem>>, vector<8x256xf32>,
    %c0_81 = arith.constant 0 : index
    %c256_82 = arith.constant 256 : index
    %119 = vector.load %arg11[%c0_81, %c256_82] : memref<8x3584xf32, #tpu.memory_space<vmem>>, vector<8x256xf32>
    %c0_83 = arith.constant 0 : index
    %c272 = arith.constant 272 : index
    %120 = vector.load %arg11[%c0_83, %c272] : memref<8x3584xf32, #tpu.memory_space<vmem>>, vector<8x256xf32>
    %121 = arith.maximumf %119, %120 : vector<8x256xf32>
    %c0_84 = arith.constant 0 : index
    %c256_85 = arith.constant 256 : index
    %122 = vector.load %arg11[%c0_84, %c256_85] : memref<8x3584xf32, #tpu.memory_space<vmem>>, vector<8x256xf32>
    tpu.vector_store %arg11[%c0_84, %c256_85], %121 {strides = array<i32>} : memref<8x3584xf32, #tpu.memory_space<vmem>>, vector<8x256xf32>,
    %c0_86 = arith.constant 0 : index
    %c512_87 = arith.constant 512 : index
    %123 = vector.load %arg11[%c0_86, %c512_87] : memref<8x3584xf32, #tpu.memory_space<vmem>>, vector<8x256xf32>
    %c0_88 = arith.constant 0 : index
    %c528 = arith.constant 528 : index
    %124 = vector.load %arg11[%c0_88, %c528] : memref<8x3584xf32, #tpu.memory_space<vmem>>, vector<8x256xf32>
    %125 = arith.maximumf %123, %124 : vector<8x256xf32>
    %c0_89 = arith.constant 0 : index
    %c512_90 = arith.constant 512 : index
    %126 = vector.load %arg11[%c0_89, %c512_90] : memref<8x3584xf32, #tpu.memory_space<vmem>>, vector<8x256xf32>
    tpu.vector_store %arg11[%c0_89, %c512_90], %125 {strides = array<i32>} : memref<8x3584xf32, #tpu.memory_space<vmem>>, vector<8x256xf32>,
    %c0_91 = arith.constant 0 : index
    %c768_92 = arith.constant 768 : index
    %127 = vector.load %arg11[%c0_91, %c768_92] : memref<8x3584xf32, #tpu.memory_space<vmem>>, vector<8x256xf32>
    %c0_93 = arith.constant 0 : index
    %c784 = arith.constant 784 : index
    %128 = vector.load %arg11[%c0_93, %c784] : memref<8x3584xf32, #tpu.memory_space<vmem>>, vector<8x256xf32>
    %129 = arith.maximumf %127, %128 : vector<8x256xf32>
    %c0_94 = arith.constant 0 : index
    %c768_95 = arith.constant 768 : index
    %130 = vector.load %arg11[%c0_94, %c768_95] : memref<8x3584xf32, #tpu.memory_space<vmem>>, vector<8x256xf32>
    tpu.vector_store %arg11[%c0_94, %c768_95], %129 {strides = array<i32>} : memref<8x3584xf32, #tpu.memory_space<vmem>>, vector<8x256xf32>,
    %c0_96 = arith.constant 0 : index
    %c1024_97 = arith.constant 1024 : index
    %131 = vector.load %arg11[%c0_96, %c1024_97] : memref<8x3584xf32, #tpu.memory_space<vmem>>, vector<8x256xf32>
    %c0_98 = arith.constant 0 : index
    %c1040 = arith.constant 1040 : index
    %132 = vector.load %arg11[%c0_98, %c1040] : memref<8x3584xf32, #tpu.memory_space<vmem>>, vector<8x256xf32>
    %133 = arith.maximumf %131, %132 : vector<8x256xf32>
    %c0_99 = arith.constant 0 : index
    %c1024_100 = arith.constant 1024 : index
    %134 = vector.load %arg11[%c0_99, %c1024_100] : memref<8x3584xf32, #tpu.memory_space<vmem>>, vector<8x256xf32>
    tpu.vector_store %arg11[%c0_99, %c1024_100], %133 {strides = array<i32>} : memref<8x3584xf32, #tpu.memory_space<vmem>>, vector<8x256xf32>,
    %c0_101 = arith.constant 0 : index
    %c1280_102 = arith.constant 1280 : index
    %135 = vector.load %arg11[%c0_101, %c1280_102] : memref<8x3584xf32, #tpu.memory_space<vmem>>, vector<8x256xf32>
    %c0_103 = arith.constant 0 : index
    %c1296 = arith.constant 1296 : index
    %136 = vector.load %arg11[%c0_103, %c1296] : memref<8x3584xf32, #tpu.memory_space<vmem>>, vector<8x256xf32>
    %137 = arith.maximumf %135, %136 : vector<8x256xf32>
    %c0_104 = arith.constant 0 : index
    %c1280_105 = arith.constant 1280 : index
    %138 = vector.load %arg11[%c0_104, %c1280_105] : memref<8x3584xf32, #tpu.memory_space<vmem>>, vector<8x256xf32>
    tpu.vector_store %arg11[%c0_104, %c1280_105], %137 {strides = array<i32>} : memref<8x3584xf32, #tpu.memory_space<vmem>>, vector<8x256xf32>,
    %c0_106 = arith.constant 0 : index
    %c1536_107 = arith.constant 1536 : index
    %139 = vector.load %arg11[%c0_106, %c1536_107] : memref<8x3584xf32, #tpu.memory_space<vmem>>, vector<8x256xf32>
    %c0_108 = arith.constant 0 : index
    %c1552 = arith.constant 1552 : index
    %140 = vector.load %arg11[%c0_108, %c1552] : memref<8x3584xf32, #tpu.memory_space<vmem>>, vector<8x256xf32>
    %141 = arith.maximumf %139, %140 : vector<8x256xf32>
    %c0_109 = arith.constant 0 : index
    %c1536_110 = arith.constant 1536 : index
    %142 = vector.load %arg11[%c0_109, %c1536_110] : memref<8x3584xf32, #tpu.memory_space<vmem>>, vector<8x256xf32>
    tpu.vector_store %arg11[%c0_109, %c1536_110], %141 {strides = array<i32>} : memref<8x3584xf32, #tpu.memory_space<vmem>>, vector<8x256xf32>,
    %c0_111 = arith.constant 0 : index
    %c1792_112 = arith.constant 1792 : index
    %143 = vector.load %arg11[%c0_111, %c1792_112] : memref<8x3584xf32, #tpu.memory_space<vmem>>, vector<8x256xf32>
    %c0_113 = arith.constant 0 : index
    %c1808 = arith.constant 1808 : index
    %144 = vector.load %arg11[%c0_113, %c1808] : memref<8x3584xf32, #tpu.memory_space<vmem>>, vector<8x256xf32>
    %145 = arith.maximumf %143, %144 : vector<8x256xf32>
    %c0_114 = arith.constant 0 : index
    %c1792_115 = arith.constant 1792 : index
    %146 = vector.load %arg11[%c0_114, %c1792_115] : memref<8x3584xf32, #tpu.memory_space<vmem>>, vector<8x256xf32>
    tpu.vector_store %arg11[%c0_114, %c1792_115], %145 {strides = array<i32>} : memref<8x3584xf32, #tpu.memory_space<vmem>>, vector<8x256xf32>,
    %c0_116 = arith.constant 0 : index
    %c2048_117 = arith.constant 2048 : index
    %147 = vector.load %arg11[%c0_116, %c2048_117] : memref<8x3584xf32, #tpu.memory_space<vmem>>, vector<8x256xf32>
    %c0_118 = arith.constant 0 : index
    %c2064 = arith.constant 2064 : index
    %148 = vector.load %arg11[%c0_118, %c2064] : memref<8x3584xf32, #tpu.memory_space<vmem>>, vector<8x256xf32>
    %149 = arith.maximumf %147, %148 : vector<8x256xf32>
    %c0_119 = arith.constant 0 : index
    %c2048_120 = arith.constant 2048 : index
    %150 = vector.load %arg11[%c0_119, %c2048_120] : memref<8x3584xf32, #tpu.memory_space<vmem>>, vector<8x256xf32>
    tpu.vector_store %arg11[%c0_119, %c2048_120], %149 {strides = array<i32>} : memref<8x3584xf32, #tpu.memory_space<vmem>>, vector<8x256xf32>,
    %c0_121 = arith.constant 0 : index
    %c2304_122 = arith.constant 2304 : index
    %151 = vector.load %arg11[%c0_121, %c2304_122] : memref<8x3584xf32, #tpu.memory_space<vmem>>, vector<8x256xf32>
    %c0_123 = arith.constant 0 : index
    %c2320 = arith.constant 2320 : index
    %152 = vector.load %arg11[%c0_123, %c2320] : memref<8x3584xf32, #tpu.memory_space<vmem>>, vector<8x256xf32>
    %153 = arith.maximumf %151, %152 : vector<8x256xf32>
    %c0_124 = arith.constant 0 : index
    %c2304_125 = arith.constant 2304 : index
    %154 = vector.load %arg11[%c0_124, %c2304_125] : memref<8x3584xf32, #tpu.memory_space<vmem>>, vector<8x256xf32>
    tpu.vector_store %arg11[%c0_124, %c2304_125], %153 {strides = array<i32>} : memref<8x3584xf32, #tpu.memory_space<vmem>>, vector<8x256xf32>,
    %c0_126 = arith.constant 0 : index
    %c2560_127 = arith.constant 2560 : index
    %155 = vector.load %arg11[%c0_126, %c2560_127] : memref<8x3584xf32, #tpu.memory_space<vmem>>, vector<8x256xf32>
    %c0_128 = arith.constant 0 : index
    %c2576 = arith.constant 2576 : index
    %156 = vector.load %arg11[%c0_128, %c2576] : memref<8x3584xf32, #tpu.memory_space<vmem>>, vector<8x256xf32>
    %157 = arith.maximumf %155, %156 : vector<8x256xf32>
    %c0_129 = arith.constant 0 : index
    %c2560_130 = arith.constant 2560 : index
    %158 = vector.load %arg11[%c0_129, %c2560_130] : memref<8x3584xf32, #tpu.memory_space<vmem>>, vector<8x256xf32>
    tpu.vector_store %arg11[%c0_129, %c2560_130], %157 {strides = array<i32>} : memref<8x3584xf32, #tpu.memory_space<vmem>>, vector<8x256xf32>,
    %c0_131 = arith.constant 0 : index
    %c2816_132 = arith.constant 2816 : index
    %159 = vector.load %arg11[%c0_131, %c2816_132] : memref<8x3584xf32, #tpu.memory_space<vmem>>, vector<8x256xf32>
    %c0_133 = arith.constant 0 : index
    %c2832 = arith.constant 2832 : index
    %160 = vector.load %arg11[%c0_133, %c2832] : memref<8x3584xf32, #tpu.memory_space<vmem>>, vector<8x256xf32>
    %161 = arith.maximumf %159, %160 : vector<8x256xf32>
    %c0_134 = arith.constant 0 : index
    %c2816_135 = arith.constant 2816 : index
    %162 = vector.load %arg11[%c0_134, %c2816_135] : memref<8x3584xf32, #tpu.memory_space<vmem>>, vector<8x256xf32>
    tpu.vector_store %arg11[%c0_134, %c2816_135], %161 {strides = array<i32>} : memref<8x3584xf32, #tpu.memory_space<vmem>>, vector<8x256xf32>,
    %c0_136 = arith.constant 0 : index
    %c3072_137 = arith.constant 3072 : index
    %163 = vector.load %arg11[%c0_136, %c3072_137] : memref<8x3584xf32, #tpu.memory_space<vmem>>, vector<8x256xf32>
    %c0_138 = arith.constant 0 : index
    %c3088 = arith.constant 3088 : index
    %164 = vector.load %arg11[%c0_138, %c3088] : memref<8x3584xf32, #tpu.memory_space<vmem>>, vector<8x256xf32>
    %165 = arith.maximumf %163, %164 : vector<8x256xf32>
    %c0_139 = arith.constant 0 : index
    %c3072_140 = arith.constant 3072 : index
    %166 = vector.load %arg11[%c0_139, %c3072_140] : memref<8x3584xf32, #tpu.memory_space<vmem>>, vector<8x256xf32>
    tpu.vector_store %arg11[%c0_139, %c3072_140], %165 {strides = array<i32>} : memref<8x3584xf32, #tpu.memory_space<vmem>>, vector<8x256xf32>,
    %c0_141 = arith.constant 0 : index
    %c0_142 = arith.constant 0 : index
    %167 = vector.load %arg11[%c0_141, %c0_142] : memref<8x3584xf32, #tpu.memory_space<vmem>>, vector<8x256xf32>
    %c0_143 = arith.constant 0 : index
    %c256_144 = arith.constant 256 : index
    %168 = vector.load %arg11[%c0_143, %c256_144] : memref<8x3584xf32, #tpu.memory_space<vmem>>, vector<8x256xf32>
    %169 = arith.maximumf %167, %168 : vector<8x256xf32>
    %c0_145 = arith.constant 0 : index
    %c0_146 = arith.constant 0 : index
    %170 = vector.load %arg12[%c0_145, %c0_146] : memref<8x3072xf32, #tpu.memory_space<vmem>>, vector<8x256xf32>
    tpu.vector_store %arg12[%c0_145, %c0_146], %169 {strides = array<i32>} : memref<8x3072xf32, #tpu.memory_space<vmem>>, vector<8x256xf32>,
    %c0_147 = arith.constant 0 : index
    %c256_148 = arith.constant 256 : index
    %171 = vector.load %arg11[%c0_147, %c256_148] : memref<8x3584xf32, #tpu.memory_space<vmem>>, vector<8x256xf32>
    %c0_149 = arith.constant 0 : index
    %c512_150 = arith.constant 512 : index
    %172 = vector.load %arg11[%c0_149, %c512_150] : memref<8x3584xf32, #tpu.memory_space<vmem>>, vector<8x256xf32>
    %173 = arith.maximumf %171, %172 : vector<8x256xf32>
    %c0_151 = arith.constant 0 : index
    %c256_152 = arith.constant 256 : index
    %174 = vector.load %arg12[%c0_151, %c256_152] : memref<8x3072xf32, #tpu.memory_space<vmem>>, vector<8x256xf32>
    tpu.vector_store %arg12[%c0_151, %c256_152], %173 {strides = array<i32>} : memref<8x3072xf32, #tpu.memory_space<vmem>>, vector<8x256xf32>,
    %c0_153 = arith.constant 0 : index
    %c512_154 = arith.constant 512 : index
    %175 = vector.load %arg11[%c0_153, %c512_154] : memref<8x3584xf32, #tpu.memory_space<vmem>>, vector<8x256xf32>
    %c0_155 = arith.constant 0 : index
    %c768_156 = arith.constant 768 : index
    %176 = vector.load %arg11[%c0_155, %c768_156] : memref<8x3584xf32, #tpu.memory_space<vmem>>, vector<8x256xf32>
    %177 = arith.maximumf %175, %176 : vector<8x256xf32>
    %c0_157 = arith.constant 0 : index
    %c512_158 = arith.constant 512 : index
    %178 = vector.load %arg12[%c0_157, %c512_158] : memref<8x3072xf32, #tpu.memory_space<vmem>>, vector<8x256xf32>
    tpu.vector_store %arg12[%c0_157, %c512_158], %177 {strides = array<i32>} : memref<8x3072xf32, #tpu.memory_space<vmem>>, vector<8x256xf32>,
    %c0_159 = arith.constant 0 : index
    %c768_160 = arith.constant 768 : index
    %179 = vector.load %arg11[%c0_159, %c768_160] : memref<8x3584xf32, #tpu.memory_space<vmem>>, vector<8x256xf32>
    %c0_161 = arith.constant 0 : index
    %c1024_162 = arith.constant 1024 : index
    %180 = vector.load %arg11[%c0_161, %c1024_162] : memref<8x3584xf32, #tpu.memory_space<vmem>>, vector<8x256xf32>
    %181 = arith.maximumf %179, %180 : vector<8x256xf32>
    %c0_163 = arith.constant 0 : index
    %c768_164 = arith.constant 768 : index
    %182 = vector.load %arg12[%c0_163, %c768_164] : memref<8x3072xf32, #tpu.memory_space<vmem>>, vector<8x256xf32>
    tpu.vector_store %arg12[%c0_163, %c768_164], %181 {strides = array<i32>} : memref<8x3072xf32, #tpu.memory_space<vmem>>, vector<8x256xf32>,
    %c0_165 = arith.constant 0 : index
    %c1024_166 = arith.constant 1024 : index
    %183 = vector.load %arg11[%c0_165, %c1024_166] : memref<8x3584xf32, #tpu.memory_space<vmem>>, vector<8x256xf32>
    %c0_167 = arith.constant 0 : index
    %c1280_168 = arith.constant 1280 : index
    %184 = vector.load %arg11[%c0_167, %c1280_168] : memref<8x3584xf32, #tpu.memory_space<vmem>>, vector<8x256xf32>
    %185 = arith.maximumf %183, %184 : vector<8x256xf32>
    %c0_169 = arith.constant 0 : index
    %c1024_170 = arith.constant 1024 : index
    %186 = vector.load %arg12[%c0_169, %c1024_170] : memref<8x3072xf32, #tpu.memory_space<vmem>>, vector<8x256xf32>
    tpu.vector_store %arg12[%c0_169, %c1024_170], %185 {strides = array<i32>} : memref<8x3072xf32, #tpu.memory_space<vmem>>, vector<8x256xf32>,
    %c0_171 = arith.constant 0 : index
    %c1280_172 = arith.constant 1280 : index
    %187 = vector.load %arg11[%c0_171, %c1280_172] : memref<8x3584xf32, #tpu.memory_space<vmem>>, vector<8x256xf32>
    %c0_173 = arith.constant 0 : index
    %c1536_174 = arith.constant 1536 : index
    %188 = vector.load %arg11[%c0_173, %c1536_174] : memref<8x3584xf32, #tpu.memory_space<vmem>>, vector<8x256xf32>
    %189 = arith.maximumf %187, %188 : vector<8x256xf32>
    %c0_175 = arith.constant 0 : index
    %c1280_176 = arith.constant 1280 : index
    %190 = vector.load %arg12[%c0_175, %c1280_176] : memref<8x3072xf32, #tpu.memory_space<vmem>>, vector<8x256xf32>
    tpu.vector_store %arg12[%c0_175, %c1280_176], %189 {strides = array<i32>} : memref<8x3072xf32, #tpu.memory_space<vmem>>, vector<8x256xf32>,
    %c0_177 = arith.constant 0 : index
    %c1536_178 = arith.constant 1536 : index
    %191 = vector.load %arg11[%c0_177, %c1536_178] : memref<8x3584xf32, #tpu.memory_space<vmem>>, vector<8x256xf32>
    %c0_179 = arith.constant 0 : index
    %c1792_180 = arith.constant 1792 : index
    %192 = vector.load %arg11[%c0_179, %c1792_180] : memref<8x3584xf32, #tpu.memory_space<vmem>>, vector<8x256xf32>
    %193 = arith.maximumf %191, %192 : vector<8x256xf32>
    %c0_181 = arith.constant 0 : index
    %c1536_182 = arith.constant 1536 : index
    %194 = vector.load %arg12[%c0_181, %c1536_182] : memref<8x3072xf32, #tpu.memory_space<vmem>>, vector<8x256xf32>
    tpu.vector_store %arg12[%c0_181, %c1536_182], %193 {strides = array<i32>} : memref<8x3072xf32, #tpu.memory_space<vmem>>, vector<8x256xf32>,
    %c0_183 = arith.constant 0 : index
    %c1792_184 = arith.constant 1792 : index
    %195 = vector.load %arg11[%c0_183, %c1792_184] : memref<8x3584xf32, #tpu.memory_space<vmem>>, vector<8x256xf32>
    %c0_185 = arith.constant 0 : index
    %c2048_186 = arith.constant 2048 : index
    %196 = vector.load %arg11[%c0_185, %c2048_186] : memref<8x3584xf32, #tpu.memory_space<vmem>>, vector<8x256xf32>
    %197 = arith.maximumf %195, %196 : vector<8x256xf32>
    %c0_187 = arith.constant 0 : index
    %c1792_188 = arith.constant 1792 : index
    %198 = vector.load %arg12[%c0_187, %c1792_188] : memref<8x3072xf32, #tpu.memory_space<vmem>>, vector<8x256xf32>
    tpu.vector_store %arg12[%c0_187, %c1792_188], %197 {strides = array<i32>} : memref<8x3072xf32, #tpu.memory_space<vmem>>, vector<8x256xf32>,
    %c0_189 = arith.constant 0 : index
    %c2048_190 = arith.constant 2048 : index
    %199 = vector.load %arg11[%c0_189, %c2048_190] : memref<8x3584xf32, #tpu.memory_space<vmem>>, vector<8x256xf32>
    %c0_191 = arith.constant 0 : index
    %c2304_192 = arith.constant 2304 : index
    %200 = vector.load %arg11[%c0_191, %c2304_192] : memref<8x3584xf32, #tpu.memory_space<vmem>>, vector<8x256xf32>
    %201 = arith.maximumf %199, %200 : vector<8x256xf32>
    %c0_193 = arith.constant 0 : index
    %c2048_194 = arith.constant 2048 : index
    %202 = vector.load %arg12[%c0_193, %c2048_194] : memref<8x3072xf32, #tpu.memory_space<vmem>>, vector<8x256xf32>
    tpu.vector_store %arg12[%c0_193, %c2048_194], %201 {strides = array<i32>} : memref<8x3072xf32, #tpu.memory_space<vmem>>, vector<8x256xf32>,
    %c0_195 = arith.constant 0 : index
    %c2304_196 = arith.constant 2304 : index
    %203 = vector.load %arg11[%c0_195, %c2304_196] : memref<8x3584xf32, #tpu.memory_space<vmem>>, vector<8x256xf32>
    %c0_197 = arith.constant 0 : index
    %c2560_198 = arith.constant 2560 : index
    %204 = vector.load %arg11[%c0_197, %c2560_198] : memref<8x3584xf32, #tpu.memory_space<vmem>>, vector<8x256xf32>
    %205 = arith.maximumf %203, %204 : vector<8x256xf32>
    %c0_199 = arith.constant 0 : index
    %c2304_200 = arith.constant 2304 : index
    %206 = vector.load %arg12[%c0_199, %c2304_200] : memref<8x3072xf32, #tpu.memory_space<vmem>>, vector<8x256xf32>
    tpu.vector_store %arg12[%c0_199, %c2304_200], %205 {strides = array<i32>} : memref<8x3072xf32, #tpu.memory_space<vmem>>, vector<8x256xf32>,
    %c0_201 = arith.constant 0 : index
    %c2560_202 = arith.constant 2560 : index
    %207 = vector.load %arg11[%c0_201, %c2560_202] : memref<8x3584xf32, #tpu.memory_space<vmem>>, vector<8x256xf32>
    %c0_203 = arith.constant 0 : index
    %c2816_204 = arith.constant 2816 : index
    %208 = vector.load %arg11[%c0_203, %c2816_204] : memref<8x3584xf32, #tpu.memory_space<vmem>>, vector<8x256xf32>
    %209 = arith.maximumf %207, %208 : vector<8x256xf32>
    %c0_205 = arith.constant 0 : index
    %c2560_206 = arith.constant 2560 : index
    %210 = vector.load %arg12[%c0_205, %c2560_206] : memref<8x3072xf32, #tpu.memory_space<vmem>>, vector<8x256xf32>
    tpu.vector_store %arg12[%c0_205, %c2560_206], %209 {strides = array<i32>} : memref<8x3072xf32, #tpu.memory_space<vmem>>, vector<8x256xf32>,
    %c0_207 = arith.constant 0 : index
    %c2816_208 = arith.constant 2816 : index
    %211 = vector.load %arg11[%c0_207, %c2816_208] : memref<8x3584xf32, #tpu.memory_space<vmem>>, vector<8x256xf32>
    %c0_209 = arith.constant 0 : index
    %c3072_210 = arith.constant 3072 : index
    %212 = vector.load %arg11[%c0_209, %c3072_210] : memref<8x3584xf32, #tpu.memory_space<vmem>>, vector<8x256xf32>
    %213 = arith.maximumf %211, %212 : vector<8x256xf32>
    %c0_211 = arith.constant 0 : index
    %c2816_212 = arith.constant 2816 : index
    %214 = vector.load %arg12[%c0_211, %c2816_212] : memref<8x3072xf32, #tpu.memory_space<vmem>>, vector<8x256xf32>
    tpu.vector_store %arg12[%c0_211, %c2816_212], %213 {strides = array<i32>} : memref<8x3072xf32, #tpu.memory_space<vmem>>, vector<8x256xf32>,
    %c0_213 = arith.constant 0 : index
    %c0_214 = arith.constant 0 : index
    %215 = vector.load %arg5[%c0_213, %c0_214] : memref<1x256xf32, #tpu.memory_space<vmem>>, vector<1x256xf32>
    %216 = vector.shape_cast %215 : vector<1x256xf32> to vector<1x256xf32>
    %217 = vector.broadcast %216 : vector<1x256xf32> to vector<8x256xf32>
    %c0_215 = arith.constant 0 : index
    %c0_216 = arith.constant 0 : index
    %218 = vector.load %arg4[%c0_215, %c0_216] : memref<1024x256xbf16, #tpu.memory_space<vmem>>, vector<1024x256xbf16>
    %c0_217 = arith.constant 0 : index
    %c0_218 = arith.constant 0 : index
    %219 = vector.load %arg12[%c0_217, %c0_218] : memref<8x3072xf32, #tpu.memory_space<vmem>>, vector<8x1024xf32>
    %220 = arith.truncf %219 : vector<8x1024xf32> to vector<8x1024xbf16>
    %cst_219 = arith.constant dense<0.000000e+00> : vector<8x256xf32>
    %221 = tpu.matmul %220, %218, %cst_219 {dimension_numbers = #tpu.dot_dimension_numbers<[1], [0], [0], [1], [0, 0, 1, 1], [], []>} : vector<8x1024xbf16>, vector<1024x256xbf16>, vector<8x256xf32> -> vector<8x256xf32>
    %222 = arith.addf %221, %217 : vector<8x256xf32>
    %cst_220 = arith.constant 0.000000e+00 : f32
    %223 = vector.broadcast %cst_220 : f32 to vector<8x256xf32>
    %224 = arith.maximumf %222, %223 : vector<8x256xf32>
    %c0_221 = arith.constant 0 : index
    %c0_222 = arith.constant 0 : index
    %225 = vector.load %arg13[%c0_221, %c0_222] : memref<8x1280xf32, #tpu.memory_space<vmem>>, vector<8x256xf32>
    tpu.vector_store %arg13[%c0_221, %c0_222], %224 {strides = array<i32>} : memref<8x1280xf32, #tpu.memory_space<vmem>>, vector<8x256xf32>,
    %c0_223 = arith.constant 0 : index
    %c512_224 = arith.constant 512 : index
    %226 = vector.load %arg12[%c0_223, %c512_224] : memref<8x3072xf32, #tpu.memory_space<vmem>>, vector<8x1024xf32>
    %227 = arith.truncf %226 : vector<8x1024xf32> to vector<8x1024xbf16>
    %cst_225 = arith.constant dense<0.000000e+00> : vector<8x256xf32>
    %228 = tpu.matmul %227, %218, %cst_225 {dimension_numbers = #tpu.dot_dimension_numbers<[1], [0], [0], [1], [0, 0, 1, 1], [], []>} : vector<8x1024xbf16>, vector<1024x256xbf16>, vector<8x256xf32> -> vector<8x256xf32>
    %229 = arith.addf %228, %217 : vector<8x256xf32>
    %cst_226 = arith.constant 0.000000e+00 : f32
    %230 = vector.broadcast %cst_226 : f32 to vector<8x256xf32>
    %231 = arith.maximumf %229, %230 : vector<8x256xf32>
    %c0_227 = arith.constant 0 : index
    %c256_228 = arith.constant 256 : index
    %232 = vector.load %arg13[%c0_227, %c256_228] : memref<8x1280xf32, #tpu.memory_space<vmem>>, vector<8x256xf32>
    tpu.vector_store %arg13[%c0_227, %c256_228], %231 {strides = array<i32>} : memref<8x1280xf32, #tpu.memory_space<vmem>>, vector<8x256xf32>,
    %c0_229 = arith.constant 0 : index
    %c1024_230 = arith.constant 1024 : index
    %233 = vector.load %arg12[%c0_229, %c1024_230] : memref<8x3072xf32, #tpu.memory_space<vmem>>, vector<8x1024xf32>
    %234 = arith.truncf %233 : vector<8x1024xf32> to vector<8x1024xbf16>
    %cst_231 = arith.constant dense<0.000000e+00> : vector<8x256xf32>
    %235 = tpu.matmul %234, %218, %cst_231 {dimension_numbers = #tpu.dot_dimension_numbers<[1], [0], [0], [1], [0, 0, 1, 1], [], []>} : vector<8x1024xbf16>, vector<1024x256xbf16>, vector<8x256xf32> -> vector<8x256xf32>
    %236 = arith.addf %235, %217 : vector<8x256xf32>
    %cst_232 = arith.constant 0.000000e+00 : f32
    %237 = vector.broadcast %cst_232 : f32 to vector<8x256xf32>
    %238 = arith.maximumf %236, %237 : vector<8x256xf32>
    %c0_233 = arith.constant 0 : index
    %c512_234 = arith.constant 512 : index
    %239 = vector.load %arg13[%c0_233, %c512_234] : memref<8x1280xf32, #tpu.memory_space<vmem>>, vector<8x256xf32>
    tpu.vector_store %arg13[%c0_233, %c512_234], %238 {strides = array<i32>} : memref<8x1280xf32, #tpu.memory_space<vmem>>, vector<8x256xf32>,
    %c0_235 = arith.constant 0 : index
    %c1536_236 = arith.constant 1536 : index
    %240 = vector.load %arg12[%c0_235, %c1536_236] : memref<8x3072xf32, #tpu.memory_space<vmem>>, vector<8x1024xf32>
    %241 = arith.truncf %240 : vector<8x1024xf32> to vector<8x1024xbf16>
    %cst_237 = arith.constant dense<0.000000e+00> : vector<8x256xf32>
    %242 = tpu.matmul %241, %218, %cst_237 {dimension_numbers = #tpu.dot_dimension_numbers<[1], [0], [0], [1], [0, 0, 1, 1], [], []>} : vector<8x1024xbf16>, vector<1024x256xbf16>, vector<8x256xf32> -> vector<8x256xf32>
    %243 = arith.addf %242, %217 : vector<8x256xf32>
    %cst_238 = arith.constant 0.000000e+00 : f32
    %244 = vector.broadcast %cst_238 : f32 to vector<8x256xf32>
    %245 = arith.maximumf %243, %244 : vector<8x256xf32>
    %c0_239 = arith.constant 0 : index
    %c768_240 = arith.constant 768 : index
    %246 = vector.load %arg13[%c0_239, %c768_240] : memref<8x1280xf32, #tpu.memory_space<vmem>>, vector<8x256xf32>
    tpu.vector_store %arg13[%c0_239, %c768_240], %245 {strides = array<i32>} : memref<8x1280xf32, #tpu.memory_space<vmem>>, vector<8x256xf32>,
    %c0_241 = arith.constant 0 : index
    %c2048_242 = arith.constant 2048 : index
    %247 = vector.load %arg12[%c0_241, %c2048_242] : memref<8x3072xf32, #tpu.memory_space<vmem>>, vector<8x1024xf32>
    %248 = arith.truncf %247 : vector<8x1024xf32> to vector<8x1024xbf16>
    %cst_243 = arith.constant dense<0.000000e+00> : vector<8x256xf32>
    %249 = tpu.matmul %248, %218, %cst_243 {dimension_numbers = #tpu.dot_dimension_numbers<[1], [0], [0], [1], [0, 0, 1, 1], [], []>} : vector<8x1024xbf16>, vector<1024x256xbf16>, vector<8x256xf32> -> vector<8x256xf32>
    %250 = arith.addf %249, %217 : vector<8x256xf32>
    %cst_244 = arith.constant 0.000000e+00 : f32
    %251 = vector.broadcast %cst_244 : f32 to vector<8x256xf32>
    %252 = arith.maximumf %250, %251 : vector<8x256xf32>
    %c0_245 = arith.constant 0 : index
    %c1024_246 = arith.constant 1024 : index
    %253 = vector.load %arg13[%c0_245, %c1024_246] : memref<8x1280xf32, #tpu.memory_space<vmem>>, vector<8x256xf32>
    tpu.vector_store %arg13[%c0_245, %c1024_246], %252 {strides = array<i32>} : memref<8x1280xf32, #tpu.memory_space<vmem>>, vector<8x256xf32>,
    %c0_247 = arith.constant 0 : index
    %c0_248 = arith.constant 0 : index
    %254 = vector.load %arg13[%c0_247, %c0_248] : memref<8x1280xf32, #tpu.memory_space<vmem>>, vector<8x160xf32>
    %255 = vector.extract_strided_slice %254 {offsets = [0, 0], sizes = [8, 128], strides = [1, 1]} : vector<8x160xf32> to vector<8x128xf32>
    %256 = vector.extract_strided_slice %254 {offsets = [0, 32], sizes = [8, 128], strides = [1, 1]} : vector<8x160xf32> to vector<8x128xf32>
    %257 = arith.maximumf %255, %256 : vector<8x128xf32>
    %c0_249 = arith.constant 0 : index
    %c0_250 = arith.constant 0 : index
    %258 = vector.load %arg13[%c0_249, %c0_250] : memref<8x1280xf32, #tpu.memory_space<vmem>>, vector<8x128xf32>
    tpu.vector_store %arg13[%c0_249, %c0_250], %257 {strides = array<i32>} : memref<8x1280xf32, #tpu.memory_space<vmem>>, vector<8x128xf32>,
    %c0_251 = arith.constant 0 : index
    %c256_252 = arith.constant 256 : index
    %259 = vector.load %arg13[%c0_251, %c256_252] : memref<8x1280xf32, #tpu.memory_space<vmem>>, vector<8x160xf32>
    %260 = vector.extract_strided_slice %259 {offsets = [0, 0], sizes = [8, 128], strides = [1, 1]} : vector<8x160xf32> to vector<8x128xf32>
    %261 = vector.extract_strided_slice %259 {offsets = [0, 32], sizes = [8, 128], strides = [1, 1]} : vector<8x160xf32> to vector<8x128xf32>
    %262 = arith.maximumf %260, %261 : vector<8x128xf32>
    %c0_253 = arith.constant 0 : index
    %c256_254 = arith.constant 256 : index
    %263 = vector.load %arg13[%c0_253, %c256_254] : memref<8x1280xf32, #tpu.memory_space<vmem>>, vector<8x128xf32>
    tpu.vector_store %arg13[%c0_253, %c256_254], %262 {strides = array<i32>} : memref<8x1280xf32, #tpu.memory_space<vmem>>, vector<8x128xf32>,
    %c0_255 = arith.constant 0 : index
    %c512_256 = arith.constant 512 : index
    %264 = vector.load %arg13[%c0_255, %c512_256] : memref<8x1280xf32, #tpu.memory_space<vmem>>, vector<8x160xf32>
    %265 = vector.extract_strided_slice %264 {offsets = [0, 0], sizes = [8, 128], strides = [1, 1]} : vector<8x160xf32> to vector<8x128xf32>
    %266 = vector.extract_strided_slice %264 {offsets = [0, 32], sizes = [8, 128], strides = [1, 1]} : vector<8x160xf32> to vector<8x128xf32>
    %267 = arith.maximumf %265, %266 : vector<8x128xf32>
    %c0_257 = arith.constant 0 : index
    %c512_258 = arith.constant 512 : index
    %268 = vector.load %arg13[%c0_257, %c512_258] : memref<8x1280xf32, #tpu.memory_space<vmem>>, vector<8x128xf32>
    tpu.vector_store %arg13[%c0_257, %c512_258], %267 {strides = array<i32>} : memref<8x1280xf32, #tpu.memory_space<vmem>>, vector<8x128xf32>,
    %c0_259 = arith.constant 0 : index
    %c768_260 = arith.constant 768 : index
    %269 = vector.load %arg13[%c0_259, %c768_260] : memref<8x1280xf32, #tpu.memory_space<vmem>>, vector<8x160xf32>
    %270 = vector.extract_strided_slice %269 {offsets = [0, 0], sizes = [8, 128], strides = [1, 1]} : vector<8x160xf32> to vector<8x128xf32>
    %271 = vector.extract_strided_slice %269 {offsets = [0, 32], sizes = [8, 128], strides = [1, 1]} : vector<8x160xf32> to vector<8x128xf32>
    %272 = arith.maximumf %270, %271 : vector<8x128xf32>
    %c0_261 = arith.constant 0 : index
    %c768_262 = arith.constant 768 : index
    %273 = vector.load %arg13[%c0_261, %c768_262] : memref<8x1280xf32, #tpu.memory_space<vmem>>, vector<8x128xf32>
    tpu.vector_store %arg13[%c0_261, %c768_262], %272 {strides = array<i32>} : memref<8x1280xf32, #tpu.memory_space<vmem>>, vector<8x128xf32>,
    %c0_263 = arith.constant 0 : index
    %c1024_264 = arith.constant 1024 : index
    %274 = vector.load %arg13[%c0_263, %c1024_264] : memref<8x1280xf32, #tpu.memory_space<vmem>>, vector<8x160xf32>
    %275 = vector.extract_strided_slice %274 {offsets = [0, 0], sizes = [8, 128], strides = [1, 1]} : vector<8x160xf32> to vector<8x128xf32>
    %276 = vector.extract_strided_slice %274 {offsets = [0, 32], sizes = [8, 128], strides = [1, 1]} : vector<8x160xf32> to vector<8x128xf32>
    %277 = arith.maximumf %275, %276 : vector<8x128xf32>
    %c0_265 = arith.constant 0 : index
    %c1024_266 = arith.constant 1024 : index
    %278 = vector.load %arg13[%c0_265, %c1024_266] : memref<8x1280xf32, #tpu.memory_space<vmem>>, vector<8x128xf32>
    tpu.vector_store %arg13[%c0_265, %c1024_266], %277 {strides = array<i32>} : memref<8x1280xf32, #tpu.memory_space<vmem>>, vector<8x128xf32>,
    %c0_267 = arith.constant 0 : index
    %c0_268 = arith.constant 0 : index
    %279 = vector.load %arg13[%c0_267, %c0_268] : memref<8x1280xf32, #tpu.memory_space<vmem>>, vector<8x128xf32>
    %c0_269 = arith.constant 0 : index
    %c256_270 = arith.constant 256 : index
    %280 = vector.load %arg13[%c0_269, %c256_270] : memref<8x1280xf32, #tpu.memory_space<vmem>>, vector<8x128xf32>
    %281 = arith.maximumf %279, %280 : vector<8x128xf32>
    %c0_271 = arith.constant 0 : index
    %c0_272 = arith.constant 0 : index
    %282 = vector.load %arg14[%c0_271, %c0_272] : memref<8x512xf32, #tpu.memory_space<vmem>>, vector<8x128xf32>
    tpu.vector_store %arg14[%c0_271, %c0_272], %281 {strides = array<i32>} : memref<8x512xf32, #tpu.memory_space<vmem>>, vector<8x128xf32>,
    %c0_273 = arith.constant 0 : index
    %c256_274 = arith.constant 256 : index
    %283 = vector.load %arg13[%c0_273, %c256_274] : memref<8x1280xf32, #tpu.memory_space<vmem>>, vector<8x128xf32>
    %c0_275 = arith.constant 0 : index
    %c512_276 = arith.constant 512 : index
    %284 = vector.load %arg13[%c0_275, %c512_276] : memref<8x1280xf32, #tpu.memory_space<vmem>>, vector<8x128xf32>
    %285 = arith.maximumf %283, %284 : vector<8x128xf32>
    %c0_277 = arith.constant 0 : index
    %c128 = arith.constant 128 : index
    %286 = vector.load %arg14[%c0_277, %c128] : memref<8x512xf32, #tpu.memory_space<vmem>>, vector<8x128xf32>
    tpu.vector_store %arg14[%c0_277, %c128], %285 {strides = array<i32>} : memref<8x512xf32, #tpu.memory_space<vmem>>, vector<8x128xf32>,
    %c0_278 = arith.constant 0 : index
    %c512_279 = arith.constant 512 : index
    %287 = vector.load %arg13[%c0_278, %c512_279] : memref<8x1280xf32, #tpu.memory_space<vmem>>, vector<8x128xf32>
    %c0_280 = arith.constant 0 : index
    %c768_281 = arith.constant 768 : index
    %288 = vector.load %arg13[%c0_280, %c768_281] : memref<8x1280xf32, #tpu.memory_space<vmem>>, vector<8x128xf32>
    %289 = arith.maximumf %287, %288 : vector<8x128xf32>
    %c0_282 = arith.constant 0 : index
    %c256_283 = arith.constant 256 : index
    %290 = vector.load %arg14[%c0_282, %c256_283] : memref<8x512xf32, #tpu.memory_space<vmem>>, vector<8x128xf32>
    tpu.vector_store %arg14[%c0_282, %c256_283], %289 {strides = array<i32>} : memref<8x512xf32, #tpu.memory_space<vmem>>, vector<8x128xf32>,
    %c0_284 = arith.constant 0 : index
    %c768_285 = arith.constant 768 : index
    %291 = vector.load %arg13[%c0_284, %c768_285] : memref<8x1280xf32, #tpu.memory_space<vmem>>, vector<8x128xf32>
    %c0_286 = arith.constant 0 : index
    %c1024_287 = arith.constant 1024 : index
    %292 = vector.load %arg13[%c0_286, %c1024_287] : memref<8x1280xf32, #tpu.memory_space<vmem>>, vector<8x128xf32>
    %293 = arith.maximumf %291, %292 : vector<8x128xf32>
    %c0_288 = arith.constant 0 : index
    %c384 = arith.constant 384 : index
    %294 = vector.load %arg14[%c0_288, %c384] : memref<8x512xf32, #tpu.memory_space<vmem>>, vector<8x128xf32>
    tpu.vector_store %arg14[%c0_288, %c384], %293 {strides = array<i32>} : memref<8x512xf32, #tpu.memory_space<vmem>>, vector<8x128xf32>,
    %c0_289 = arith.constant 0 : index
    %c0_290 = arith.constant 0 : index
    %295 = vector.load %arg14[%c0_289, %c0_290] : memref<8x512xf32, #tpu.memory_space<vmem>>, vector<8x512xf32>
    %296 = arith.truncf %295 : vector<8x512xf32> to vector<8x512xbf16>
    %c0_291 = arith.constant 0 : index
    %c0_292 = arith.constant 0 : index
    %297 = vector.load %arg6[%c0_291, %c0_292] : memref<512x128xbf16, #tpu.memory_space<vmem>>, vector<512x128xbf16>
    %cst_293 = arith.constant dense<0.000000e+00> : vector<8x128xf32>
    %298 = tpu.matmul %296, %297, %cst_293 {dimension_numbers = #tpu.dot_dimension_numbers<[1], [0], [0], [1], [0, 0, 1, 1], [], []>} : vector<8x512xbf16>, vector<512x128xbf16>, vector<8x128xf32> -> vector<8x128xf32>
    %c0_294 = arith.constant 0 : index
    %c0_295 = arith.constant 0 : index
    %299 = vector.load %arg7[%c0_294, %c0_295] : memref<1x128xf32, #tpu.memory_space<vmem>>, vector<1x128xf32>
    %300 = vector.broadcast %299 : vector<1x128xf32> to vector<8x128xf32>
    %301 = arith.addf %298, %300 : vector<8x128xf32>
    %cst_296 = arith.constant 0.000000e+00 : f32
    %302 = vector.broadcast %cst_296 : f32 to vector<8x128xf32>
    %303 = arith.maximumf %301, %302 : vector<8x128xf32>
    %304 = arith.truncf %303 : vector<8x128xf32> to vector<8x128xbf16>
    %c0_297 = arith.constant 0 : index
    %c0_298 = arith.constant 0 : index
    %305 = vector.load %arg8[%c0_297, %c0_298] : memref<128x128xbf16, #tpu.memory_space<vmem>>, vector<128x128xbf16>
    %cst_299 = arith.constant dense<0.000000e+00> : vector<8x128xf32>
    %306 = tpu.matmul %304, %305, %cst_299 {dimension_numbers = #tpu.dot_dimension_numbers<[1], [0], [0], [1], [0, 0, 1, 1], [], []>} : vector<8x128xbf16>, vector<128x128xbf16>, vector<8x128xf32> -> vector<8x128xf32>
    %c0_300 = arith.constant 0 : index
    %c0_301 = arith.constant 0 : index
    %307 = vector.load %arg9[%c0_300, %c0_301] : memref<1x128xf32, #tpu.memory_space<vmem>>, vector<1x128xf32>
    %308 = vector.broadcast %307 : vector<1x128xf32> to vector<8x128xf32>
    %309 = arith.addf %306, %308 : vector<8x128xf32>
    %c0_302 = arith.constant 0 : index
    %c0_303 = arith.constant 0 : index
    %310 = vector.load %arg10[%c0_302, %c0_303] : memref<8x128xf32, #tpu.memory_space<vmem>>, vector<8x128xf32>
    tpu.vector_store %arg10[%c0_302, %c0_303], %309 {strides = array<i32>} : memref<8x128xf32, #tpu.memory_space<vmem>>, vector<8x128xf32>,
    return
  }
  func.func @transform_0(%arg0: i32) -> (i32, i32) {
    %c0_i32 = arith.constant 0 : i32
    %c0_i32_0 = arith.constant 0 : i32
    return %arg0, %c0_i32 : i32, i32
  }
  func.func @transform_1(%arg0: i32) -> (i32, i32) {
    %c0_i32 = arith.constant 0 : i32
    %c0_i32_0 = arith.constant 0 : i32
    %c0_i32_1 = arith.constant 0 : i32
    return %c0_i32, %c0_i32_0 : i32, i32
  }
  func.func @transform_2(%arg0: i32) -> (i32, i32) {
    %c0_i32 = arith.constant 0 : i32
    %c0_i32_0 = arith.constant 0 : i32
    %c0_i32_1 = arith.constant 0 : i32
    return %c0_i32, %c0_i32_0 : i32, i32
  }
  func.func @transform_3(%arg0: i32) -> (i32, i32) {
    %c0_i32 = arith.constant 0 : i32
    %c0_i32_0 = arith.constant 0 : i32
    %c0_i32_1 = arith.constant 0 : i32
    return %c0_i32, %c0_i32_0 : i32, i32
  }
  func.func @transform_4(%arg0: i32) -> (i32, i32) {
    %c0_i32 = arith.constant 0 : i32
    %c0_i32_0 = arith.constant 0 : i32
    %c0_i32_1 = arith.constant 0 : i32
    return %c0_i32, %c0_i32_0 : i32, i32
  }
  func.func @transform_5(%arg0: i32) -> (i32, i32) {
    %c0_i32 = arith.constant 0 : i32
    %c0_i32_0 = arith.constant 0 : i32
    %c0_i32_1 = arith.constant 0 : i32
    return %c0_i32, %c0_i32_0 : i32, i32
  }
  func.func @transform_6(%arg0: i32) -> (i32, i32) {
    %c0_i32 = arith.constant 0 : i32
    %c0_i32_0 = arith.constant 0 : i32
    %c0_i32_1 = arith.constant 0 : i32
    return %c0_i32, %c0_i32_0 : i32, i32
  }
  func.func @transform_7(%arg0: i32) -> (i32, i32) {
    %c0_i32 = arith.constant 0 : i32
    %c0_i32_0 = arith.constant 0 : i32
    %c0_i32_1 = arith.constant 0 : i32
    return %c0_i32, %c0_i32_0 : i32, i32
  }
  func.func @transform_8(%arg0: i32) -> (i32, i32) {
    %c0_i32 = arith.constant 0 : i32
    %c0_i32_0 = arith.constant 0 : i32
    %c0_i32_1 = arith.constant 0 : i32
    return %c0_i32, %c0_i32_0 : i32, i32
  }
  func.func @transform_9(%arg0: i32) -> (i32, i32) {
    %c0_i32 = arith.constant 0 : i32
    %c0_i32_0 = arith.constant 0 : i32
    return %arg0, %c0_i32 : i32, i32
  }
}

</mosaic_0001>

<bundles_post_ra>
// kernel: sample_convnet_forward.1
= control target key start
LH: loop header
LB: loop body
LE: loop exit
PB: predicated region body
PF: predicated region fallthrough
CT: control target
= control target key end

     0   :  { %14 = vsyncpa [#allocation7], 0  ;;  %s9634_s0 = inlined_call_operand.vmem [shape: f32[8,784], index: 0, kind: input, shape index: {}]   ;;  %s9635_s1 = inlined_call_operand.hbm [shape: bf16[3136,256], index: 1, kind: input, shape index: {}]   ;;  %s9636_s2 = inlined_call_operand.hbm [shape: f32[1,256], index: 2, kind: input, shape index: {}]   ;;  %s9637_s3 = inlined_call_operand.hbm [shape: bf16[1024,256], index: 3, kind: input, shape index: {}]   ;;  %s9638_s4 = inlined_call_operand.hbm [shape: f32[1,256], index: 4, kind: input, shape index: {}]   ;;  %s9639_s5 = inlined_call_operand.hbm [shape: bf16[512,128], index: 5, kind: input, shape index: {}]   ;;  %s9640_s6 = inlined_call_operand.hbm [shape: f32[1,128], index: 6, kind: input, shape index: {}]   ;;  %s9641_s7 = inlined_call_operand.hbm [shape: bf16[128,128], index: 7, kind: input, shape index: {}]   ;;  %s9642_s8 = inlined_call_operand.hbm [shape: f32[1,128], index: 8, kind: input, shape index: {}]   ;;  %s9643_s9 = inlined_call_operand.vmem [shape: f32[8,128], index: 9, kind: output, shape index: {}]  }
   0x1   :  { %15 = vsyncpa [#allocation9], 0 }
   0x2   :  { %16 = vsyncpa [#allocation12], 0 }
   0x3   :  { %17 = vsyncpa [#allocation15], 0 }
   0x4   :  { %18 = vsyncpa [#allocation18], 0  ;;  %s7962_s30 = smov [#allocation8]   ;;  %s7963_s11 = smov [#allocation11]  }
   0x5   :  { %s39_s10 = sshll.u32 %s7962_s30, 4  ;;  %s61_s12 = sshll.u32 %s7963_s11, 4  ;;  %s40_s10 = int_to_ptr.vmem [resolvable:$true] %s39_s10  ;;  %s62_s12 = int_to_ptr.vmem [resolvable:$true] %s61_s12 }
   0x6   :  { %s7776_s15 = scalar_lea.hbm %s9636_s2, 32 }
   0x7   :  { %p7777_p0 = scmp.ne.s32.totalorder %s9636_s2, %s7776_s15  ;;  %p7780_p1 = scmp.lt.u32.totalorder %s7776_s15, %s9636_s2 }
   0x9   :  { %p7782_p2 = pnand %p7780_p1, %p7777_p0 }
   0xb   :  { %7785 = shalt.err (!%p7782_p2)
}
   0xc   :  { %s7786_s20 = scalar_lea.vmem %s40_s10, 32  ;;  %p7791_p4 = scmp.lt.s32.totalorder %s40_s10, %s40_s10 }
   0xd   :  { %p7787_p3 = scmp.ne.s32.totalorder %s40_s10, %s7786_s20  ;;  %p7792_p5 = scmp.lt.s32.totalorder %s7786_s20, %s7786_s20 }
   0xf   :  { %p7793_p6 = por %p7792_p5, %p7791_p4 }
  0x11   :  { %p7794_p7 = pnand %p7793_p6, %p7787_p3 }
  0x13   :  { %7797 = shalt.err (!%p7794_p7)
}
  0x14   :  { %42 = dma.hbm_to_vmem [thread:$0]  %s9636_s2, 32, %s40_s10, [#allocation9]  }
  0x15   :  { %s7798_s25 = scalar_lea.hbm %s9638_s4, 32 }
  0x16   :  { %p7799_p8 = scmp.ne.s32.totalorder %s9638_s4, %s7798_s25  ;;  %p7802_p9 = scmp.lt.u32.totalorder %s7798_s25, %s9638_s4 }
  0x18   :  { %p7804_p10 = pnand %p7802_p9, %p7799_p8 }
  0x1a   :  { %7807 = shalt.err (!%p7804_p10)
}
  0x1b   :  { %s7808_s30 = scalar_lea.vmem %s62_s12, 32  ;;  %p7813_p12 = scmp.lt.s32.totalorder %s62_s12, %s62_s12 }
  0x1c   :  { %p7809_p11 = scmp.ne.s32.totalorder %s62_s12, %s7808_s30  ;;  %p7814_p13 = scmp.lt.s32.totalorder %s7808_s30, %s7808_s30 }
  0x1e   :  { %p7815_p0 = por %p7814_p13, %p7813_p12 }
  0x20   :  { %p7816_p1 = pnand %p7815_p0, %p7809_p11 }
  0x22   :  { %7819 = shalt.err (!%p7816_p1)
}
  0x23   :  { %64 = dma.hbm_to_vmem [thread:$0]  %s9638_s4, 32, %s62_s12, [#allocation12]  }
  0x24   :  { %s7964_s11 = smov [#allocation14]   ;;  %s7965_s14 = smov [#allocation6]  }
  0x25   :  { %s83_s13 = sshll.u32 %s7964_s11, 4  ;;  %s26_s15 = sshll.u32 %s7965_s14, 4  ;;  %s84_s13 = int_to_ptr.vmem [resolvable:$true] %s83_s13  ;;  %s8062_s15 = int_to_ptr.vmem [resolvable:$true] %s26_s15 }
  0x26   :  { %s7820_s18 = scalar_lea.hbm %s9640_s6, 16 }
  0x27   :  { %p7821_p2 = scmp.ne.s32.totalorder %s9640_s6, %s7820_s18  ;;  %p7824_p3 = scmp.lt.u32.totalorder %s7820_s18, %s9640_s6 }
  0x29   :  { %p7826_p4 = pnand %p7824_p3, %p7821_p2 }
  0x2b   :  { %7829 = shalt.err (!%p7826_p4)
}
  0x2c   :  { %s7830_s4 = scalar_lea.vmem %s84_s13, 16  ;;  %s7834_s12 = scalar_lea.vmem %s84_s13, 32 }
  0x2d   :  { %p7831_p5 = scmp.ne.s32.totalorder %s84_s13, %s7830_s4  ;;  %p7835_p6 = scmp.lt.s32.totalorder %s84_s13, %s84_s13 }
  0x2e   :  { %p7836_p7 = scmp.lt.s32.totalorder %s7834_s12, %s7830_s4 }
  0x30   :  { %p7837_p8 = por %p7836_p7, %p7835_p6 }
  0x32   :  { %p7838_p9 = pnand %p7837_p8, %p7831_p5 }
  0x34   :  { %7841 = shalt.err (!%p7838_p9)
}
  0x35   :  { %86 = dma.hbm_to_vmem [thread:$0]  %s9640_s6, 16, %s84_s13, [#allocation15]  }
  0x36   :  { %s7842_s27 = scalar_lea.hbm %s9635_s1, 50176 }
  0x37   :  { %p7843_p10 = scmp.ne.s32.totalorder %s9635_s1, %s7842_s27  ;;  %p7846_p11 = scmp.lt.u32.totalorder %s7842_s27, %s9635_s1 }
  0x39   :  { %p7848_p12 = pnand %p7846_p11, %p7843_p10 }
  0x3b   :  { %7851 = shalt.err (!%p7848_p12)
}
  0x3c   :  { %s7852_s10 = scalar_lea.vmem %s8062_s15, 50176  ;;  %p7857_p0 = scmp.lt.s32.totalorder %s8062_s15, %s8062_s15 }
  0x3d   :  { %p7853_p13 = scmp.ne.s32.totalorder %s8062_s15, %s7852_s10  ;;  %p7858_p1 = scmp.lt.s32.totalorder %s7852_s10, %s7852_s10 }
  0x3f   :  { %p7859_p2 = por %p7858_p1, %p7857_p0 }
  0x41   :  { %p7860_p3 = pnand %p7859_p2, %p7853_p13 }
  0x43   :  { %7863 = shalt.err (!%p7860_p3)
}
  0x44   :  { %s7966_s6 = smov 128   ;;  %s7967_s11 = smov 8  }
  0x45   :  { %32 = dma.hbm_to_vmem [thread:$0]  %s9635_s1, 50176, %s8062_s15, [#allocation7], %s7966_s6, %s7966_s6, %s7967_s11  }
  0x46   :  { %s7968_s16 = smov [#allocation10]   ;;  %s7969_s18 = smov [#allocation13]  }
  0x47   :  { %s48_s17 = sshll.u32 %s7968_s16, 4  ;;  %s70_s19 = sshll.u32 %s7969_s18, 4  ;;  %s49_s17 = int_to_ptr.vmem [resolvable:$true] %s48_s17  ;;  %s8093_s19 = int_to_ptr.vmem [resolvable:$true] %s70_s19 }
  0x48   :  { %s7864_s22 = scalar_lea.hbm %s9637_s3, 16384 }
  0x49   :  { %p7865_p4 = scmp.ne.s32.totalorder %s9637_s3, %s7864_s22  ;;  %p7868_p5 = scmp.lt.u32.totalorder %s7864_s22, %s9637_s3 }
  0x4b   :  { %p7870_p6 = pnand %p7868_p5, %p7865_p4 }
  0x4d   :  { %7873 = shalt.err (!%p7870_p6)
}
  0x4e   :  { %s7874_s1 = scalar_lea.vmem %s49_s17, 16384  ;;  %p7879_p8 = scmp.lt.s32.totalorder %s49_s17, %s49_s17 }
  0x4f   :  { %p7875_p7 = scmp.ne.s32.totalorder %s49_s17, %s7874_s1  ;;  %p7880_p9 = scmp.lt.s32.totalorder %s7874_s1, %s7874_s1 }
  0x51   :  { %p7881_p10 = por %p7880_p9, %p7879_p8 }
  0x53   :  { %p7882_p11 = pnand %p7881_p10, %p7875_p7 }
  0x55   :  { %7885 = shalt.err (!%p7882_p11)
}
  0x56   :  { %54 = dma.hbm_to_vmem [thread:$0]  %s9637_s3, 16384, %s49_s17, [#allocation9], %s7966_s6, %s7966_s6, %s7967_s11  }
  0x57   :  { %s7886_s28 = scalar_lea.hbm %s9639_s5, 4096 }
  0x58   :  { %p7887_p12 = scmp.ne.s32.totalorder %s9639_s5, %s7886_s28  ;;  %p7890_p13 = scmp.lt.u32.totalorder %s7886_s28, %s9639_s5 }
  0x5a   :  { %p7892_p0 = pnand %p7890_p13, %p7887_p12 }
  0x5c   :  { %7895 = shalt.err (!%p7892_p0)
}
  0x5d   :  { %s7896_s13 = scalar_lea.vmem %s8093_s19, 4096  ;;  %p7901_p2 = scmp.lt.s32.totalorder %s8093_s19, %s8093_s19 }
  0x5e   :  { %p7897_p1 = scmp.ne.s32.totalorder %s8093_s19, %s7896_s13  ;;  %p7902_p3 = scmp.lt.s32.totalorder %s7896_s13, %s7896_s13 }
  0x60   :  { %p7903_p4 = por %p7902_p3, %p7901_p2 }
  0x62   :  { %p7904_p5 = pnand %p7903_p4, %p7897_p1 }
  0x64   :  { %7907 = shalt.err (!%p7904_p5)
}
  0x65   :  { %s7970_s3 = smov 64   ;;  %s7971_s6 = smov 4  }
  0x66   :  { %76 = dma.hbm_to_vmem [thread:$0]  %s9639_s5, 4096, %s8093_s19, [#allocation12], %s7970_s3, %s7970_s3, %s7971_s6  }
  0x67   :  { %s7972_s16 = smov [#allocation16]   ;;  %s7973_s18 = smov [#allocation17]  }
  0x68   :  { %s92_s17 = sshll.u32 %s7972_s16, 4  ;;  %s105_s20 = sshll.u32 %s7973_s18, 4  ;;  %s93_s17 = int_to_ptr.vmem [resolvable:$true] %s92_s17  ;;  %s106_s20 = int_to_ptr.vmem [resolvable:$true] %s105_s20 }
  0x69   :  { %s7908_s4 = scalar_lea.hbm %s9641_s7, 1024 }
  0x6a   :  { %p7909_p6 = scmp.ne.s32.totalorder %s9641_s7, %s7908_s4  ;;  %p7912_p7 = scmp.lt.u32.totalorder %s7908_s4, %s9641_s7 }
  0x6c   :  { %p7914_p8 = pnand %p7912_p7, %p7909_p6 }
  0x6e   :  { %7917 = shalt.err (!%p7914_p8)
}
  0x6f   :  { %s7918_s5 = scalar_lea.vmem %s93_s17, 1024  ;;  %p7923_p10 = scmp.lt.s32.totalorder %s93_s17, %s93_s17 }
  0x70   :  { %p7919_p9 = scmp.ne.s32.totalorder %s93_s17, %s7918_s5  ;;  %p7924_p11 = scmp.lt.s32.totalorder %s7918_s5, %s7918_s5 }
  0x72   :  { %p7925_p12 = por %p7924_p11, %p7923_p10 }
  0x74   :  { %p7926_p13 = pnand %p7925_p12, %p7919_p9 }
  0x76   :  { %7929 = shalt.err (!%p7926_p13)
}
  0x77   :  { %98 = dma.hbm_to_vmem [thread:$0]  %s9641_s7, 1024, %s93_s17, [#allocation15], %s7970_s3, %s7970_s3, %s7971_s6  }
  0x78   :  { %s7930_s27 = scalar_lea.hbm %s9642_s8, 16 }
  0x79   :  { %p7931_p0 = scmp.ne.s32.totalorder %s9642_s8, %s7930_s27  ;;  %p7934_p1 = scmp.lt.u32.totalorder %s7930_s27, %s9642_s8 }
  0x7b   :  { %p7936_p2 = pnand %p7934_p1, %p7931_p0 }
  0x7d   :  { %7939 = shalt.err (!%p7936_p2)
}
  0x7e   :  { %s7940_s10 = scalar_lea.vmem %s106_s20, 16  ;;  %s7944_s13 = scalar_lea.vmem %s106_s20, 32 }
  0x7f   :  { %p7941_p3 = scmp.ne.s32.totalorder %s106_s20, %s7940_s10  ;;  %p7945_p4 = scmp.lt.s32.totalorder %s106_s20, %s106_s20 }
  0x80   :  { %p7946_p5 = scmp.lt.s32.totalorder %s7944_s13, %s7940_s10 }
  0x82   :  { %p7947_p6 = por %p7946_p5, %p7945_p4 }
  0x84   :  { %p7948_p7 = pnand %p7947_p6, %p7941_p3 }
  0x86   :  { %7951 = shalt.err (!%p7948_p7)
}
  0x87   :  { %108 = dma.hbm_to_vmem [thread:$0]  %s9642_s8, 16, %s106_s20, [#allocation18]  }
  0x88   :  { %7952 = dma.done.wait [#allocation7], 50176  }
  0x89   :  { %7953 = vsyncadd [#allocation7], 4294917120 }
  0x8a   :  { %7954 = dma.done.wait [#allocation9], 16416  }
  0x8b   :  { %7955 = vsyncadd [#allocation9], 4294950880 }
  0x8c   :  { %7956 = dma.done.wait [#allocation12], 4128  }
  0x8d   :  { %7957 = vsyncadd [#allocation12], 4294963168 }
  0x8e   :  { %7958 = dma.done.wait [#allocation15], 1040  }
  0x8f   :  { %7959 = vsyncadd [#allocation15], 4294966256 }
  0x90   :  { %7960 = dma.done.wait [#allocation18], 16  }
  0x91   :  { %7961 = vsyncadd [#allocation18], 4294967280  ;;  %v1051_v0 = vld [vmem:[%s9634_s0 + $0x8] sm:$0xff]  ;;  %v587_v1 = vld [vmem:[%s9634_s0] sm:$0xff]  ;;  %vm318_vm0 = vcmask 785408   ;;  %s7974_s20 = smov 116  }
  0x92   :  { %v1052_v2 = vld [vmem:[%s9634_s0 + $0x10] sm:$0xff]  ;;  %v8159_v3 = vpack.c.bf16 %v1051_v0, %v1051_v0  ;;  %v8161_v4 = vpack.c.bf16 %v587_v1, %v587_v1  ;;  %v6838_v5 = vld [vmem:[#allocation6 + $0x4] ss:$8 sps:$4 sm:$0xff]   ;;  %v6840_v6 = vld [vmem:[#allocation6] ss:$8 sps:$4 sm:$0xff]   ;;  %s7975_s21 = smov 100  }
  0x93   :  { %v8165_v7 = vpack.c.bf16 %v1052_v2, %v1052_v2  ;;  %v6841_v8 = vld [vmem:[#allocation6 + $0x14] ss:$8 sps:$4 sm:$0xff]   ;;  %322 = vmatprep.subr.bf16.mxu0 %v6838_v5  ;;  %v6844_v9 = vld [vmem:[#allocation6 + $0xe4] ss:$8 sps:$4 sm:$0xff]   ;;  %v6843_v10 = vld [vmem:[#allocation6 + $0x10] ss:$8 sps:$4 sm:$0xff]  }
  0x94   :  { %1085 = vrot.lane.b32.xlu1 %v8159_v3, %s7974_s20  ;;  %621 = vrot.lane.b32.xlu0 %v8161_v4, %s7975_s21  ;;  %v6848_v11 = vld [vmem:[#allocation6 + $0xe0] ss:$8 sps:$4 sm:$0xff]   ;;  %v6846_v12 = vld [vmem:[#allocation6 + $0x24] ss:$8 sps:$4 sm:$0xff]   ;;  %v6850_v13 = vld [vmem:[#allocation6 + $0xf4] ss:$8 sps:$4 sm:$0xff]  }
  0x95   :  { %6023 = vmatprep.mubr.msk.bf16.mxu0 %vm318_vm0, %v8159_v3  ;;  %323 = vmatpush1.bf16.msra.mxu0 %v6840_v6  ;;  %v6849_v14 = vld [vmem:[#allocation6 + $0x20] ss:$8 sps:$4 sm:$0xff]   ;;  %v6854_v15 = vld [vmem:[#allocation6 + $0xf0] ss:$8 sps:$4 sm:$0xff]   ;;  %v6856_v16 = vld [vmem:[#allocation6 + $0x104] ss:$8 sps:$4 sm:$0xff]  }
  0x96   :  { %6052 = vmatprep.mubr.msk.bf16.mxu1 %vm318_vm0, %v8159_v3  ;;  %324 = vmatprep.subr.bf16.mxu0 %v6841_v8  ;;  %v6852_v17 = vld [vmem:[#allocation6 + $0x34] ss:$8 sps:$4 sm:$0xff]   ;;  %s7976_s22 = smov 44   ;;  %v6860_v18 = vld [vmem:[#allocation6 + $0x100] ss:$8 sps:$4 sm:$0xff]   ;;  %s7977_s1 = smov 20  }
  0x97   :  { %542 = vmatprep.subr.bf16.mxu1 %v6844_v9  ;;  %v6855_v19 = vld [vmem:[#allocation6 + $0x30] ss:$8 sps:$4 sm:$0xff]   ;;  %v6862_v20 = vld [vmem:[#allocation6 + $0x114] ss:$8 sps:$4 sm:$0xff]   ;;  %v6858_v21 = vld [vmem:[#allocation6 + $0x44] ss:$8 sps:$4 sm:$0xff]  }
  0x98   :  { %1087 = vrot.lane.b32.xlu1 %v8165_v7, %s7974_s20  ;;  %623 = vrot.lane.b32.xlu0 %v8159_v3, %s7975_s21  ;;  %v6861_v22 = vld [vmem:[#allocation6 + $0x40] ss:$8 sps:$4 sm:$0xff]   ;;  %v6866_v23 = vld [vmem:[#allocation6 + $0x110] ss:$8 sps:$4 sm:$0xff]   ;;  %v6868_v24 = vld [vmem:[#allocation6 + $0x124] ss:$8 sps:$4 sm:$0xff]  }
  0x99   :  { %543 = vmatpush1.bf16.msra.mxu1 %v6848_v11  ;;  %325 = vmatpush1.bf16.msra.mxu0 %v6843_v10  ;;  %v6864_v25 = vld [vmem:[#allocation6 + $0x54] ss:$8 sps:$4 sm:$0xff]   ;;  %v6872_v26 = vld [vmem:[#allocation6 + $0x120] ss:$8 sps:$4 sm:$0xff]   ;;  %v6867_v27 = vld [vmem:[#allocation6 + $0x50] ss:$8 sps:$4 sm:$0xff]  }
  0x9a   :  { %544 = vmatprep.subr.bf16.mxu1 %v6850_v13  ;;  %326 = vmatprep.subr.bf16.mxu0 %v6846_v12  ;;  %v6874_v28 = vld [vmem:[#allocation6 + $0x134] ss:$8 sps:$4 sm:$0xff]   ;;  %v6870_v29 = vld [vmem:[#allocation6 + $0x64] ss:$8 sps:$4 sm:$0xff]   ;;  %v6873_v30 = vld [vmem:[#allocation6 + $0x60] ss:$8 sps:$4 sm:$0xff]  }
  0x9b   :  { %v6878_v31 = vld [vmem:[#allocation6 + $0x130] ss:$8 sps:$4 sm:$0xff]   ;;  %v6880_v32 = vld [vmem:[#allocation6 + $0x144] ss:$8 sps:$4 sm:$0xff]   ;;  %v6876_v33 = vld [vmem:[#allocation6 + $0x74] ss:$8 sps:$4 sm:$0xff]  }
  0x9c   :  { %857 = vrot.lane.b32.xlu1 %v8165_v7, %s7976_s22  ;;  %855 = vrot.lane.b32.xlu0 %v8159_v3, %s7976_s22  ;;  %v6884_v34 = vld [vmem:[#allocation6 + $0x140] ss:$8 sps:$4 sm:$0xff]   ;;  %v6879_v35 = vld [vmem:[#allocation6 + $0x70] ss:$8 sps:$4 sm:$0xff]   ;;  %v6886_v36 = vld [vmem:[#allocation6 + $0x154] ss:$8 sps:$4 sm:$0xff]  }
  0x9d   :  { %545 = vmatpush1.bf16.msra.mxu1 %v6854_v15  ;;  %327 = vmatpush1.bf16.msra.mxu0 %v6849_v14  ;;  %v6882_v37 = vld [vmem:[#allocation6 + $0x84] ss:$8 sps:$4 sm:$0xff]   ;;  %v1517_v38 = vld [vmem:[%s9634_s0 + $0x18] sm:$0xff]  ;;  %v6885_v40 = vld [vmem:[#allocation6 + $0x80] ss:$8 sps:$4 sm:$0xff]   ;;  %s7979_s5 = smov 36  }
  0x9e   :  { %546 = vmatprep.subr.bf16.mxu1 %v6856_v16  ;;  %328 = vmatprep.subr.bf16.mxu0 %v6852_v17  ;;  %v8183_v39 = vpack.c.bf16 %v1517_v38, %v1517_v38  ;;  %v6890_v41 = vld [vmem:[#allocation6 + $0x150] ss:$8 sps:$4 sm:$0xff]   ;;  %v6892_v42 = vld [vmem:[#allocation6 + $0x164] ss:$8 sps:$4 sm:$0xff]   ;;  %v6888_v43 = vld [vmem:[#allocation6 + $0x94] ss:$8 sps:$4 sm:$0xff]  }
  0x9f   :  { %v1987_v44 = vld [vmem:[%s9634_s0 + $0x20] sm:$0xff]  ;;  %v6891_v47 = vld [vmem:[#allocation6 + $0x90] ss:$8 sps:$4 sm:$0xff]   ;;  %v6898_v48 = vld [vmem:[#allocation6 + $0x174] ss:$8 sps:$4 sm:$0xff]   ;;  %s7980_s19 = smov 76  }
  0xa0   :  { %853 = vrot.lane.b32.xlu0 %v8161_v4, %s7976_s22  ;;  %1554 = vrot.lane.b32.xlu1 %v8165_v7, %s7971_s6  ;;  %v8190_v45 = vpack.c.bf16 %v1987_v44, %v1987_v44  ;;  %v6896_v46 = vld [vmem:[#allocation6 + $0x160] ss:$8 sps:$4 sm:$0xff]   ;;  %v6894_v49 = vld [vmem:[#allocation6 + $0xa4] ss:$8 sps:$4 sm:$0xff]   ;;  %v6902_v50 = vld [vmem:[#allocation6 + $0x170] ss:$8 sps:$4 sm:$0xff]  }
  0xa1   :  { %547 = vmatpush1.bf16.msra.mxu1 %v6860_v18  ;;  %329 = vmatpush1.bf16.msra.mxu0 %v6855_v19  ;;  %v6897_v51 = vld [vmem:[#allocation6 + $0xa0] ss:$8 sps:$4 sm:$0xff]   ;;  %v6904_v52 = vld [vmem:[#allocation6 + $0x184] ss:$8 sps:$4 sm:$0xff]   ;;  %v6900_v53 = vld [vmem:[#allocation6 + $0xb4] ss:$8 sps:$4 sm:$0xff]  }
  0xa2   :  { %548 = vmatprep.subr.bf16.mxu1 %v6862_v20  ;;  %330 = vmatprep.subr.bf16.mxu0 %v6858_v21  ;;  %v6908_v54 = vld [vmem:[#allocation6 + $0x180] ss:$8 sps:$4 sm:$0xff]   ;;  %v6903_v55 = vld [vmem:[#allocation6 + $0xb0] ss:$8 sps:$4 sm:$0xff]   ;;  %v6910_v56 = vld [vmem:[#allocation6 + $0x194] ss:$8 sps:$4 sm:$0xff]  }
  0xa3   :  { %v6906_v57 = vld [vmem:[#allocation6 + $0xc4] ss:$8 sps:$4 sm:$0xff]   ;;  %v6914_v58 = vld [vmem:[#allocation6 + $0x190] ss:$8 sps:$4 sm:$0xff]   ;;  %v6909_v59 = vld [vmem:[#allocation6 + $0xc0] ss:$8 sps:$4 sm:$0xff]  }
  0xa4   :  { %1552 = vrot.lane.b32.xlu1 %v8159_v3, %s7971_s6  ;;  %1556 = vrot.lane.b32.xlu0 %v8183_v39, %s7971_s6  ;;  %s7978_s6 = smov 60   ;;  %v6916_v60 = vld [vmem:[#allocation6 + $0x1a4] ss:$8 sps:$4 sm:$0xff]   ;;  %v6912_v61 = vld [vmem:[#allocation6 + $0xd4] ss:$8 sps:$4 sm:$0xff]   ;;  %s7981_s26 = smov 80  }
  0xa5   :  { %549 = vmatpush1.bf16.msra.mxu1 %v6866_v23  ;;  %331 = vmatpush1.bf16.msra.mxu0 %v6861_v22  ;;  %v6918_v62 = vld [vmem:[#allocation6 + $0x1a0] ss:$8 sps:$4 sm:$0xff]   ;;  %v6915_v63 = vld [vmem:[#allocation6 + $0xd0] ss:$8 sps:$4 sm:$0xff]   ;;  %v6922_v0 = vld [vmem:[#allocation6 + $0x1b4] ss:$8 sps:$4 sm:$0xff]  }
  0xa6   :  { %550 = vmatprep.subr.bf16.mxu1 %v6868_v24  ;;  %332 = vmatprep.subr.bf16.mxu0 %v6864_v25  ;;  %v6921_v1 = vld [vmem:[#allocation6 + $0x1c4] ss:$8 sps:$4 sm:$0xff]   ;;  %v6924_v2 = vld [vmem:[#allocation6 + $0x1b0] ss:$8 sps:$4 sm:$0xff]   ;;  %v6927_v6 = vld [vmem:[#allocation6 + $0x1d4] ss:$8 sps:$4 sm:$0xff]  }
  0xa7   :  { %v6933_v5 = vld [vmem:[#allocation6 + $0x2a4] ss:$8 sps:$4 sm:$0xff]   ;;  %v6931_v8 = vld [vmem:[#allocation6 + $0x2a0] ss:$8 sps:$4 sm:$0xff]   ;;  %v6925_v9 = vld [vmem:[#allocation6 + $0x1d0] ss:$8 sps:$4 sm:$0xff]  }
  0xa8   :  { %2024 = vrot.lane.b32.xlu0 %v8183_v39, %s7977_s1  ;;  %2026 = vrot.lane.b32.xlu1 %v8190_v45, %s7977_s1  ;;  %v6939_v10 = vld [vmem:[#allocation6 + $0x2b4] ss:$8 sps:$4 sm:$0xff]   ;;  %v6930_v11 = vld [vmem:[#allocation6 + $0x1e4] ss:$8 sps:$4 sm:$0xff]   ;;  %v6937_v12 = vld [vmem:[#allocation6 + $0x2b0] ss:$8 sps:$4 sm:$0xff]  }
  0xa9   :  { %551 = vmatpush1.bf16.msra.mxu1 %v6872_v26  ;;  %333 = vmatpush1.bf16.msra.mxu0 %v6867_v27  ;;  %v6928_v13 = vld [vmem:[#allocation6 + $0x1e0] ss:$8 sps:$4 sm:$0xff]   ;;  %v6945_v14 = vld [vmem:[#allocation6 + $0x2c4] ss:$8 sps:$4 sm:$0xff]   ;;  %v6936_v15 = vld [vmem:[#allocation6 + $0x1f4] ss:$8 sps:$4 sm:$0xff]  }
  0xaa   :  { %552 = vmatprep.subr.bf16.mxu1 %v6874_v28  ;;  %334 = vmatprep.subr.bf16.mxu0 %v6870_v29  ;;  %v6943_v16 = vld [vmem:[#allocation6 + $0x2c0] ss:$8 sps:$4 sm:$0xff]   ;;  %v6934_v17 = vld [vmem:[#allocation6 + $0x1f0] ss:$8 sps:$4 sm:$0xff]   ;;  %v6951_v18 = vld [vmem:[#allocation6 + $0x2d4] ss:$8 sps:$4 sm:$0xff]  }
  0xab   :  { %v6942_v19 = vld [vmem:[#allocation6 + $0x204] ss:$8 sps:$4 sm:$0xff]   ;;  %v6949_v20 = vld [vmem:[#allocation6 + $0x2d0] ss:$8 sps:$4 sm:$0xff]   ;;  %v6940_v22 = vld [vmem:[#allocation6 + $0x200] ss:$8 sps:$4 sm:$0xff]  }
  0xac   :  { %2022 = vrot.lane.b32.xlu0 %v8165_v7, %s7977_s1  ;;  %1319 = vrot.lane.b32.xlu1 %v8165_v7, %s7978_s6  ;;  %v6957_v23 = vld [vmem:[#allocation6 + $0x2e4] ss:$8 sps:$4 sm:$0xff]   ;;  %v6948_v24 = vld [vmem:[#allocation6 + $0x214] ss:$8 sps:$4 sm:$0xff]   ;;  %v6955_v25 = vld [vmem:[#allocation6 + $0x2e0] ss:$8 sps:$4 sm:$0xff]  }
  0xad   :  { %553 = vmatpush1.bf16.msra.mxu1 %v6878_v31  ;;  %335 = vmatpush1.bf16.msra.mxu0 %v6873_v30  ;;  %v6946_v26 = vld [vmem:[#allocation6 + $0x210] ss:$8 sps:$4 sm:$0xff]   ;;  %v6963_v27 = vld [vmem:[#allocation6 + $0x2f4] ss:$8 sps:$4 sm:$0xff]   ;;  %v6954_v28 = vld [vmem:[#allocation6 + $0x224] ss:$8 sps:$4 sm:$0xff]  }
  0xae   :  { %554 = vmatprep.subr.bf16.mxu1 %v6880_v32  ;;  %336 = vmatprep.subr.bf16.mxu0 %v6876_v33  ;;  %v6961_v29 = vld [vmem:[#allocation6 + $0x2f0] ss:$8 sps:$4 sm:$0xff]   ;;  %v6952_v30 = vld [vmem:[#allocation6 + $0x220] ss:$8 sps:$4 sm:$0xff]   ;;  %v6969_v31 = vld [vmem:[#allocation6 + $0x304] ss:$8 sps:$4 sm:$0xff]  }
  0xaf   :  { %v6960_v32 = vld [vmem:[#allocation6 + $0x234] ss:$8 sps:$4 sm:$0xff]   ;;  %s7982_s27 = smov 92   ;;  %v6967_v33 = vld [vmem:[#allocation6 + $0x300] ss:$8 sps:$4 sm:$0xff]   ;;  %vm625_vm1 = vcmask 818176  }
  0xb0   :  { %1321 = vrot.lane.b32.xlu0 %v8183_v39, %s7978_s6  ;;  %1317 = vrot.lane.b32.xlu1 %v8159_v3, %s7978_s6  ;;  %v6919_v3 = vld [vmem:[#allocation6 + $0x1c0] ss:$8 sps:$4 sm:$0xff]   ;;  %v6978_v44 = vld [vmem:[#allocation6 + $0x264] ss:$8 sps:$4 sm:$0xff]   ;;  %vm859_vm2 = vcmask 359424   ;;  %vm1558_vm3 = vcmask 31744  }
  0xb1   :  { %555 = vmatpush1.bf16.msra.mxu1 %v6884_v34  ;;  %337 = vmatpush1.bf16.msra.mxu0 %v6879_v35  ;;  %v6958_v34 = vld [vmem:[#allocation6 + $0x230] ss:$8 sps:$4 sm:$0xff]   ;;  %v6975_v35 = vld [vmem:[#allocation6 + $0x314] ss:$8 sps:$4 sm:$0xff]   ;;  %v6964_v38 = vld [vmem:[#allocation6 + $0x240] ss:$8 sps:$4 sm:$0xff]  }
  0xb2   :  { %556 = vmatprep.subr.bf16.mxu1 %v6886_v36  ;;  %338 = vmatprep.subr.bf16.mxu0 %v6882_v37  ;;  %v6966_v36 = vld [vmem:[#allocation6 + $0x244] ss:$8 sps:$4 sm:$0xff]   ;;  %v6973_v37 = vld [vmem:[#allocation6 + $0x310] ss:$8 sps:$4 sm:$0xff]   ;;  %vm2028_vm4 = vcmask 162816   ;;  %vm1323_vm5 = vcmask 490496  }
  0xb3   :  { %vm2498_vm6 = vcmask 293888   ;;  %vm1089_vm7 = vcmask 949248   ;;  %vm1793_vm8 = vcmask 621568   ;;  %vm2962_vm9 = vcmask 654336   ;;  %s7983_s30 = smov 112   ;;  %s7984_s3 = smov 108  }
  0xb4   :  { %2494 = vrot.lane.b32.xlu0 %v8190_v45, %s7979_s5  ;;  %vm2263_vm10 = vcmask 752640   ;;  %vm3400_vm11 = vcmask 916480   ;;  %vm2728_vm12 = vcmask 883712   ;;  %vm7987_vm13 = vmmov 0  }
  0xb5   :  { %557 = vmatpush1.bf16.msra.mxu1 %v6890_v41  ;;  %339 = vmatpush1.bf16.msra.mxu0 %v6885_v40  ;;  %v6981_v40 = vld [vmem:[#allocation6 + $0x324] ss:$8 sps:$4 sm:$0xff]   ;;  %v6972_v41 = vld [vmem:[#allocation6 + $0x254] ss:$8 sps:$4 sm:$0xff]  }
  0xb6   :  { %558 = vmatprep.subr.bf16.mxu1 %v6892_v42  ;;  %340 = vmatprep.subr.bf16.mxu0 %v6888_v43  ;;  %v6970_v42 = vld [vmem:[#allocation6 + $0x250] ss:$8 sps:$4 sm:$0xff]   ;;  %v6987_v43 = vld [vmem:[#allocation6 + $0x334] ss:$8 sps:$4 sm:$0xff]  }
  0xb8   :  { %2492 = vrot.lane.b32.xlu0 %v8183_v39, %s7979_s5 }
  0xb9   :  { %559 = vmatpush1.bf16.msra.mxu1 %v6896_v46  ;;  %341 = vmatpush1.bf16.msra.mxu0 %v6891_v47  ;;  %v6985_v46 = vld [vmem:[#allocation6 + $0x330] ss:$8 sps:$4 sm:$0xff]   ;;  %v6976_v47 = vld [vmem:[#allocation6 + $0x260] ss:$8 sps:$4 sm:$0xff]  }
  0xba   :  { %560 = vmatprep.subr.bf16.mxu1 %v6898_v48  ;;  %342 = vmatprep.subr.bf16.mxu0 %v6894_v49  ;;  %v6993_v48 = vld [vmem:[#allocation6 + $0x344] ss:$8 sps:$4 sm:$0xff]   ;;  %v6984_v49 = vld [vmem:[#allocation6 + $0x274] ss:$8 sps:$4 sm:$0xff]  }
  0xbc   :  { %1791 = vrot.lane.b32.xlu0 %v8190_v45, %s7980_s19 }
  0xbd   :  { %561 = vmatpush1.bf16.msra.mxu1 %v6902_v50  ;;  %343 = vmatpush1.bf16.msra.mxu0 %v6897_v51  ;;  %v6991_v50 = vld [vmem:[#allocation6 + $0x340] ss:$8 sps:$4 sm:$0xff]   ;;  %v6982_v51 = vld [vmem:[#allocation6 + $0x270] ss:$8 sps:$4 sm:$0xff]  }
  0xbe   :  { %562 = vmatprep.subr.bf16.mxu1 %v6904_v52  ;;  %344 = vmatprep.subr.bf16.mxu0 %v6900_v53  ;;  %v6999_v52 = vld [vmem:[#allocation6 + $0x354] ss:$8 sps:$4 sm:$0xff]   ;;  %v6990_v53 = vld [vmem:[#allocation6 + $0x284] ss:$8 sps:$4 sm:$0xff]  }
  0xc1   :  { %563 = vmatpush1.bf16.msra.mxu1 %v6908_v54  ;;  %345 = vmatpush1.bf16.msra.mxu0 %v6903_v55  ;;  %v6997_v54 = vld [vmem:[#allocation6 + $0x350] ss:$8 sps:$4 sm:$0xff]   ;;  %v6988_v55 = vld [vmem:[#allocation6 + $0x280] ss:$8 sps:$4 sm:$0xff]  }
  0xc2   :  { %564 = vmatprep.subr.bf16.mxu1 %v6910_v56  ;;  %346 = vmatprep.subr.bf16.mxu0 %v6906_v57  ;;  %v7002_v56 = vld [vmem:[#allocation6 + $0x364] ss:$8 sps:$4 sm:$0xff]   ;;  %v6996_v57 = vld [vmem:[#allocation6 + $0x294] ss:$8 sps:$4 sm:$0xff]  }
  0xc5   :  { %565 = vmatpush1.bf16.msra.mxu1 %v6914_v58  ;;  %347 = vmatpush1.bf16.msra.mxu0 %v6909_v59  ;;  %v6994_v58 = vld [vmem:[#allocation6 + $0x290] ss:$8 sps:$4 sm:$0xff]   ;;  %v7000_v59 = vld [vmem:[#allocation6 + $0x360] ss:$8 sps:$4 sm:$0xff]  }
  0xc6   :  { %566 = vmatprep.subr.bf16.mxu1 %v6916_v60  ;;  %348 = vmatprep.subr.bf16.mxu0 %v6912_v61  ;;  %v2921_v60 = vld [vmem:[%s9634_s0 + $0x30] sm:$0xff] }
  0xc7   :  { %v7008_v61 = vld [vmem:[#allocation6 + $0x374] ss:$8 sps:$4 sm:$0xff]  }
  0xc9   :  { %567 = vmatpush1.bf16.msra.mxu1 %v6918_v62  ;;  %349 = vmatpush1.bf16.msra.mxu0 %v6915_v63  ;;  %v2924_v62 = vpack.c.bf16 %v2921_v60, %v2921_v60  ;;  %v7005_v63 = vld [vmem:[#allocation6 + $0x384] ss:$8 sps:$4 sm:$0xff]  }
  0xca   :  { %568 = vmatprep.subr.bf16.mxu1 %v6922_v0  ;;  %771 = vmatprep.subr.bf16.mxu0 %v6921_v1  ;;  %v7006_v0 = vld [vmem:[#allocation6 + $0x370] ss:$8 sps:$4 sm:$0xff]   ;;  %v7017_v1 = vld [vmem:[#allocation6 + $0x464] ss:$8 sps:$4 sm:$0xff]  }
  0xcc   :  { %355 = vmatmul.mubr.bf16.vlgmr.msra.gmra.mrb[0].mxu0 %v8161_v4 }
  0xcd   :  { %569 = vmatpush1.bf16.msra.mxu1 %v6924_v2  ;;  %772 = vmatpush1.bf16.msra.mxu0 %v6919_v3 }
  0xce   :  { %1006 = vmatprep.subr.bf16.mxu1 %v6933_v5  ;;  %773 = vmatprep.subr.bf16.mxu0 %v6927_v6  ;;  %v7003_v5 = vld [vmem:[#allocation6 + $0x380] ss:$8 sps:$4 sm:$0xff]  }
  0xd0   :  { %575 = vmatmul.mubr.bf16.vlgmr.msra.gmra.mrb[0].mxu1 %v8161_v4  ;;  %v2457_v4 = vld [vmem:[%s9634_s0 + $0x28] sm:$0xff] }
  0xd1   :  { %1007 = vmatpush1.bf16.msra.mxu1 %v6931_v8  ;;  %774 = vmatpush1.bf16.msra.mxu0 %v6925_v9  ;;  %v2460_v21 = vpack.c.bf16 %v2457_v4, %v2457_v4  ;;  %v7011_v9 = vld [vmem:[#allocation6 + $0x394] ss:$8 sps:$4 sm:$0xff]  }
  0xd2   :  { %1008 = vmatprep.subr.bf16.mxu1 %v6939_v10  ;;  %775 = vmatprep.subr.bf16.mxu0 %v6930_v11 }
  0xd3   :  { %2496 = vrot.lane.b32.xlu1 %v2460_v21, %s7979_s5  ;;  %2958 = vrot.lane.b32.xlu0 %v2460_v21, %s7981_s26 }
  0xd5   :  { %1009 = vmatpush1.bf16.msra.mxu1 %v6937_v12  ;;  %776 = vmatpush1.bf16.msra.mxu0 %v6928_v13  ;;  %v7014_v13 = vld [vmem:[#allocation6 + $0x3a4] ss:$8 sps:$4 sm:$0xff]  }
  0xd6   :  { %1010 = vmatprep.subr.bf16.mxu1 %v6945_v14  ;;  %777 = vmatprep.subr.bf16.mxu0 %v6936_v15  ;;  %v7012_v14 = vld [vmem:[#allocation6 + $0x3a0] ss:$8 sps:$4 sm:$0xff]  }
  0xd7   :  { %1789 = vrot.lane.b32.xlu1 %v8183_v39, %s7980_s19  ;;  %2956 = vrot.lane.b32.xlu0 %v8190_v45, %s7981_s26  ;;  %v7015_v15 = vld [vmem:[#allocation6 + $0x460] ss:$8 sps:$4 sm:$0xff]  }
  0xd9   :  { %1011 = vmatpush1.bf16.msra.mxu1 %v6943_v16  ;;  %778 = vmatpush1.bf16.msra.mxu0 %v6934_v17  ;;  %v7020_v16 = vld [vmem:[#allocation6 + $0x3b4] ss:$8 sps:$4 sm:$0xff]  }
  0xda   :  { %1012 = vmatprep.subr.bf16.mxu1 %v6951_v18  ;;  %779 = vmatprep.subr.bf16.mxu0 %v6942_v19  ;;  %v7023_v18 = vld [vmem:[#allocation6 + $0x474] ss:$8 sps:$4 sm:$0xff]  }
  0xdb   :  { %1787 = vrot.lane.b32.xlu1 %v8165_v7, %s7980_s19  ;;  %2261 = vrot.lane.b32.xlu0 %v2460_v21, %s7982_s27  ;;  %v6979_v7 = vld [vmem:[#allocation6 + $0x320] ss:$8 sps:$4 sm:$0xff]   ;;  %v7021_v21 = vld [vmem:[#allocation6 + $0x470] ss:$8 sps:$4 sm:$0xff]  }
  0xdd   :  { %1013 = vmatpush1.bf16.msra.mxu1 %v6949_v20  ;;  %780 = vmatpush1.bf16.msra.mxu0 %v6940_v22  ;;  %v7018_v20 = vld [vmem:[#allocation6 + $0x3b0] ss:$8 sps:$4 sm:$0xff]   ;;  %v7026_v22 = vld [vmem:[#allocation6 + $0x3c4] ss:$8 sps:$4 sm:$0xff]  }
  0xde   :  { %1014 = vmatprep.subr.bf16.mxu1 %v6957_v23  ;;  %781 = vmatprep.subr.bf16.mxu0 %v6948_v24  ;;  %v7029_v23 = vld [vmem:[#allocation6 + $0x484] ss:$8 sps:$4 sm:$0xff]  }
  0xdf   :  { %2960 = vrot.lane.b32.xlu1 %v2924_v62, %s7981_s26  ;;  %v7071_v62 = vld [vmem:[#allocation6 + $0x4f4] ss:$8 sps:$4 sm:$0xff]  }
  0xe1   :  { %1015 = vmatpush1.bf16.msra.mxu1 %v6955_v25  ;;  %782 = vmatpush1.bf16.msra.mxu0 %v6946_v26  ;;  %v7024_v26 = vld [vmem:[#allocation6 + $0x3c0] ss:$8 sps:$4 sm:$0xff]  }
  0xe2   :  { %1016 = vmatprep.subr.bf16.mxu1 %v6963_v27  ;;  %783 = vmatprep.subr.bf16.mxu0 %v6954_v28  ;;  %v7027_v27 = vld [vmem:[#allocation6 + $0x480] ss:$8 sps:$4 sm:$0xff]   ;;  %v7032_v28 = vld [vmem:[#allocation6 + $0x3d4] ss:$8 sps:$4 sm:$0xff]  }
  0xe3   :  { %2259 = vrot.lane.b32.xlu1 %v8190_v45, %s7982_s27  ;;  %v7009_v45 = vld [vmem:[#allocation6 + $0x390] ss:$8 sps:$4 sm:$0xff]  }
  0xe5   :  { %1017 = vmatpush1.bf16.msra.mxu1 %v6961_v29  ;;  %784 = vmatpush1.bf16.msra.mxu0 %v6952_v30  ;;  %v7035_v29 = vld [vmem:[#allocation6 + $0x494] ss:$8 sps:$4 sm:$0xff]   ;;  %v7030_v30 = vld [vmem:[#allocation6 + $0x3d0] ss:$8 sps:$4 sm:$0xff]  }
  0xe6   :  { %1018 = vmatprep.subr.bf16.mxu1 %v6969_v31  ;;  %785 = vmatprep.subr.bf16.mxu0 %v6960_v32  ;;  %v7033_v31 = vld [vmem:[#allocation6 + $0x490] ss:$8 sps:$4 sm:$0xff]   ;;  %v7038_v32 = vld [vmem:[#allocation6 + $0x3e4] ss:$8 sps:$4 sm:$0xff]  }
  0xe7   :  { %2257 = vrot.lane.b32.xlu1 %v8183_v39, %s7982_s27 }
  0xe9   :  { %1019 = vmatpush1.bf16.msra.mxu1 %v6967_v33  ;;  %786 = vmatpush1.bf16.msra.mxu0 %v6958_v34  ;;  %v7041_v33 = vld [vmem:[#allocation6 + $0x4a4] ss:$8 sps:$4 sm:$0xff]   ;;  %v7036_v34 = vld [vmem:[#allocation6 + $0x3e0] ss:$8 sps:$4 sm:$0xff]  }
  0xea   :  { %1020 = vmatprep.subr.bf16.mxu1 %v6975_v35  ;;  %787 = vmatprep.subr.bf16.mxu0 %v6966_v36  ;;  %v7039_v35 = vld [vmem:[#allocation6 + $0x4a0] ss:$8 sps:$4 sm:$0xff]   ;;  %v7044_v36 = vld [vmem:[#allocation6 + $0x3f4] ss:$8 sps:$4 sm:$0xff]  }
  0xed   :  { %1021 = vmatpush1.bf16.msra.mxu1 %v6973_v37  ;;  %788 = vmatpush1.bf16.msra.mxu0 %v6964_v38  ;;  %v7047_v37 = vld [vmem:[#allocation6 + $0x4b4] ss:$8 sps:$4 sm:$0xff]   ;;  %v7042_v38 = vld [vmem:[#allocation6 + $0x3f0] ss:$8 sps:$4 sm:$0xff]  }
  0xee   :  { %1022 = vmatprep.subr.bf16.mxu1 %v6981_v40  ;;  %789 = vmatprep.subr.bf16.mxu0 %v6972_v41  ;;  %v7045_v40 = vld [vmem:[#allocation6 + $0x4b0] ss:$8 sps:$4 sm:$0xff]   ;;  %v7050_v41 = vld [vmem:[#allocation6 + $0x404] ss:$8 sps:$4 sm:$0xff]  }
  0xf1   :  { %1023 = vmatpush1.bf16.msra.mxu1 %v6979_v7  ;;  %790 = vmatpush1.bf16.msra.mxu0 %v6970_v42  ;;  %v7053_v42 = vld [vmem:[#allocation6 + $0x4c4] ss:$8 sps:$4 sm:$0xff]  }
  0xf2   :  { %1024 = vmatprep.subr.bf16.mxu1 %v6987_v43  ;;  %791 = vmatprep.subr.bf16.mxu0 %v6978_v44  ;;  %v7048_v43 = vld [vmem:[#allocation6 + $0x400] ss:$8 sps:$4 sm:$0xff]  }
  0xf3   :  { %v7051_v44 = vld [vmem:[#allocation6 + $0x4c0] ss:$8 sps:$4 sm:$0xff]  }
  0xf5   :  { %1025 = vmatpush1.bf16.msra.mxu1 %v6985_v46  ;;  %792 = vmatpush1.bf16.msra.mxu0 %v6976_v47  ;;  %v7056_v46 = vld [vmem:[#allocation6 + $0x414] ss:$8 sps:$4 sm:$0xff]  }
  0xf6   :  { %1026 = vmatprep.subr.bf16.mxu1 %v6993_v48  ;;  %793 = vmatprep.subr.bf16.mxu0 %v6984_v49  ;;  %v7059_v48 = vld [vmem:[#allocation6 + $0x4d4] ss:$8 sps:$4 sm:$0xff]  }
  0xf9   :  { %1027 = vmatpush1.bf16.msra.mxu1 %v6991_v50  ;;  %794 = vmatpush1.bf16.msra.mxu0 %v6982_v51  ;;  %v7054_v51 = vld [vmem:[#allocation6 + $0x410] ss:$8 sps:$4 sm:$0xff]  }
  0xfa   :  { %1028 = vmatprep.subr.bf16.mxu1 %v6999_v52  ;;  %795 = vmatprep.subr.bf16.mxu0 %v6990_v53  ;;  %v7057_v52 = vld [vmem:[#allocation6 + $0x4d0] ss:$8 sps:$4 sm:$0xff]   ;;  %v7062_v53 = vld [vmem:[#allocation6 + $0x424] ss:$8 sps:$4 sm:$0xff]  }
  0xfd   :  { %1029 = vmatpush1.bf16.msra.mxu1 %v6997_v54  ;;  %796 = vmatpush1.bf16.msra.mxu0 %v6988_v55  ;;  %v7065_v55 = vld [vmem:[#allocation6 + $0x4e4] ss:$8 sps:$4 sm:$0xff]  }
  0xfe   :  { %1030 = vmatprep.subr.bf16.mxu1 %v7002_v56  ;;  %797 = vmatprep.subr.bf16.mxu0 %v6996_v57  ;;  %v7060_v57 = vld [vmem:[#allocation6 + $0x420] ss:$8 sps:$4 sm:$0xff]  }
 0x101   :  { %1031 = vmatpush1.bf16.msra.mxu1 %v7000_v59  ;;  %798 = vmatpush1.bf16.msra.mxu0 %v6994_v58  ;;  %v7063_v58 = vld [vmem:[#allocation6 + $0x4e0] ss:$8 sps:$4 sm:$0xff]   ;;  %v7068_v59 = vld [vmem:[#allocation6 + $0x434] ss:$8 sps:$4 sm:$0xff]  }
 0x102   :  { %1032 = vmatprep.subr.bf16.mxu1 %v7008_v61  ;;  %1235 = vmatprep.subr.bf16.mxu0 %v7005_v63 }
 0x105   :  { %1033 = vmatpush1.bf16.msra.mxu1 %v7006_v0  ;;  %v7066_v0 = vld [vmem:[#allocation6 + $0x430] ss:$8 sps:$4 sm:$0xff]  }
 0x106   :  { %v8224_v2 = vpop.permute.xlu1 %1085  ;;  %v622_v3 = vpop.permute.xlu0 %621  ;;  %1470 = vmatprep.subr.bf16.mxu1 %v7017_v1  ;;  %v7069_v1 = vld [vmem:[#allocation6 + $0x4f0] ss:$8 sps:$4 sm:$0xff]  }
 0x10a   :  { %v8228_v6 = vpop.permute.xlu1 %1087  ;;  %v624_v8 = vpop.permute.xlu0 %623 }
 0x10b   :  { %v626_v10 = vsel %vm625_vm1, %v622_v3, %v624_v8  ;;  %6081 = vmatprep.mubr.msk.bf16.mxu0 %vm318_vm0, %v624_v8  ;;  %v7074_v3 = vld [vmem:[#allocation6 + $0x444] ss:$8 sps:$4 sm:$0xff]  }
 0x10c   :  { %804 = vmatmul.mubr.bf16.vlgmr.msra.gmra.mrb[4].mxu0 %v626_v10  ;;  %v7077_v8 = vld [vmem:[#allocation6 + $0x504] ss:$8 sps:$4 sm:$0xff]   ;;  %v7075_v10 = vld [vmem:[#allocation6 + $0x500] ss:$8 sps:$4 sm:$0xff]  }
 0x10d   :  { %1236 = vmatpush1.bf16.msra.mxu0 %v7003_v5  ;;  %6139 = vmatprep.mubr.msk.bf16.mxu0 %vm318_vm0, %v8228_v6 }
 0x10e   :  { %v858_v11 = vpop.permute.xlu1 %857  ;;  %v856_v12 = vpop.permute.xlu0 %855  ;;  %1237 = vmatprep.subr.bf16.mxu0 %v7011_v9  ;;  %v7072_v9 = vld [vmem:[#allocation6 + $0x440] ss:$8 sps:$4 sm:$0xff]  }
 0x10f   :  { %v861_v39 = vsel %vm859_vm2, %v856_v12, %v858_v11 }
 0x110   :  { %6110 = vmatprep.mubr.msk.bf16.mxu1 %vm318_vm0, %v861_v39  ;;  %v7078_v39 = vld [vmem:[#allocation6 + $0x450] ss:$8 sps:$4 sm:$0xff]  }
 0x111   :  { %1238 = vmatpush1.bf16.msra.mxu0 %v7009_v45  ;;  %v7080_v45 = vld [vmem:[#allocation6 + $0x454] ss:$8 sps:$4 sm:$0xff]  }
 0x112   :  { %v854_v17 = vpop.permute.xlu0 %853  ;;  %1239 = vmatprep.subr.bf16.mxu0 %v7014_v13  ;;  %v8235_v19 = vpop.permute.xlu1 %1554 }
 0x113   :  { %v860_v4 = vsel %vm859_vm2, %v854_v17, %v856_v12  ;;  %v7083_v12 = vld [vmem:[#allocation6 + $0x514] ss:$8 sps:$4 sm:$0xff]   ;;  %v7084_v17 = vld [vmem:[#allocation6 + $0x520] ss:$8 sps:$4 sm:$0xff]  }
 0x114   :  { %1039 = vmatmul.mubr.bf16.vlgmr.msra.gmra.mrb[4].mxu1 %v860_v4  ;;  %v7092_v4 = vld [vmem:[#allocation6 + $0x534] ss:$8 sps:$4 sm:$0xff]  }
 0x115   :  { %1240 = vmatpush1.bf16.msra.mxu0 %v7012_v14  ;;  %1471 = vmatpush1.bf16.msra.mxu1 %v7015_v15  ;;  %v7081_v14 = vld [vmem:[#allocation6 + $0x510] ss:$8 sps:$4 sm:$0xff]   ;;  %v7086_v15 = vld [vmem:[#allocation6 + $0x524] ss:$8 sps:$4 sm:$0xff]  }
 0x116   :  { %1241 = vmatprep.subr.bf16.mxu0 %v7020_v16  ;;  %1472 = vmatprep.subr.bf16.mxu1 %v7023_v18  ;;  %v1553_v24 = vpop.permute.xlu1 %1552  ;;  %v8242_v7 = vpop.permute.xlu0 %1556  ;;  %v7089_v16 = vld [vmem:[#allocation6 + $0x544] ss:$8 sps:$4 sm:$0xff]   ;;  %v7087_v18 = vld [vmem:[#allocation6 + $0x540] ss:$8 sps:$4 sm:$0xff]  }
 0x117   :  { %v8240_v25 = vsel %vm1558_vm3, %v1553_v24, %v8235_v19  ;;  %v7093_v24 = vld [vmem:[#allocation6 + $0x550] ss:$8 sps:$4 sm:$0xff]  }
 0x119   :  { %1242 = vmatpush1.bf16.msra.mxu0 %v7018_v20  ;;  %1473 = vmatpush1.bf16.msra.mxu1 %v7021_v21  ;;  %v7095_v20 = vld [vmem:[#allocation6 + $0x554] ss:$8 sps:$4 sm:$0xff]   ;;  %v1090_v21 = vsel %vm1089_vm7, %v8224_v2, %v8228_v6 }
 0x11a   :  { %1243 = vmatprep.subr.bf16.mxu0 %v7026_v22  ;;  %1474 = vmatprep.subr.bf16.mxu1 %v7029_v23  ;;  %v2025_v47 = vpop.permute.xlu0 %2024  ;;  %v2027_v49 = vpop.permute.xlu1 %2026  ;;  %v1560_v22 = vsel %vm1558_vm3, %v8235_v19, %v8242_v7  ;;  %v7090_v23 = vld [vmem:[#allocation6 + $0x530] ss:$8 sps:$4 sm:$0xff]   ;;  %v7104_v6 = vld [vmem:[#allocation6 + $0x574] ss:$8 sps:$4 sm:$0xff]  }
 0x11b   :  { %v8245_v50 = vsel %vm2028_vm4, %v2025_v47, %v2027_v49  ;;  %v7107_v19 = vld [vmem:[#allocation6 + $0x634] ss:$8 sps:$4 sm:$0xff]   ;;  %v7117_v49 = vld [vmem:[#allocation6 + $0x650] ss:$8 sps:$4 sm:$0xff]  }
 0x11c   :  { %v7116_v7 = vld [vmem:[#allocation6 + $0x594] ss:$8 sps:$4 sm:$0xff]  }
 0x11d   :  { %1244 = vmatpush1.bf16.msra.mxu0 %v7024_v26  ;;  %1475 = vmatpush1.bf16.msra.mxu1 %v7027_v27  ;;  %v7098_v26 = vld [vmem:[#allocation6 + $0x564] ss:$8 sps:$4 sm:$0xff]  }
 0x11e   :  { %1245 = vmatprep.subr.bf16.mxu0 %v7032_v28  ;;  %1476 = vmatprep.subr.bf16.mxu1 %v7035_v29  ;;  %v2023_v54 = vpop.permute.xlu0 %2022  ;;  %v1320_v60 = vpop.permute.xlu1 %1319  ;;  %v7101_v28 = vld [vmem:[#allocation6 + $0x624] ss:$8 sps:$4 sm:$0xff]   ;;  %v7096_v29 = vld [vmem:[#allocation6 + $0x560] ss:$8 sps:$4 sm:$0xff]  }
 0x11f   :  { %v8248_v56 = vsel %vm2028_vm4, %v2023_v54, %v2025_v47  ;;  %v7123_v54 = vld [vmem:[#allocation6 + $0x660] ss:$8 sps:$4 sm:$0xff]  }
 0x121   :  { %1246 = vmatpush1.bf16.msra.mxu0 %v7030_v30  ;;  %1477 = vmatpush1.bf16.msra.mxu1 %v7033_v31  ;;  %v7099_v30 = vld [vmem:[#allocation6 + $0x620] ss:$8 sps:$4 sm:$0xff]  }
 0x122   :  { %1247 = vmatprep.subr.bf16.mxu0 %v7038_v32  ;;  %1478 = vmatprep.subr.bf16.mxu1 %v7041_v33  ;;  %v1322_v61 = vpop.permute.xlu0 %1321  ;;  %v1318_v27 = vpop.permute.xlu1 %1317  ;;  %v7102_v32 = vld [vmem:[#allocation6 + $0x570] ss:$8 sps:$4 sm:$0xff]  }
 0x123   :  { %v1325_v63 = vsel %vm1323_vm5, %v1320_v60, %v1322_v61  ;;  %v1324_v2 = vsel %vm1323_vm5, %v1318_v27, %v1320_v60  ;;  %v7105_v33 = vld [vmem:[#allocation6 + $0x630] ss:$8 sps:$4 sm:$0xff]   ;;  %v7134_v60 = vld [vmem:[#allocation6 + $0x5c4] ss:$8 sps:$4 sm:$0xff]  }
 0x124   :  { %6168 = vmatprep.mubr.msk.bf16.mxu1 %vm318_vm0, %v1325_v63  ;;  %v7137_v61 = vld [vmem:[#allocation6 + $0x684] ss:$8 sps:$4 sm:$0xff]   ;;  %v7135_v63 = vld [vmem:[#allocation6 + $0x680] ss:$8 sps:$4 sm:$0xff]  }
 0x125   :  { %1248 = vmatpush1.bf16.msra.mxu0 %v7036_v34  ;;  %1479 = vmatpush1.bf16.msra.mxu1 %v7039_v35  ;;  %v7110_v34 = vld [vmem:[#allocation6 + $0x584] ss:$8 sps:$4 sm:$0xff]  }
 0x126   :  { %1249 = vmatprep.subr.bf16.mxu0 %v7044_v36  ;;  %1480 = vmatprep.subr.bf16.mxu1 %v7047_v37  ;;  %v8252_v5 = vpop.permute.xlu0 %2494  ;;  %v7113_v36 = vld [vmem:[#allocation6 + $0x644] ss:$8 sps:$4 sm:$0xff]  }
 0x127   :  { %v7170_v27 = vld [vmem:[#allocation6 + $0x6e4] ss:$8 sps:$4 sm:$0xff]  }
 0x129   :  { %1250 = vmatpush1.bf16.msra.mxu0 %v7042_v38  ;;  %1481 = vmatpush1.bf16.msra.mxu1 %v7045_v40  ;;  %v7108_v40 = vld [vmem:[#allocation6 + $0x580] ss:$8 sps:$4 sm:$0xff]  }
 0x12a   :  { %1251 = vmatprep.subr.bf16.mxu0 %v7050_v41  ;;  %1482 = vmatprep.subr.bf16.mxu1 %v7053_v42  ;;  %v2493_v11 = vpop.permute.xlu0 %2492  ;;  %v7111_v41 = vld [vmem:[#allocation6 + $0x640] ss:$8 sps:$4 sm:$0xff]  }
 0x12b   :  { %v8256_v13 = vsel %vm2498_vm6, %v2493_v11, %v8252_v5  ;;  %v7152_v11 = vld [vmem:[#allocation6 + $0x5f4] ss:$8 sps:$4 sm:$0xff]  }
 0x12d   :  { %1252 = vmatpush1.bf16.msra.mxu0 %v7048_v43  ;;  %1483 = vmatpush1.bf16.msra.mxu1 %v7051_v44  ;;  %v7119_v43 = vld [vmem:[#allocation6 + $0x654] ss:$8 sps:$4 sm:$0xff]  }
 0x12e   :  { %1253 = vmatprep.subr.bf16.mxu0 %v7056_v46  ;;  %1484 = vmatprep.subr.bf16.mxu1 %v7059_v48  ;;  %v1792_v31 = vpop.permute.xlu0 %1791  ;;  %v7114_v48 = vld [vmem:[#allocation6 + $0x590] ss:$8 sps:$4 sm:$0xff]  }
 0x131   :  { %1254 = vmatpush1.bf16.msra.mxu0 %v7054_v51  ;;  %1485 = vmatpush1.bf16.msra.mxu1 %v7057_v52  ;;  %v7122_v51 = vld [vmem:[#allocation6 + $0x5a4] ss:$8 sps:$4 sm:$0xff]  }
 0x132   :  { %1255 = vmatprep.subr.bf16.mxu0 %v7062_v53  ;;  %1486 = vmatprep.subr.bf16.mxu1 %v7065_v55  ;;  %v7125_v52 = vld [vmem:[#allocation6 + $0x664] ss:$8 sps:$4 sm:$0xff]   ;;  %v7120_v53 = vld [vmem:[#allocation6 + $0x5a0] ss:$8 sps:$4 sm:$0xff]   ;;  %v7128_v55 = vld [vmem:[#allocation6 + $0x5b4] ss:$8 sps:$4 sm:$0xff]  }
 0x135   :  { %1256 = vmatpush1.bf16.msra.mxu0 %v7060_v57  ;;  %1487 = vmatpush1.bf16.msra.mxu1 %v7063_v58  ;;  %v7131_v57 = vld [vmem:[#allocation6 + $0x674] ss:$8 sps:$4 sm:$0xff]   ;;  %v7126_v58 = vld [vmem:[#allocation6 + $0x5b0] ss:$8 sps:$4 sm:$0xff]  }
 0x136   :  { %1257 = vmatprep.subr.bf16.mxu0 %v7068_v59  ;;  %1488 = vmatprep.subr.bf16.mxu1 %v7071_v62  ;;  %v7129_v59 = vld [vmem:[#allocation6 + $0x670] ss:$8 sps:$4 sm:$0xff]   ;;  %v7132_v62 = vld [vmem:[#allocation6 + $0x5c0] ss:$8 sps:$4 sm:$0xff]  }
 0x139   :  { %1258 = vmatpush1.bf16.msra.mxu0 %v7066_v0  ;;  %1489 = vmatpush1.bf16.msra.mxu1 %v7069_v1  ;;  %v7140_v0 = vld [vmem:[#allocation6 + $0x5d4] ss:$8 sps:$4 sm:$0xff]  }
 0x13a   :  { %1259 = vmatprep.subr.bf16.mxu0 %v7074_v3  ;;  %1490 = vmatprep.subr.bf16.mxu1 %v7077_v8  ;;  %v7143_v1 = vld [vmem:[#allocation6 + $0x694] ss:$8 sps:$4 sm:$0xff]   ;;  %v7138_v3 = vld [vmem:[#allocation6 + $0x5d0] ss:$8 sps:$4 sm:$0xff]   ;;  %v7146_v8 = vld [vmem:[#allocation6 + $0x5e4] ss:$8 sps:$4 sm:$0xff]  }
 0x13d   :  { %1260 = vmatpush1.bf16.msra.mxu0 %v7072_v9  ;;  %1491 = vmatpush1.bf16.msra.mxu1 %v7075_v10  ;;  %v7149_v9 = vld [vmem:[#allocation6 + $0x6a4] ss:$8 sps:$4 sm:$0xff]   ;;  %v7144_v10 = vld [vmem:[#allocation6 + $0x5e0] ss:$8 sps:$4 sm:$0xff]  }
 0x13e   :  { %1261 = vmatprep.subr.bf16.mxu0 %v7080_v45  ;;  %1492 = vmatprep.subr.bf16.mxu1 %v7083_v12  ;;  %v7147_v45 = vld [vmem:[#allocation6 + $0x6a0] ss:$8 sps:$4 sm:$0xff]   ;;  %v7155_v12 = vld [vmem:[#allocation6 + $0x6b4] ss:$8 sps:$4 sm:$0xff]  }
 0x141   :  { %1262 = vmatpush1.bf16.msra.mxu0 %v7078_v39  ;;  %1493 = vmatpush1.bf16.msra.mxu1 %v7081_v14  ;;  %v7150_v39 = vld [vmem:[#allocation6 + $0x5f0] ss:$8 sps:$4 sm:$0xff]  }
 0x142   :  { %1494 = vmatprep.subr.bf16.mxu1 %v7086_v15  ;;  %1705 = vmatprep.subr.bf16.mxu0 %v7089_v16  ;;  %v7153_v14 = vld [vmem:[#allocation6 + $0x6b0] ss:$8 sps:$4 sm:$0xff]   ;;  %v7158_v15 = vld [vmem:[#allocation6 + $0x604] ss:$8 sps:$4 sm:$0xff]  }
 0x143   :  { %v7161_v16 = vld [vmem:[#allocation6 + $0x6c4] ss:$8 sps:$4 sm:$0xff]  }
 0x144   :  { %1268 = vmatmul.mubr.bf16.vlgmr.msra.gmra.mrb[8].mxu0 %v1090_v21  ;;  %v7167_v21 = vld [vmem:[#allocation6 + $0x6d4] ss:$8 sps:$4 sm:$0xff]  }
 0x145   :  { %1495 = vmatpush1.bf16.msra.mxu1 %v7084_v17  ;;  %1706 = vmatpush1.bf16.msra.mxu0 %v7087_v18  ;;  %v2497_v35 = vpop.permute.xlu1 %2496  ;;  %v8269_v38 = vpop.permute.xlu0 %2958  ;;  %v7156_v18 = vld [vmem:[#allocation6 + $0x600] ss:$8 sps:$4 sm:$0xff]  }
 0x146   :  { %1496 = vmatprep.subr.bf16.mxu1 %v7092_v4  ;;  %1707 = vmatprep.subr.bf16.mxu0 %v7095_v20  ;;  %v8267_v37 = vsel %vm2498_vm6, %v8252_v5, %v2497_v35  ;;  %v7141_v5 = vld [vmem:[#allocation6 + $0x690] ss:$8 sps:$4 sm:$0xff]   ;;  %v7159_v4 = vld [vmem:[#allocation6 + $0x6c0] ss:$8 sps:$4 sm:$0xff]   ;;  %v7164_v20 = vld [vmem:[#allocation6 + $0x614] ss:$8 sps:$4 sm:$0xff]  }
 0x147   :  { %6197 = vmatprep.mubr.msk.bf16.mxu0 %vm318_vm0, %v1560_v22  ;;  %v7183_v35 = vld [vmem:[#allocation6 + $0x7e0] ss:$8 sps:$4 sm:$0xff]  }
 0x149   :  { %1497 = vmatpush1.bf16.msra.mxu1 %v7090_v23  ;;  %1708 = vmatpush1.bf16.msra.mxu0 %v7093_v24  ;;  %v8271_v42 = vpop.permute.xlu1 %1789  ;;  %v2957_v46 = vpop.permute.xlu0 %2956  ;;  %v7162_v23 = vld [vmem:[#allocation6 + $0x610] ss:$8 sps:$4 sm:$0xff]  }
 0x14a   :  { %1709 = vmatprep.subr.bf16.mxu0 %v7098_v26  ;;  %1940 = vmatprep.subr.bf16.mxu1 %v7101_v28  ;;  %v1795_v44 = vsel %vm1793_vm8, %v8271_v42, %v1792_v31  ;;  %v8278_v47 = vsel %vm2962_vm9, %v2957_v46, %v8269_v38  ;;  %v7165_v26 = vld [vmem:[#allocation6 + $0x6d0] ss:$8 sps:$4 sm:$0xff]   ;;  %v7173_v28 = vld [vmem:[#allocation6 + $0x704] ss:$8 sps:$4 sm:$0xff]  }
 0x14b   :  { %v7177_v31 = vld [vmem:[#allocation6 + $0x710] ss:$8 sps:$4 sm:$0xff]   ;;  %v7197_v46 = vld [vmem:[#allocation6 + $0x804] ss:$8 sps:$4 sm:$0xff]  }
 0x14c   :  { %1503 = vmatmul.mubr.bf16.vlgmr.msra.gmra.mrb[8].mxu1 %v1324_v2  ;;  %v7176_v2 = vld [vmem:[#allocation6 + $0x6f4] ss:$8 sps:$4 sm:$0xff]  }
 0x14d   :  { %1710 = vmatpush1.bf16.msra.mxu0 %v7096_v29  ;;  %1941 = vmatpush1.bf16.msra.mxu1 %v7099_v30  ;;  %v1788_v17 = vpop.permute.xlu1 %1787  ;;  %v7168_v29 = vld [vmem:[#allocation6 + $0x6e0] ss:$8 sps:$4 sm:$0xff]  }
 0x14e   :  { %1711 = vmatprep.subr.bf16.mxu0 %v7104_v6  ;;  %1942 = vmatprep.subr.bf16.mxu1 %v7107_v19  ;;  %v7171_v30 = vld [vmem:[#allocation6 + $0x700] ss:$8 sps:$4 sm:$0xff]   ;;  %v7179_v6 = vld [vmem:[#allocation6 + $0x714] ss:$8 sps:$4 sm:$0xff]   ;;  %v7174_v19 = vld [vmem:[#allocation6 + $0x6f0] ss:$8 sps:$4 sm:$0xff]  }
 0x14f   :  { %6226 = vmatprep.mubr.msk.bf16.mxu1 %vm318_vm0, %v1795_v44 }
 0x151   :  { %1712 = vmatpush1.bf16.msra.mxu0 %v7102_v32  ;;  %1943 = vmatpush1.bf16.msra.mxu1 %v7105_v33  ;;  %v2961_v22 = vpop.permute.xlu1 %2960  ;;  %v7182_v32 = vld [vmem:[#allocation6 + $0x724] ss:$8 sps:$4 sm:$0xff]  }
 0x152   :  { %1713 = vmatprep.subr.bf16.mxu0 %v7110_v34  ;;  %1944 = vmatprep.subr.bf16.mxu1 %v7113_v36  ;;  %v8282_v24 = vsel %vm2962_vm9, %v8269_v38, %v2961_v22  ;;  %v7185_v33 = vld [vmem:[#allocation6 + $0x7e4] ss:$8 sps:$4 sm:$0xff]   ;;  %v7180_v34 = vld [vmem:[#allocation6 + $0x720] ss:$8 sps:$4 sm:$0xff]   ;;  %v1794_v36 = vsel %vm1793_vm8, %v1788_v17, %v8271_v42  ;;  %v7188_v38 = vld [vmem:[#allocation6 + $0x734] ss:$8 sps:$4 sm:$0xff]  }
 0x153   :  { %v7192_v42 = vld [vmem:[#allocation6 + $0x740] ss:$8 sps:$4 sm:$0xff]  }
 0x155   :  { %1714 = vmatpush1.bf16.msra.mxu0 %v7108_v40  ;;  %1945 = vmatpush1.bf16.msra.mxu1 %v7111_v41  ;;  %v7191_v40 = vld [vmem:[#allocation6 + $0x7f4] ss:$8 sps:$4 sm:$0xff]   ;;  %v7186_v41 = vld [vmem:[#allocation6 + $0x730] ss:$8 sps:$4 sm:$0xff]  }
 0x156   :  { %1715 = vmatprep.subr.bf16.mxu0 %v7116_v7  ;;  %1946 = vmatprep.subr.bf16.mxu1 %v7119_v43  ;;  %v7189_v7 = vld [vmem:[#allocation6 + $0x7f0] ss:$8 sps:$4 sm:$0xff]   ;;  %v8289_v43 = vpop.permute.xlu1 %2259 }
 0x159   :  { %1716 = vmatpush1.bf16.msra.mxu0 %v7114_v48  ;;  %1947 = vmatpush1.bf16.msra.mxu1 %v7117_v49  ;;  %v7195_v48 = vld [vmem:[#allocation6 + $0x800] ss:$8 sps:$4 sm:$0xff]   ;;  %v7200_v49 = vld [vmem:[#allocation6 + $0x754] ss:$8 sps:$4 sm:$0xff]  }
 0x15a   :  { %1717 = vmatprep.subr.bf16.mxu0 %v7122_v51  ;;  %1948 = vmatprep.subr.bf16.mxu1 %v7125_v52  ;;  %v7203_v51 = vld [vmem:[#allocation6 + $0x814] ss:$8 sps:$4 sm:$0xff]   ;;  %v7198_v52 = vld [vmem:[#allocation6 + $0x750] ss:$8 sps:$4 sm:$0xff]  }
 0x15d   :  { %1718 = vmatpush1.bf16.msra.mxu0 %v7120_v53  ;;  %1949 = vmatpush1.bf16.msra.mxu1 %v7123_v54  ;;  %v7201_v53 = vld [vmem:[#allocation6 + $0x810] ss:$8 sps:$4 sm:$0xff]   ;;  %v7206_v54 = vld [vmem:[#allocation6 + $0x764] ss:$8 sps:$4 sm:$0xff]  }
 0x15e   :  { %1719 = vmatprep.subr.bf16.mxu0 %v7128_v55  ;;  %1950 = vmatprep.subr.bf16.mxu1 %v7131_v57  ;;  %v7209_v55 = vld [vmem:[#allocation6 + $0x824] ss:$8 sps:$4 sm:$0xff]   ;;  %v7204_v57 = vld [vmem:[#allocation6 + $0x760] ss:$8 sps:$4 sm:$0xff]  }
 0x161   :  { %1720 = vmatpush1.bf16.msra.mxu0 %v7126_v58  ;;  %1951 = vmatpush1.bf16.msra.mxu1 %v7129_v59  ;;  %v7207_v58 = vld [vmem:[#allocation6 + $0x820] ss:$8 sps:$4 sm:$0xff]   ;;  %v7212_v59 = vld [vmem:[#allocation6 + $0x774] ss:$8 sps:$4 sm:$0xff]  }
 0x162   :  { %1721 = vmatprep.subr.bf16.mxu0 %v7134_v60  ;;  %1952 = vmatprep.subr.bf16.mxu1 %v7137_v61  ;;  %v7215_v60 = vld [vmem:[#allocation6 + $0x834] ss:$8 sps:$4 sm:$0xff]   ;;  %v7210_v61 = vld [vmem:[#allocation6 + $0x770] ss:$8 sps:$4 sm:$0xff]  }
 0x165   :  { %1722 = vmatpush1.bf16.msra.mxu0 %v7132_v62  ;;  %1953 = vmatpush1.bf16.msra.mxu1 %v7135_v63  ;;  %v7213_v62 = vld [vmem:[#allocation6 + $0x830] ss:$8 sps:$4 sm:$0xff]   ;;  %v7218_v63 = vld [vmem:[#allocation6 + $0x784] ss:$8 sps:$4 sm:$0xff]  }
 0x166   :  { %1723 = vmatprep.subr.bf16.mxu0 %v7140_v0  ;;  %1954 = vmatprep.subr.bf16.mxu1 %v7143_v1  ;;  %v7221_v0 = vld [vmem:[#allocation6 + $0x844] ss:$8 sps:$4 sm:$0xff]   ;;  %v7216_v1 = vld [vmem:[#allocation6 + $0x780] ss:$8 sps:$4 sm:$0xff]  }
 0x169   :  { %1724 = vmatpush1.bf16.msra.mxu0 %v7138_v3  ;;  %1955 = vmatpush1.bf16.msra.mxu1 %v7141_v5  ;;  %v7219_v3 = vld [vmem:[#allocation6 + $0x840] ss:$8 sps:$4 sm:$0xff]   ;;  %v7224_v5 = vld [vmem:[#allocation6 + $0x794] ss:$8 sps:$4 sm:$0xff]  }
 0x16a   :  { %1725 = vmatprep.subr.bf16.mxu0 %v7146_v8  ;;  %1956 = vmatprep.subr.bf16.mxu1 %v7149_v9  ;;  %v7227_v8 = vld [vmem:[#allocation6 + $0x854] ss:$8 sps:$4 sm:$0xff]   ;;  %v7222_v9 = vld [vmem:[#allocation6 + $0x790] ss:$8 sps:$4 sm:$0xff]  }
 0x16d   :  { %1726 = vmatpush1.bf16.msra.mxu0 %v7144_v10  ;;  %1957 = vmatpush1.bf16.msra.mxu1 %v7147_v45  ;;  %v7225_v10 = vld [vmem:[#allocation6 + $0x850] ss:$8 sps:$4 sm:$0xff]   ;;  %v7230_v45 = vld [vmem:[#allocation6 + $0x7a4] ss:$8 sps:$4 sm:$0xff]  }
 0x16e   :  { %1727 = vmatprep.subr.bf16.mxu0 %v7152_v11  ;;  %1958 = vmatprep.subr.bf16.mxu1 %v7155_v12  ;;  %v7233_v11 = vld [vmem:[#allocation6 + $0x864] ss:$8 sps:$4 sm:$0xff]   ;;  %v7228_v12 = vld [vmem:[#allocation6 + $0x7a0] ss:$8 sps:$4 sm:$0xff]  }
 0x171   :  { %1728 = vmatpush1.bf16.msra.mxu0 %v7150_v39  ;;  %1959 = vmatpush1.bf16.msra.mxu1 %v7153_v14  ;;  %v7231_v39 = vld [vmem:[#allocation6 + $0x860] ss:$8 sps:$4 sm:$0xff]   ;;  %v7236_v14 = vld [vmem:[#allocation6 + $0x7b4] ss:$8 sps:$4 sm:$0xff]  }
 0x172   :  { %1729 = vmatprep.subr.bf16.mxu0 %v7158_v15  ;;  %1960 = vmatprep.subr.bf16.mxu1 %v7161_v16  ;;  %v7239_v15 = vld [vmem:[#allocation6 + $0x874] ss:$8 sps:$4 sm:$0xff]  }
 0x175   :  { %1730 = vmatpush1.bf16.msra.mxu0 %v7156_v18  ;;  %1961 = vmatpush1.bf16.msra.mxu1 %v7159_v4  ;;  %v7234_v4 = vld [vmem:[#allocation6 + $0x7b0] ss:$8 sps:$4 sm:$0xff]  }
 0x176   :  { %1731 = vmatprep.subr.bf16.mxu0 %v7164_v20  ;;  %1962 = vmatprep.subr.bf16.mxu1 %v7167_v21  ;;  %v7237_v20 = vld [vmem:[#allocation6 + $0x870] ss:$8 sps:$4 sm:$0xff]  }
 0x179   :  { %1732 = vmatpush1.bf16.msra.mxu0 %v7162_v23  ;;  %1963 = vmatpush1.bf16.msra.mxu1 %v7165_v26  ;;  %v7242_v23 = vld [vmem:[#allocation6 + $0x7c4] ss:$8 sps:$4 sm:$0xff]  }
 0x17a   :  { %1964 = vmatprep.subr.bf16.mxu1 %v7170_v27  ;;  %2175 = vmatprep.subr.bf16.mxu0 %v7173_v28  ;;  %v7245_v26 = vld [vmem:[#allocation6 + $0x884] ss:$8 sps:$4 sm:$0xff]  }
 0x17c   :  { %1738 = vmatmul.mubr.bf16.vlgmr.msra.gmra.mrb[12].mxu0 %v8240_v25  ;;  %v2262_v25 = vpop.permute.xlu0 %2261 }
 0x17d   :  { %1965 = vmatpush1.bf16.msra.mxu1 %v7168_v29  ;;  %2176 = vmatpush1.bf16.msra.mxu0 %v7171_v30  ;;  %v2265_v44 = vsel %vm2263_vm10, %v8289_v43, %v2262_v25  ;;  %v7240_v30 = vld [vmem:[#allocation6 + $0x7c0] ss:$8 sps:$4 sm:$0xff]   ;;  %v7258_v25 = vld [vmem:[#allocation6 + $0x8b0] ss:$8 sps:$4 sm:$0xff]  }
 0x17e   :  { %1966 = vmatprep.subr.bf16.mxu1 %v7176_v2  ;;  %2177 = vmatprep.subr.bf16.mxu0 %v7179_v6  ;;  %v7243_v2 = vld [vmem:[#allocation6 + $0x880] ss:$8 sps:$4 sm:$0xff]   ;;  %v7248_v6 = vld [vmem:[#allocation6 + $0x7d4] ss:$8 sps:$4 sm:$0xff]  }
 0x17f   :  { %6255 = vmatprep.mubr.msk.bf16.mxu0 %vm318_vm0, %v8245_v50  ;;  %v7194_v50 = vld [vmem:[#allocation6 + $0x744] ss:$8 sps:$4 sm:$0xff]  }
 0x181   :  { %1967 = vmatpush1.bf16.msra.mxu1 %v7174_v19  ;;  %2178 = vmatpush1.bf16.msra.mxu0 %v7177_v31  ;;  %v7251_v19 = vld [vmem:[#allocation6 + $0x894] ss:$8 sps:$4 sm:$0xff]   ;;  %v7246_v31 = vld [vmem:[#allocation6 + $0x7d0] ss:$8 sps:$4 sm:$0xff]  }
 0x182   :  { %2179 = vmatprep.subr.bf16.mxu0 %v7182_v32  ;;  %2410 = vmatprep.subr.bf16.mxu1 %v7185_v33  ;;  %v7249_v32 = vld [vmem:[#allocation6 + $0x890] ss:$8 sps:$4 sm:$0xff]   ;;  %v7254_v33 = vld [vmem:[#allocation6 + $0x8a4] ss:$8 sps:$4 sm:$0xff]  }
 0x184   :  { %1973 = vmatmul.mubr.bf16.vlgmr.msra.gmra.mrb[12].mxu1 %v1794_v36  ;;  %v7255_v36 = vld [vmem:[#allocation6 + $0x8c0] ss:$8 sps:$4 sm:$0xff]  }
 0x185   :  { %2180 = vmatpush1.bf16.msra.mxu0 %v7180_v34  ;;  %2411 = vmatpush1.bf16.msra.mxu1 %v7183_v35  ;;  %v7257_v34 = vld [vmem:[#allocation6 + $0x8c4] ss:$8 sps:$4 sm:$0xff]   ;;  %v7252_v35 = vld [vmem:[#allocation6 + $0x8a0] ss:$8 sps:$4 sm:$0xff]  }
 0x186   :  { %2181 = vmatprep.subr.bf16.mxu0 %v7188_v38  ;;  %2412 = vmatprep.subr.bf16.mxu1 %v7191_v40  ;;  %v7260_v38 = vld [vmem:[#allocation6 + $0x8b4] ss:$8 sps:$4 sm:$0xff]  }
 0x187   :  { %6284 = vmatprep.mubr.msk.bf16.mxu1 %vm318_vm0, %v2265_v44  ;;  %v7263_v40 = vld [vmem:[#allocation6 + $0x8d4] ss:$8 sps:$4 sm:$0xff]   ;;  %v136_v44 = vlaneseq }
 0x189   :  { %2182 = vmatpush1.bf16.msra.mxu0 %v7186_v41  ;;  %2413 = vmatpush1.bf16.msra.mxu1 %v7189_v7  ;;  %v7261_v41 = vld [vmem:[#allocation6 + $0x8d0] ss:$8 sps:$4 sm:$0xff]   ;;  %v7266_v7 = vld [vmem:[#allocation6 + $0x8e4] ss:$8 sps:$4 sm:$0xff]  }
 0x18a   :  { %2183 = vmatprep.subr.bf16.mxu0 %v7194_v50  ;;  %2414 = vmatprep.subr.bf16.mxu1 %v7197_v46  ;;  %v2258_v50 = vpop.permute.xlu1 %2257  ;;  %v7347_v46 = vld [vmem:[#allocation6 + $0x9a4] ss:$8 sps:$4 sm:$0xff]  }
 0x18d   :  { %2184 = vmatpush1.bf16.msra.mxu0 %v7192_v42  ;;  %2415 = vmatpush1.bf16.msra.mxu1 %v7195_v48  ;;  %v2264_v42 = vsel %vm2263_vm10, %v2258_v50, %v8289_v43  ;;  %v7264_v48 = vld [vmem:[#allocation6 + $0x8e0] ss:$8 sps:$4 sm:$0xff]   ;;  %v7275_v43 = vld [vmem:[#allocation6 + $0x914] ss:$8 sps:$4 sm:$0xff]  }
 0x18e   :  { %2185 = vmatprep.subr.bf16.mxu0 %v7200_v49  ;;  %2416 = vmatprep.subr.bf16.mxu1 %v7203_v51  ;;  %v7345_v49 = vld [vmem:[#allocation6 + $0x9a0] ss:$8 sps:$4 sm:$0xff]   ;;  %v8307_v51 = vshrl.u32 %v136_v44, 7 }
 0x190   :  { %9831 = vst [vmem:[#allocation24_spill] sm:$0xff] %v8307_v51 }
 0x191   :  { %2186 = vmatpush1.bf16.msra.mxu0 %v7198_v52  ;;  %2417 = vmatpush1.bf16.msra.mxu1 %v7201_v53  ;;  %v7353_v52 = vld [vmem:[#allocation6 + $0x9b4] ss:$8 sps:$4 sm:$0xff]   ;;  %v7267_v53 = vld [vmem:[#allocation6 + $0x8f0] ss:$8 sps:$4 sm:$0xff]  }
 0x192   :  { %2187 = vmatprep.subr.bf16.mxu0 %v7206_v54  ;;  %2418 = vmatprep.subr.bf16.mxu1 %v7209_v55  ;;  %v7272_v54 = vld [vmem:[#allocation6 + $0x904] ss:$8 sps:$4 sm:$0xff]   ;;  %v7351_v55 = vld [vmem:[#allocation6 + $0x9b0] ss:$8 sps:$4 sm:$0xff]  }
 0x195   :  { %2188 = vmatpush1.bf16.msra.mxu0 %v7204_v57  ;;  %2419 = vmatpush1.bf16.msra.mxu1 %v7207_v58  ;;  %v7270_v57 = vld [vmem:[#allocation6 + $0x900] ss:$8 sps:$4 sm:$0xff]  }
 0x196   :  { %2189 = vmatprep.subr.bf16.mxu0 %v7212_v59  ;;  %2420 = vmatprep.subr.bf16.mxu1 %v7215_v60  ;;  %v7357_v58 = vld [vmem:[#allocation6 + $0x9c0] ss:$8 sps:$4 sm:$0xff]   ;;  %v7365_v59 = vld [vmem:[#allocation6 + $0x9d4] ss:$8 sps:$4 sm:$0xff]   ;;  %v7273_v60 = vld [vmem:[#allocation6 + $0x910] ss:$8 sps:$4 sm:$0xff]  }
 0x199   :  { %2190 = vmatpush1.bf16.msra.mxu0 %v7210_v61  ;;  %2421 = vmatpush1.bf16.msra.mxu1 %v7213_v62  ;;  %v7278_v61 = vld [vmem:[#allocation6 + $0x924] ss:$8 sps:$4 sm:$0xff]   ;;  %v7363_v62 = vld [vmem:[#allocation6 + $0x9d0] ss:$8 sps:$4 sm:$0xff]  }
 0x19a   :  { %2191 = vmatprep.subr.bf16.mxu0 %v7218_v63  ;;  %2422 = vmatprep.subr.bf16.mxu1 %v7221_v0  ;;  %v7371_v63 = vld [vmem:[#allocation6 + $0x9e4] ss:$8 sps:$4 sm:$0xff]   ;;  %v7276_v0 = vld [vmem:[#allocation6 + $0x920] ss:$8 sps:$4 sm:$0xff]  }
 0x19d   :  { %2192 = vmatpush1.bf16.msra.mxu0 %v7216_v1  ;;  %2423 = vmatpush1.bf16.msra.mxu1 %v7219_v3  ;;  %v7369_v1 = vld [vmem:[#allocation6 + $0x9e0] ss:$8 sps:$4 sm:$0xff]   ;;  %v7281_v3 = vld [vmem:[#allocation6 + $0x934] ss:$8 sps:$4 sm:$0xff]  }
 0x19e   :  { %2193 = vmatprep.subr.bf16.mxu0 %v7224_v5  ;;  %2424 = vmatprep.subr.bf16.mxu1 %v7227_v8  ;;  %v7377_v5 = vld [vmem:[#allocation6 + $0x9f4] ss:$8 sps:$4 sm:$0xff]   ;;  %v7279_v8 = vld [vmem:[#allocation6 + $0x930] ss:$8 sps:$4 sm:$0xff]  }
 0x19f   :  { %v8294_v16 = vpop.f32.mrb[0].mxu0 }
 0x1a0   :  { %v8296_v17 = vpop.f32.mrb[1].mxu0 }
 0x1a1   :  { %2194 = vmatpush1.bf16.msra.mxu0 %v7222_v9  ;;  %2425 = vmatpush1.bf16.msra.mxu1 %v7225_v10  ;;  %v360_v18 = vpop.f32.mrb[2].mxu0  ;;  %v7284_v9 = vld [vmem:[#allocation6 + $0x944] ss:$8 sps:$4 sm:$0xff]   ;;  %v7375_v10 = vld [vmem:[#allocation6 + $0x9f0] ss:$8 sps:$4 sm:$0xff]  }
 0x1a2   :  { %2195 = vmatprep.subr.bf16.mxu0 %v7230_v45  ;;  %2426 = vmatprep.subr.bf16.mxu1 %v7233_v11  ;;  %v361_v21 = vpop.f32.mrb[3].mxu0  ;;  %v7383_v45 = vld [vmem:[#allocation6 + $0xa04] ss:$8 sps:$4 sm:$0xff]   ;;  %v7282_v11 = vld [vmem:[#allocation6 + $0x940] ss:$8 sps:$4 sm:$0xff]   ;;  %v9644_v18 = vsub.s32 1, %v8307_v51 }
 0x1a3   :  { %v8298_v22 = vpop.f32.mrb[0].mxu1  ;;  %v7387_v21 = vld [vmem:[#allocation6 + $0xa10] ss:$8 sps:$4 sm:$0xff]  }
 0x1a4   :  { %v8300_v27 = vpop.f32.mrb[1].mxu1 }
 0x1a5   :  { %2196 = vmatpush1.bf16.msra.mxu0 %v7228_v12  ;;  %2427 = vmatpush1.bf16.msra.mxu1 %v7231_v39  ;;  %v580_v28 = vpop.f32.mrb[2].mxu1  ;;  %v7287_v12 = vld [vmem:[#allocation6 + $0x954] ss:$8 sps:$4 sm:$0xff]   ;;  %v7381_v39 = vld [vmem:[#allocation6 + $0xa00] ss:$8 sps:$4 sm:$0xff]  }
 0x1a6   :  { %2197 = vmatprep.subr.bf16.mxu0 %v7236_v14  ;;  %2428 = vmatprep.subr.bf16.mxu1 %v7239_v15  ;;  %v581_v29 = vpop.f32.mrb[3].mxu1  ;;  %v7389_v14 = vld [vmem:[#allocation6 + $0xa14] ss:$8 sps:$4 sm:$0xff]   ;;  %v9645_v15 = vsub.s32 0, %v8307_v51  ;;  %v7288_v28 = vld [vmem:[#allocation6 + $0x960] ss:$8 sps:$4 sm:$0xff]  }
 0x1a7   :  { %v7393_v29 = vld [vmem:[#allocation6 + $0xa20] ss:$8 sps:$4 sm:$0xff]  }
 0x1a8   :  { %v8681_v51 = vld [vmem:[#allocation10 + $0x74] ss:$8 sps:$4 sm:$0xff]  }
 0x1a9   :  { %2198 = vmatpush1.bf16.msra.mxu0 %v7234_v4  ;;  %2429 = vmatpush1.bf16.msra.mxu1 %v7237_v20  ;;  %v7285_v4 = vld [vmem:[#allocation6 + $0x950] ss:$8 sps:$4 sm:$0xff]   ;;  %v7290_v20 = vld [vmem:[#allocation6 + $0x964] ss:$8 sps:$4 sm:$0xff]  }
 0x1aa   :  { %2199 = vmatprep.subr.bf16.mxu0 %v7242_v23  ;;  %2430 = vmatprep.subr.bf16.mxu1 %v7245_v26  ;;  %v7395_v23 = vld [vmem:[#allocation6 + $0xa24] ss:$8 sps:$4 sm:$0xff]   ;;  %v134_v26 = vld [vmem:[#allocation8] sm:$0x3] }
 0x1ad   :  { %2200 = vmatpush1.bf16.msra.mxu0 %v7240_v30  ;;  %2431 = vmatpush1.bf16.msra.mxu1 %v7243_v2  ;;  %v7293_v30 = vld [vmem:[#allocation6 + $0x974] ss:$8 sps:$4 sm:$0xff]  }
 0x1ae   :  { %2201 = vmatprep.subr.bf16.mxu0 %v7248_v6  ;;  %2432 = vmatprep.subr.bf16.mxu1 %v7251_v19  ;;  %v7401_v2 = vld [vmem:[#allocation6 + $0xa34] ss:$8 sps:$4 sm:$0xff]   ;;  %v8313_v6 = vrot.slane %v134_v26, %v9644_v18  ;;  %v7291_v19 = vld [vmem:[#allocation6 + $0x970] ss:$8 sps:$4 sm:$0xff]  }
 0x1b1   :  { %2202 = vmatpush1.bf16.msra.mxu0 %v7246_v31  ;;  %2433 = vmatpush1.bf16.msra.mxu1 %v7249_v32  ;;  %v7296_v31 = vld [vmem:[#allocation6 + $0x984] ss:$8 sps:$4 sm:$0xff]   ;;  %v7399_v32 = vld [vmem:[#allocation6 + $0xa30] ss:$8 sps:$4 sm:$0xff]  }
 0x1b2   :  { %2434 = vmatprep.subr.bf16.mxu1 %v7254_v33  ;;  %2645 = vmatprep.subr.bf16.mxu0 %v7257_v34  ;;  %v8317_v33 = vrot.slane %v134_v26, %v9645_v15  ;;  %v8321_v34 = vadd.f32 %v8300_v27, %v8313_v6  ;;  %v7309_v26 = vld [vmem:[#allocation6 + $0xab0] ss:$8 sps:$4 sm:$0xff]   ;;  %v8667_v15 = vld [vmem:[#allocation10 + $0x320] ss:$8 sps:$4 sm:$0xff]  }
 0x1b3   :  { %9856 = vst [vmem:[#allocation49_spill] sm:$0xff] %v8667_v15 }
 0x1b4   :  { %2208 = vmatmul.mubr.bf16.vlgmr.msra.gmra.mrb[16].mxu0 %v8248_v56  ;;  %v7269_v56 = vld [vmem:[#allocation6 + $0x8f4] ss:$8 sps:$4 sm:$0xff]   ;;  %v577_v44 = vadd.f32 %v8298_v22, %v8317_v33  ;;  %v584_v50 = vmax.f32 %v8321_v34, 0.0  ;;  %v7440_v34 = vld [vmem:[#allocation10 + $0x200] ss:$8 sps:$4 sm:$0xff]  }
 0x1b5   :  { %2435 = vmatpush1.bf16.msra.mxu1 %v7252_v35  ;;  %2646 = vmatpush1.bf16.msra.mxu0 %v7255_v36  ;;  %v7407_v35 = vld [vmem:[#allocation6 + $0xa44] ss:$8 sps:$4 sm:$0xff]  }
 0x1b6   :  { %2436 = vmatprep.subr.bf16.mxu1 %v7260_v38  ;;  %2647 = vmatprep.subr.bf16.mxu0 %v7263_v40 }
 0x1b7   :  { %6313 = vmatprep.mubr.msk.bf16.mxu0 %vm318_vm0, %v8267_v37  ;;  %v7359_v37 = vld [vmem:[#allocation6 + $0x9c4] ss:$8 sps:$4 sm:$0xff]  }
 0x1b9   :  { %2437 = vmatpush1.bf16.msra.mxu1 %v7258_v25  ;;  %2648 = vmatpush1.bf16.msra.mxu0 %v7261_v41  ;;  %v7294_v41 = vld [vmem:[#allocation6 + $0x980] ss:$8 sps:$4 sm:$0xff]  }
 0x1ba   :  { %2649 = vmatprep.subr.bf16.mxu0 %v7266_v7  ;;  %2874 = vmatprep.subr.bf16.mxu1 %v7347_v46  ;;  %v7405_v7 = vld [vmem:[#allocation6 + $0xa40] ss:$8 sps:$4 sm:$0xff]  }
 0x1bc   :  { %2443 = vmatmul.mubr.bf16.vlgmr.msra.gmra.mrb[16].mxu1 %v2264_v42  ;;  %v7299_v42 = vld [vmem:[#allocation6 + $0x994] ss:$8 sps:$4 sm:$0xff]  }
 0x1bd   :  { %2650 = vmatpush1.bf16.msra.mxu0 %v7264_v48  ;;  %2875 = vmatpush1.bf16.msra.mxu1 %v7345_v49  ;;  %v7413_v48 = vld [vmem:[#allocation6 + $0xa54] ss:$8 sps:$4 sm:$0xff]   ;;  %v7297_v49 = vld [vmem:[#allocation6 + $0x990] ss:$8 sps:$4 sm:$0xff]  }
 0x1be   :  { %2651 = vmatprep.subr.bf16.mxu0 %v7269_v56  ;;  %2876 = vmatprep.subr.bf16.mxu1 %v7353_v52  ;;  %v7411_v52 = vld [vmem:[#allocation6 + $0xa50] ss:$8 sps:$4 sm:$0xff]  }
 0x1c1   :  { %2652 = vmatpush1.bf16.msra.mxu0 %v7267_v53  ;;  %2877 = vmatpush1.bf16.msra.mxu1 %v7351_v55  ;;  %v8332_v53 = vmax.f32 %v577_v44, 0.0  ;;  %v7335_v44 = vld [vmem:[#allocation6 + $0xb34] ss:$8 sps:$4 sm:$0xff]  }
 0x1c2   :  { %2653 = vmatprep.subr.bf16.mxu0 %v7272_v54  ;;  %2878 = vmatprep.subr.bf16.mxu1 %v7359_v37  ;;  %v7302_v54 = vld [vmem:[#allocation6 + $0xa84] ss:$8 sps:$4 sm:$0xff]  }
 0x1c3   :  { %v2691_v37 = vld [vmem:[%s9634_s0 + $0x28] sm:$0xff] }
 0x1c5   :  { %2654 = vmatpush1.bf16.msra.mxu0 %v7270_v57  ;;  %2879 = vmatpush1.bf16.msra.mxu1 %v7357_v58  ;;  %v7419_v57 = vld [vmem:[#allocation6 + $0xa64] ss:$8 sps:$4 sm:$0xff]  }
 0x1c6   :  { %2655 = vmatprep.subr.bf16.mxu0 %v7275_v43  ;;  %2880 = vmatprep.subr.bf16.mxu1 %v7365_v59 }
 0x1c9   :  { %2656 = vmatpush1.bf16.msra.mxu0 %v7273_v60  ;;  %2881 = vmatpush1.bf16.msra.mxu1 %v7363_v62 }
 0x1ca   :  { %2657 = vmatprep.subr.bf16.mxu0 %v7278_v61  ;;  %2882 = vmatprep.subr.bf16.mxu1 %v7371_v63  ;;  %v7300_v61 = vld [vmem:[#allocation6 + $0xa80] ss:$8 sps:$4 sm:$0xff]  }
 0x1cd   :  { %2658 = vmatpush1.bf16.msra.mxu0 %v7276_v0  ;;  %2883 = vmatpush1.bf16.msra.mxu1 %v7369_v1  ;;  %v8350_v1 = vpack.c.bf16 %v2691_v37, %v2691_v37  ;;  %v7336_v37 = vld [vmem:[#allocation6 + $0xb40] ss:$8 sps:$4 sm:$0xff]  }
 0x1ce   :  { %2659 = vmatprep.subr.bf16.mxu0 %v7281_v3  ;;  %2884 = vmatprep.subr.bf16.mxu1 %v7377_v5  ;;  %v7305_v3 = vld [vmem:[#allocation6 + $0xa94] ss:$8 sps:$4 sm:$0xff]   ;;  %v2690_v5 = vld [vmem:[%s9634_s0 + $0x20] sm:$0xff] }
 0x1d1   :  { %2660 = vmatpush1.bf16.msra.mxu0 %v7279_v8  ;;  %2885 = vmatpush1.bf16.msra.mxu1 %v7375_v10  ;;  %v7417_v8 = vld [vmem:[#allocation6 + $0xa60] ss:$8 sps:$4 sm:$0xff]   ;;  %v7425_v10 = vld [vmem:[#allocation6 + $0xa74] ss:$8 sps:$4 sm:$0xff]  }
 0x1d2   :  { %2661 = vmatprep.subr.bf16.mxu0 %v7284_v9  ;;  %2886 = vmatprep.subr.bf16.mxu1 %v7383_v45  ;;  %v7303_v45 = vld [vmem:[#allocation6 + $0xa90] ss:$8 sps:$4 sm:$0xff]  }
 0x1d5   :  { %2662 = vmatpush1.bf16.msra.mxu0 %v7282_v11  ;;  %2887 = vmatpush1.bf16.msra.mxu1 %v7381_v39  ;;  %v8363_v11 = vpack.c.bf16 %v2690_v5, %v2690_v5  ;;  %v7423_v39 = vld [vmem:[#allocation6 + $0xa70] ss:$8 sps:$4 sm:$0xff]  }
 0x1d6   :  { %2663 = vmatprep.subr.bf16.mxu0 %v7287_v12  ;;  %2888 = vmatprep.subr.bf16.mxu1 %v7389_v14  ;;  %v7308_v12 = vld [vmem:[#allocation6 + $0xaa4] ss:$8 sps:$4 sm:$0xff]   ;;  %v8370_v14 = vadd.f32 %v8296_v17, %v8313_v6 }
 0x1d7   :  { %v7314_v17 = vld [vmem:[#allocation6 + $0xac4] ss:$8 sps:$4 sm:$0xff]  }
 0x1d9   :  { %2664 = vmatpush1.bf16.msra.mxu0 %v7285_v4  ;;  %2889 = vmatpush1.bf16.msra.mxu1 %v7387_v21  ;;  %v7306_v4 = vld [vmem:[#allocation6 + $0xaa0] ss:$8 sps:$4 sm:$0xff]   ;;  %v7311_v21 = vld [vmem:[#allocation6 + $0xab4] ss:$8 sps:$4 sm:$0xff]  }
 0x1da   :  { %2665 = vmatprep.subr.bf16.mxu0 %v7290_v20  ;;  %2890 = vmatprep.subr.bf16.mxu1 %v7395_v23  ;;  %v364_v23 = vmax.f32 %v8370_v14, 0.0 }
 0x1dd   :  { %2666 = vmatpush1.bf16.msra.mxu0 %v7288_v28  ;;  %2891 = vmatpush1.bf16.msra.mxu1 %v7393_v29  ;;  %v6758_v28 = vpack.i.bf16 %v8332_v53, %v364_v23  ;;  %v7312_v29 = vld [vmem:[#allocation6 + $0xac0] ss:$8 sps:$4 sm:$0xff]  }
 0x1de   :  { %2667 = vmatprep.subr.bf16.mxu0 %v7293_v30  ;;  %2892 = vmatprep.subr.bf16.mxu1 %v7401_v2  ;;  %v7317_v30 = vld [vmem:[#allocation6 + $0xad4] ss:$8 sps:$4 sm:$0xff]   ;;  %v7315_v2 = vld [vmem:[#allocation6 + $0xad0] ss:$8 sps:$4 sm:$0xff]  }
 0x1df   :  { %v805_v36 = vpop.f32.mrb[4].mxu0 }
 0x1e0   :  { %v806_v38 = vadd.f32 %v805_v36, %v8317_v33  ;;  %v807_v40 = vpop.f32.mrb[5].mxu0  ;;  %v7326_v36 = vld [vmem:[#allocation6 + $0xb04] ss:$8 sps:$4 sm:$0xff]  }
 0x1e1   :  { %2668 = vmatpush1.bf16.msra.mxu0 %v7291_v19  ;;  %v809_v25 = vpop.f32.mrb[6].mxu0  ;;  %2893 = vmatpush1.bf16.msra.mxu1 %v7399_v32  ;;  %v8335_v22 = vadd.f32 %v807_v40, %v8313_v6  ;;  %v7320_v19 = vld [vmem:[#allocation6 + $0xae4] ss:$8 sps:$4 sm:$0xff]   ;;  %v7323_v32 = vld [vmem:[#allocation6 + $0xaf4] ss:$8 sps:$4 sm:$0xff]  }
 0x1e2   :  { %v8327_v46 = vmax.f32 %v806_v38, 0.0  ;;  %v810_v27 = vpop.f32.mrb[7].mxu0  ;;  %2669 = vmatprep.subr.bf16.mxu0 %v7296_v31  ;;  %2894 = vmatprep.subr.bf16.mxu1 %v7407_v35  ;;  %v7318_v31 = vld [vmem:[#allocation6 + $0xae0] ss:$8 sps:$4 sm:$0xff]   ;;  %v7321_v35 = vld [vmem:[#allocation6 + $0xaf0] ss:$8 sps:$4 sm:$0xff]  }
 0x1e3   :  { %v813_v62 = vmax.f32 %v8335_v22, 0.0  ;;  %v7324_v38 = vld [vmem:[#allocation6 + $0xb00] ss:$8 sps:$4 sm:$0xff]   ;;  %v7329_v40 = vld [vmem:[#allocation6 + $0xb14] ss:$8 sps:$4 sm:$0xff]  }
 0x1e4   :  { %v6738_v56 = vpack.i.bf16 %v8327_v46, %v584_v50  ;;  %v6748_v59 = vpack.i.bf16 %v8327_v46, %v8332_v53  ;;  %v7327_v25 = vld [vmem:[#allocation6 + $0xb10] ss:$8 sps:$4 sm:$0xff]   ;;  %v7441_v22 = vld [vmem:[#allocation6 + $0xb80] ss:$8 sps:$4 sm:$0xff]  }
 0x1e5   :  { %2670 = vmatpush1.bf16.msra.mxu0 %v7294_v41  ;;  %2895 = vmatpush1.bf16.msra.mxu1 %v7405_v7  ;;  %v7332_v41 = vld [vmem:[#allocation6 + $0xb24] ss:$8 sps:$4 sm:$0xff]   ;;  %v7330_v7 = vld [vmem:[#allocation6 + $0xb20] ss:$8 sps:$4 sm:$0xff]   ;;  %v7333_v27 = vld [vmem:[#allocation6 + $0xb30] ss:$8 sps:$4 sm:$0xff]  }
 0x1e6   :  { %6739 = vrot.lane.b32.xlu0 %v6738_v56, %s7983_s30  ;;  %2671 = vmatprep.subr.bf16.mxu0 %v7299_v42  ;;  %v8383_v42 = vadd.f32 %v8294_v16, %v8317_v33  ;;  %v7338_v56 = vld [vmem:[#allocation6 + $0xb44] ss:$8 sps:$4 sm:$0xff]  }
 0x1e7   :  { %v1040_v55 = vpop.f32.mrb[4].mxu1  ;;  %2896 = vmatprep.subr.bf16.mxu1 %v7413_v48 }
 0x1e8   :  { %v1041_v43 = vadd.f32 %v1040_v55, %v8317_v33  ;;  %v8342_v58 = vpop.f32.mrb[5].mxu1 }
 0x1e9   :  { %2672 = vmatpush1.bf16.msra.mxu0 %v7297_v49  ;;  %v1044_v60 = vpop.f32.mrb[6].mxu1  ;;  %2897 = vmatpush1.bf16.msra.mxu1 %v7411_v52  ;;  %v8387_v48 = vadd.f32 %v8342_v58, %v8313_v6 }
 0x1ea   :  { %v8347_v63 = vmax.f32 %v1041_v43, 0.0  ;;  %v1045_v0 = vpop.f32.mrb[7].mxu1  ;;  %6749 = vrot.lane.b32.xlu0 %v6748_v59, %s7983_s30  ;;  %3109 = vmatprep.subr.bf16.mxu0 %v7302_v54  ;;  %v7341_v60 = vld [vmem:[#allocation6 + $0xb54] ss:$8 sps:$4 sm:$0xff]  }
 0x1eb   :  { %2898 = vmatprep.subr.bf16.mxu1 %v7419_v57  ;;  %v363_v57 = vmax.f32 %v8383_v42, 0.0  ;;  %v1048_v43 = vmax.f32 %v8387_v48, 0.0  ;;  %v7339_v0 = vld [vmem:[#allocation6 + $0xb50] ss:$8 sps:$4 sm:$0xff]   ;;  %v8567_v48 = vld [vmem:[#allocation10 + $0x2c0] ss:$8 sps:$4 sm:$0xff]  }
 0x1ec   :  { %2678 = vmatmul.mubr.bf16.vlgmr.msra.gmra.mrb[20].mxu0 %v8256_v13  ;;  %v6743_v9 = vpack.i.bf16 %v8347_v63, %v813_v62  ;;  %v3156_v13 = vld [vmem:[%s9634_s0 + $0x30] sm:$0xff]  ;;  %9844 = vst [vmem:[#allocation37_spill] sm:$0xff] %v8567_v48  ;;  %s7985_s0 = smov 96  }
 0x1ed   :  { %3110 = vmatpush1.bf16.msra.mxu0 %v7300_v61  ;;  %6371 = vmatprep.mubr.msk.bf16.mxu0 %vm318_vm0, %v8282_v24  ;;  %v7431_v24 = vld [vmem:[#allocation6 + $0xb64] ss:$8 sps:$4 sm:$0xff]   ;;  %v3159_v20 = vpack.c.bf16 %v3156_v13, %v3156_v13 }
 0x1ee   :  { %6744 = vrot.lane.b32.xlu1 %v6743_v9, %s7983_s30  ;;  %2726 = vrot.lane.b32.xlu0 %v8350_v1, %s7984_s3 }
 0x1ef   :  { %3111 = vmatprep.subr.bf16.mxu0 %v7305_v3  ;;  %2899 = vmatpush1.bf16.msra.mxu1 %v7417_v8  ;;  %v7342_v3 = vld [vmem:[#allocation10 + $0x104] ss:$8 sps:$4 sm:$0xff]  }
 0x1f0   :  { %2900 = vmatprep.subr.bf16.mxu1 %v7425_v10  ;;  %v7344_v10 = vld [vmem:[#allocation10 + $0x100] ss:$8 sps:$4 sm:$0xff]  }
 0x1f1   :  { %3112 = vmatpush1.bf16.msra.mxu0 %v7303_v45 }
 0x1f2   :  { %2724 = vrot.lane.b32.xlu1 %v8363_v11, %s7984_s3  ;;  %3455 = vrot.lane.b32.xlu0 %v8347_v63, %s7983_s30 }
 0x1f3   :  { %3113 = vmatprep.subr.bf16.mxu0 %v7308_v12  ;;  %2901 = vmatpush1.bf16.msra.mxu1 %v7423_v39  ;;  %v7348_v39 = vld [vmem:[#allocation10 + $0x114] ss:$8 sps:$4 sm:$0xff]  }
 0x1f4   :  { %3343 = vmatprep.subr.bf16.mxu1 %v7431_v24 }
 0x1f5   :  { %3114 = vmatpush1.bf16.msra.mxu0 %v7306_v4  ;;  %v7350_v4 = vld [vmem:[#allocation10 + $0x110] ss:$8 sps:$4 sm:$0xff]  }
 0x1f6   :  { %3195 = vrot.lane.b32.xlu0 %v3159_v20, %s7981_s26  ;;  %3115 = vmatprep.subr.bf16.mxu0 %v7311_v21  ;;  %v7354_v21 = vld [vmem:[#allocation10 + $0x124] ss:$8 sps:$4 sm:$0xff]  }
 0x1f9   :  { %3116 = vmatpush1.bf16.msra.mxu0 %v7309_v26  ;;  %v7356_v26 = vld [vmem:[#allocation10 + $0x120] ss:$8 sps:$4 sm:$0xff]  }
 0x1fa   :  { %6759 = vrot.lane.b32.xlu0 %v6758_v28, %s7983_s30  ;;  %3117 = vmatprep.subr.bf16.mxu0 %v7314_v17  ;;  %v7362_v17 = vld [vmem:[#allocation10 + $0x130] ss:$8 sps:$4 sm:$0xff]   ;;  %v7366_v28 = vld [vmem:[#allocation10 + $0x144] ss:$8 sps:$4 sm:$0xff]  }
 0x1fd   :  { %3118 = vmatpush1.bf16.msra.mxu0 %v7312_v29  ;;  %v7368_v29 = vld [vmem:[#allocation10 + $0x140] ss:$8 sps:$4 sm:$0xff]  }
 0x1fe   :  { %3119 = vmatprep.subr.bf16.mxu0 %v7317_v30  ;;  %v7374_v30 = vld [vmem:[#allocation10 + $0x150] ss:$8 sps:$4 sm:$0xff]  }
 0x201   :  { %3120 = vmatpush1.bf16.msra.mxu0 %v7315_v2  ;;  %v7378_v2 = vld [vmem:[#allocation10 + $0x164] ss:$8 sps:$4 sm:$0xff]  }
 0x202   :  { %3121 = vmatprep.subr.bf16.mxu0 %v7320_v19  ;;  %v7380_v19 = vld [vmem:[#allocation10 + $0x160] ss:$8 sps:$4 sm:$0xff]  }
 0x205   :  { %3122 = vmatpush1.bf16.msra.mxu0 %v7318_v31  ;;  %v7384_v31 = vld [vmem:[#allocation10 + $0x174] ss:$8 sps:$4 sm:$0xff]  }
 0x206   :  { %3123 = vmatprep.subr.bf16.mxu0 %v7323_v32  ;;  %v7386_v32 = vld [vmem:[#allocation10 + $0x170] ss:$8 sps:$4 sm:$0xff]  }
 0x209   :  { %3124 = vmatpush1.bf16.msra.mxu0 %v7321_v35  ;;  %v7390_v35 = vld [vmem:[#allocation10 + $0x184] ss:$8 sps:$4 sm:$0xff]  }
 0x20a   :  { %3125 = vmatprep.subr.bf16.mxu0 %v7326_v36  ;;  %v7392_v36 = vld [vmem:[#allocation10 + $0x180] ss:$8 sps:$4 sm:$0xff]  }
 0x20d   :  { %3126 = vmatpush1.bf16.msra.mxu0 %v7324_v38  ;;  %v7396_v38 = vld [vmem:[#allocation10 + $0x194] ss:$8 sps:$4 sm:$0xff]  }
 0x20e   :  { %3127 = vmatprep.subr.bf16.mxu0 %v7329_v40  ;;  %v7398_v40 = vld [vmem:[#allocation10 + $0x190] ss:$8 sps:$4 sm:$0xff]  }
 0x211   :  { %3128 = vmatpush1.bf16.msra.mxu0 %v7327_v25  ;;  %v7402_v25 = vld [vmem:[#allocation10 + $0x1a4] ss:$8 sps:$4 sm:$0xff]  }
 0x212   :  { %3129 = vmatprep.subr.bf16.mxu0 %v7332_v41  ;;  %v7404_v41 = vld [vmem:[#allocation10 + $0x1a0] ss:$8 sps:$4 sm:$0xff]  }
 0x215   :  { %3130 = vmatpush1.bf16.msra.mxu0 %v7330_v7  ;;  %v7408_v7 = vld [vmem:[#allocation10 + $0x1b4] ss:$8 sps:$4 sm:$0xff]  }
 0x216   :  { %3131 = vmatprep.subr.bf16.mxu0 %v7335_v44 }
 0x217   :  { %v1269_v49 = vpop.f32.mrb[8].mxu0 }
 0x218   :  { %v1270_v52 = vadd.f32 %v1269_v49, %v8317_v33  ;;  %v1271_v54 = vpop.f32.mrb[9].mxu0 }
 0x219   :  { %v1273_v55 = vpop.f32.mrb[10].mxu0  ;;  %3132 = vmatpush1.bf16.msra.mxu0 %v7333_v27  ;;  %v8404_v12 = vadd.f32 %v1271_v54, %v8313_v6  ;;  %v7410_v27 = vld [vmem:[#allocation10 + $0x1b0] ss:$8 sps:$4 sm:$0xff]  }
 0x21a   :  { %v8392_v59 = vmax.f32 %v1270_v52, 0.0  ;;  %v1274_v16 = vpop.f32.mrb[11].mxu0  ;;  %3133 = vmatprep.subr.bf16.mxu0 %v7338_v56  ;;  %v7414_v56 = vld [vmem:[#allocation10 + $0x1c4] ss:$8 sps:$4 sm:$0xff]  }
 0x21b   :  { %v1277_v20 = vmax.f32 %v8404_v12, 0.0  ;;  %v7416_v16 = vld [vmem:[#allocation10 + $0x1c0] ss:$8 sps:$4 sm:$0xff]  }
 0x21c   :  { %v6753_v58 = vpack.i.bf16 %v8392_v59, %v1048_v43  ;;  %v6768_v61 = vpack.i.bf16 %v8392_v59, %v363_v57 }
 0x21d   :  { %3134 = vmatpush1.bf16.msra.mxu0 %v7336_v37 }
 0x21e   :  { %6754 = vrot.lane.b32.xlu1 %v6753_v58, %s7983_s30  ;;  %6769 = vrot.lane.b32.xlu0 %v6768_v61, %s7983_s30  ;;  %v7420_v61 = vld [vmem:[#allocation10 + $0x1d4] ss:$8 sps:$4 sm:$0xff]  }
 0x21f   :  { %v1504_v5 = vpop.f32.mrb[8].mxu1  ;;  %3135 = vmatprep.subr.bf16.mxu0 %v7341_v60 }
 0x220   :  { %v1505_v8 = vadd.f32 %v1504_v5, %v8317_v33  ;;  %v1506_v9 = vpop.f32.mrb[9].mxu1 }
 0x221   :  { %3136 = vmatpush1.bf16.msra.mxu0 %v7339_v0  ;;  %v1508_v45 = vpop.f32.mrb[10].mxu1  ;;  %v8421_v44 = vadd.f32 %v1506_v9, %v8313_v6 }
 0x222   :  { %v8406_v13 = vmax.f32 %v1505_v8, 0.0  ;;  %3193 = vrot.lane.b32.xlu1 %v8350_v1, %s7981_s26  ;;  %4582 = vmatprep.subr.bf16.mxu0 %v7342_v3  ;;  %v1509_v24 = vpop.f32.mrb[11].mxu1  ;;  %v7422_v3 = vld [vmem:[#allocation10 + $0x1d0] ss:$8 sps:$4 sm:$0xff]   ;;  %v7426_v8 = vld [vmem:[#allocation10 + $0x1e4] ss:$8 sps:$4 sm:$0xff]  }
 0x223   :  { %v9649_v52 = vmax.f32 %v8421_v44, 0.0  ;;  %v7428_v24 = vld [vmem:[#allocation10 + $0x1e0] ss:$8 sps:$4 sm:$0xff]  }
 0x224   :  { %3142 = vmatmul.mubr.bf16.vlgmr.msra.gmra.mrb[24].mxu0 %v8278_v47  ;;  %3495 = vrot.lane.b32.xlu0 %v8406_v13, %s7983_s30  ;;  %v6763_v1 = vpack.i.bf16 %v8406_v13, %v1277_v20  ;;  %v7360_v47 = vld [vmem:[#allocation10 + $0x134] ss:$8 sps:$4 sm:$0xff]  }
 0x225   :  { %4583 = vmatpush1.bf16.msra.mxu0 %v7344_v10 }
 0x226   :  { %3191 = vrot.lane.b32.xlu1 %v8363_v11, %s7981_s26  ;;  %4584 = vmatprep.subr.bf16.mxu0 %v7348_v39  ;;  %v7372_v11 = vld [vmem:[#allocation10 + $0x154] ss:$8 sps:$4 sm:$0xff]  }
 0x229   :  { %4585 = vmatpush1.bf16.msra.mxu0 %v7350_v4 }
 0x22a   :  { %6764 = vrot.lane.b32.xlu1 %v6763_v1, %s7983_s30  ;;  %4586 = vmatprep.subr.bf16.mxu0 %v7354_v21 }
 0x22d   :  { %4587 = vmatpush1.bf16.msra.mxu0 %v7356_v26  ;;  %v7432_v26 = vld [vmem:[#allocation10 + $0x1f4] ss:$8 sps:$4 sm:$0xff]  }
 0x22e   :  { %4588 = vmatprep.subr.bf16.mxu0 %v7360_v47 }
 0x231   :  { %4589 = vmatpush1.bf16.msra.mxu0 %v7362_v17 }
 0x232   :  { %4590 = vmatprep.subr.bf16.mxu0 %v7366_v28 }
 0x235   :  { %4591 = vmatpush1.bf16.msra.mxu0 %v7368_v29 }
 0x236   :  { %4592 = vmatprep.subr.bf16.mxu0 %v7372_v11 }
 0x239   :  { %4593 = vmatpush1.bf16.msra.mxu0 %v7374_v30 }
 0x23a   :  { %4594 = vmatprep.subr.bf16.mxu0 %v7378_v2  ;;  %v7434_v2 = vld [vmem:[#allocation10 + $0x1f0] ss:$8 sps:$4 sm:$0xff]  }
 0x23d   :  { %4595 = vmatpush1.bf16.msra.mxu0 %v7380_v19  ;;  %v7438_v19 = vld [vmem:[#allocation10 + $0x204] ss:$8 sps:$4 sm:$0xff]  }
 0x23e   :  { %4596 = vmatprep.subr.bf16.mxu0 %v7384_v31 }
 0x241   :  { %4597 = vmatpush1.bf16.msra.mxu0 %v7386_v32 }
 0x242   :  { %4598 = vmatprep.subr.bf16.mxu0 %v7390_v35 }
 0x245   :  { %4599 = vmatpush1.bf16.msra.mxu0 %v7392_v36 }
 0x246   :  { %4600 = vmatprep.subr.bf16.mxu0 %v7396_v38 }
 0x249   :  { %4601 = vmatpush1.bf16.msra.mxu0 %v7398_v40 }
 0x24a   :  { %4602 = vmatprep.subr.bf16.mxu0 %v7402_v25 }
 0x24d   :  { %4603 = vmatpush1.bf16.msra.mxu0 %v7404_v41 }
 0x24e   :  { %4604 = vmatprep.subr.bf16.mxu0 %v7408_v7 }
 0x24f   :  { %v1739_v49 = vpop.f32.mrb[12].mxu0 }
 0x250   :  { %v1740_v54 = vadd.f32 %v1739_v49, %v8317_v33  ;;  %v1741_v55 = vpop.f32.mrb[13].mxu0 }
 0x251   :  { %v1743_v37 = vpop.f32.mrb[14].mxu0  ;;  %4605 = vmatpush1.bf16.msra.mxu0 %v7410_v27  ;;  %v8433_v5 = vadd.f32 %v1741_v55, %v8313_v6  ;;  %v7429_v27 = vld [vmem:[#allocation6 + $0xb60] ss:$8 sps:$4 sm:$0xff]   ;;  %v7437_v55 = vld [vmem:[#allocation6 + $0xb74] ss:$8 sps:$4 sm:$0xff]  }
 0x252   :  { %v8425_v60 = vmax.f32 %v1740_v54, 0.0  ;;  %v1744_v58 = vpop.f32.mrb[15].mxu0  ;;  %4606 = vmatprep.subr.bf16.mxu0 %v7414_v56 }
 0x253   :  { %v9648_v21 = vmax.f32 %v8433_v5, 0.0 }
 0x254   :  { %v6773_v0 = vpack.i.bf16 %v8425_v60, %v9649_v52  ;;  %3515 = vrot.lane.b32.xlu0 %v8425_v60, %s7983_s30  ;;  %v8679_v52 = vld [vmem:[#allocation10 + $0x330] ss:$8 sps:$4 sm:$0xff]  }
 0x255   :  { %4607 = vmatpush1.bf16.msra.mxu0 %v7416_v16  ;;  %9858 = vst [vmem:[#allocation51_spill] sm:$0xff] %v8679_v52 }
 0x256   :  { %6774 = vrot.lane.b32.xlu1 %v6773_v0, %s7983_s30  ;;  %4608 = vmatprep.subr.bf16.mxu0 %v7420_v61 }
 0x257   :  { %v1974_v9 = vpop.f32.mrb[12].mxu1 }
 0x258   :  { %v1975_v10 = vadd.f32 %v1974_v9, %v8317_v33  ;;  %v6740_v45 = vpop.permute.xlu0 %6739  ;;  %v8437_v39 = vpop.f32.mrb[13].mxu1  ;;  %v7449_v9 = vld [vmem:[#allocation6 + $0xb94] ss:$8 sps:$4 sm:$0xff]  }
 0x259   :  { %4609 = vmatpush1.bf16.msra.mxu0 %v7422_v3  ;;  %v1978_v4 = vpop.f32.mrb[14].mxu1  ;;  %v6742_v17 = vunpack.i.h.bf16 %v6740_v45  ;;  %v6741_v28 = vunpack.i.l.bf16 %v6740_v45  ;;  %v7447_v45 = vld [vmem:[#allocation6 + $0xb90] ss:$8 sps:$4 sm:$0xff]  }
 0x25a   :  { %v8440_v1 = vmax.f32 %v1975_v10, 0.0  ;;  %4610 = vmatprep.subr.bf16.mxu0 %v7426_v8  ;;  %v1979_v47 = vpop.f32.mrb[15].mxu1  ;;  %v7444_v8 = vld [vmem:[#allocation10 + $0x214] ss:$8 sps:$4 sm:$0xff]   ;;  %v7450_v10 = vld [vmem:[#allocation10 + $0x224] ss:$8 sps:$4 sm:$0xff]  }
 0x25b   :  { %v3422_v31 = vsel %vm3400_vm11, %v6741_v28, %v6742_v17  ;;  %v7455_v4 = vld [vmem:[#allocation6 + $0xba4] ss:$8 sps:$4 sm:$0xff]   ;;  %v7453_v47 = vld [vmem:[#allocation6 + $0xba0] ss:$8 sps:$4 sm:$0xff]   ;;  %v7458_v17 = vld [vmem:[#allocation10 + $0x230] ss:$8 sps:$4 sm:$0xff]  }
 0x25c   :  { %v6750_v29 = vpop.permute.xlu0 %6749  ;;  %v6778_v11 = vpack.i.bf16 %v8440_v1, %v9648_v21  ;;  %3535 = vrot.lane.b32.xlu0 %v8440_v1, %s7983_s30  ;;  %v8461_v37 = vmax.f32 %v584_v50, %v3422_v31  ;;  %v7443_v50 = vld [vmem:[#allocation6 + $0xb84] ss:$8 sps:$4 sm:$0xff]   ;;  %v7465_v31 = vld [vmem:[#allocation6 + $0xbc0] ss:$8 sps:$4 sm:$0xff]  }
 0x25d   :  { %v6751_v30 = vunpack.i.l.bf16 %v6750_v29  ;;  %4611 = vmatpush1.bf16.msra.mxu0 %v7428_v24  ;;  %v6752_v36 = vunpack.i.h.bf16 %v6750_v29  ;;  %v7452_v24 = vld [vmem:[#allocation10 + $0x220] ss:$8 sps:$4 sm:$0xff]   ;;  %v7462_v29 = vld [vmem:[#allocation10 + $0x244] ss:$8 sps:$4 sm:$0xff]  }
 0x25e   :  { %6779 = vrot.lane.b32.xlu1 %v6778_v11, %s7983_s30  ;;  %4612 = vmatprep.subr.bf16.mxu0 %v7432_v26  ;;  %v7456_v26 = vld [vmem:[#allocation10 + $0x234] ss:$8 sps:$4 sm:$0xff]   ;;  %v8675_v21 = vld [vmem:[#allocation10 + $0x60] ss:$8 sps:$4 sm:$0xff]  }
 0x25f   :  { %v3421_v38 = vsel %vm3400_vm11, %v6751_v30, %v6741_v28  ;;  %v7461_v28 = vld [vmem:[#allocation6 + $0xbb4] ss:$8 sps:$4 sm:$0xff]   ;;  %v7459_v11 = vld [vmem:[#allocation6 + $0xbb0] ss:$8 sps:$4 sm:$0xff]   ;;  %v8471_v30 = vld [vmem:[#allocation10 + $0x240] ss:$8 sps:$4 sm:$0xff]  }
 0x260   :  { %v6745_v32 = vpop.permute.xlu1 %6744  ;;  %v2727_v35 = vpop.permute.xlu0 %2726  ;;  %v8454_v56 = vmax.f32 %v8332_v53, %v3421_v38 }
 0x261   :  { %v6747_v40 = vunpack.i.h.bf16 %v6745_v32  ;;  %v6746_v25 = vunpack.i.l.bf16 %v6745_v32  ;;  %6342 = vmatprep.mubr.msk.bf16.mxu1 %vm318_vm0, %v2727_v35  ;;  %4613 = vmatpush1.bf16.msra.mxu0 %v7434_v2  ;;  %v7467_v2 = vld [vmem:[#allocation6 + $0xbc4] ss:$8 sps:$4 sm:$0xff]   ;;  %v8476_v32 = vld [vmem:[#allocation10 + $0x250] ss:$8 sps:$4 sm:$0xff]  }
 0x262   :  { %4623 = vmatprep.subr.bf16.mxu0 %v7438_v19  ;;  %v8473_v19 = vld [vmem:[#allocation10 + $0x254] ss:$8 sps:$4 sm:$0xff]  }
 0x263   :  { %v3441_v41 = vsel %vm3400_vm11, %v6752_v36, %v6746_v25  ;;  %v3442_v7 = vsel %vm3400_vm11, %v6746_v25, %v6747_v40  ;;  %v7474_v36 = vld [vmem:[#allocation10 + $0x264] ss:$8 sps:$4 sm:$0xff]   ;;  %v8482_v25 = vld [vmem:[#allocation10 + $0x260] ss:$8 sps:$4 sm:$0xff]  }
 0x264   :  { %v8457_v49 = vmax.f32 %v8327_v46, %v3441_v41  ;;  %v2725_v54 = vpop.permute.xlu1 %2724  ;;  %v8465_v16 = vmax.f32 %v813_v62, %v3442_v7  ;;  %v7435_v46 = vld [vmem:[#allocation6 + $0xb70] ss:$8 sps:$4 sm:$0xff]   ;;  %v8479_v38 = vpop.permute.xlu0 %3455  ;;  %v7479_v41 = vld [vmem:[#allocation6 + $0xbe4] ss:$8 sps:$4 sm:$0xff]  }
 0x265   :  { %v2729_v58 = vsel %vm2728_vm12, %v2725_v54, %v2727_v35  ;;  %v7446_v62 = vld [vmem:[#allocation10 + $0x210] ss:$8 sps:$4 sm:$0xff]   ;;  %v8484_v7 = vld [vmem:[#allocation10 + $0x274] ss:$8 sps:$4 sm:$0xff]  }
 0x266   :  { %2907 = vmatmul.mubr.bf16.vlgmr.msra.gmra.mrb[20].mxu1 %v2729_v58  ;;  %v3662_v61 = vmax.f32 %v8461_v37, %v8465_v16  ;;  %v3661_v53 = vmax.f32 %v8454_v56, %v8457_v49  ;;  %v7473_v35 = vld [vmem:[#allocation6 + $0xbd4] ss:$8 sps:$4 sm:$0xff]   ;;  %v7471_v40 = vld [vmem:[#allocation6 + $0xbd0] ss:$8 sps:$4 sm:$0xff]   ;;  %9832 = vst [vmem:[#allocation25_spill] sm:$0xff] %v8484_v7 }
 0x267   :  { %3344 = vmatpush1.bf16.msra.mxu1 %v7429_v27  ;;  %v7477_v27 = vld [vmem:[#allocation6 + $0xbe0] ss:$8 sps:$4 sm:$0xff]   ;;  %v8493_v58 = vld [vmem:[#allocation10 + $0x270] ss:$8 sps:$4 sm:$0xff]  }
 0x268   :  { %3345 = vmatprep.subr.bf16.mxu1 %v7437_v55  ;;  %v3896_v0 = vpack.c.bf16 %v3662_v61, %v3662_v61  ;;  %v3895_v3 = vpack.c.bf16 %v3661_v53, %v3661_v53  ;;  %v8486_v54 = vpop.permute.xlu0 %3195  ;;  %v8491_v55 = vadd.f32 %v8437_v39, %v8313_v6  ;;  %9833 = vst [vmem:[#allocation26_spill] sm:$0xff] %v8493_v58  ;;  %v7485_v61 = vld [vmem:[#allocation6 + $0xbf4] ss:$8 sps:$4 sm:$0xff]   ;;  %v8496_v53 = vld [vmem:[#allocation10 + $0x284] ss:$8 sps:$4 sm:$0xff]  }
 0x269   :  { %9834 = vst [vmem:[#allocation27_spill] sm:$0xff] %v8496_v53  ;;  %v8501_v39 = vld [vmem:[#allocation10 + $0x280] ss:$8 sps:$4 sm:$0xff]  }
 0x26a   :  { %4614 = vmatprep.mubr.bf16.mxu0 %v3896_v0  ;;  %v7483_v0 = vld [vmem:[#allocation6 + $0xbf0] ss:$8 sps:$4 sm:$0xff]   ;;  %9835 = vst [vmem:[#allocation28_spill] sm:$0xff] %v8501_v39 }
 0x26b   :  { %3346 = vmatpush1.bf16.msra.mxu1 %v7435_v46  ;;  %4615 = vmatmul.mubr.bf16.vlgmr.msra.gmra.mrb[28].mxu0 %v3895_v3  ;;  %v9647_v3 = vmax.f32 %v8491_v55, 0.0 }
 0x26c   :  { %4624 = vmatpush1.bf16.msra.mxu0 %v7440_v34  ;;  %3347 = vmatprep.subr.bf16.mxu1 %v7443_v50 }
 0x26d   :  { %4625 = vmatprep.subr.bf16.mxu0 %v7444_v8 }
 0x26f   :  { %3348 = vmatpush1.bf16.msra.mxu1 %v7441_v22  ;;  %v7491_v22 = vld [vmem:[#allocation6 + $0xc04] ss:$8 sps:$4 sm:$0xff]  }
 0x270   :  { %4626 = vmatpush1.bf16.msra.mxu0 %v7446_v62  ;;  %3349 = vmatprep.subr.bf16.mxu1 %v7449_v9  ;;  %v8504_v62 = vld [vmem:[#allocation10 + $0x294] ss:$8 sps:$4 sm:$0xff]   ;;  %v6760_v9 = vpop.permute.xlu0 %6759 }
 0x271   :  { %4627 = vmatprep.subr.bf16.mxu0 %v7450_v10  ;;  %9836 = vst [vmem:[#allocation29_spill] sm:$0xff] %v8504_v62 }
 0x273   :  { %3350 = vmatpush1.bf16.msra.mxu1 %v7447_v45 }
 0x274   :  { %4628 = vmatpush1.bf16.msra.mxu0 %v7452_v24  ;;  %3351 = vmatprep.subr.bf16.mxu1 %v7455_v4  ;;  %v7489_v24 = vld [vmem:[#allocation6 + $0xc00] ss:$8 sps:$4 sm:$0xff]  }
 0x275   :  { %4629 = vmatprep.subr.bf16.mxu0 %v7456_v26  ;;  %v8514_v26 = vld [vmem:[#allocation10 + $0x290] ss:$8 sps:$4 sm:$0xff]  }
 0x276   :  { %9837 = vst [vmem:[#allocation30_spill] sm:$0xff] %v8514_v26 }
 0x277   :  { %3352 = vmatpush1.bf16.msra.mxu1 %v7453_v47  ;;  %v7497_v47 = vld [vmem:[#allocation6 + $0xc14] ss:$8 sps:$4 sm:$0xff]  }
 0x278   :  { %4630 = vmatpush1.bf16.msra.mxu0 %v7458_v17  ;;  %3353 = vmatprep.subr.bf16.mxu1 %v7461_v28  ;;  %v6762_v17 = vunpack.i.h.bf16 %v6760_v9  ;;  %v6761_v28 = vunpack.i.l.bf16 %v6760_v9 }
 0x279   :  { %4631 = vmatprep.subr.bf16.mxu0 %v7462_v29  ;;  %v8517_v29 = vld [vmem:[#allocation10 + $0x2a4] ss:$8 sps:$4 sm:$0xff]  }
 0x27a   :  { %9838 = vst [vmem:[#allocation31_spill] sm:$0xff] %v8517_v29 }
 0x27b   :  { %3354 = vmatpush1.bf16.msra.mxu1 %v7459_v11 }
 0x27c   :  { %4632 = vmatpush1.bf16.msra.mxu0 %v8471_v30  ;;  %3355 = vmatprep.subr.bf16.mxu1 %v7467_v2 }
 0x27d   :  { %4633 = vmatprep.subr.bf16.mxu0 %v8473_v19 }
 0x27f   :  { %3356 = vmatpush1.bf16.msra.mxu1 %v7465_v31  ;;  %v7495_v31 = vld [vmem:[#allocation6 + $0xc10] ss:$8 sps:$4 sm:$0xff]  }
 0x280   :  { %4634 = vmatpush1.bf16.msra.mxu0 %v8476_v32  ;;  %3357 = vmatprep.subr.bf16.mxu1 %v7473_v35 }
 0x281   :  { %4635 = vmatprep.subr.bf16.mxu0 %v7474_v36 }
 0x283   :  { %3358 = vmatpush1.bf16.msra.mxu1 %v7471_v40 }
 0x284   :  { %4636 = vmatpush1.bf16.msra.mxu0 %v8482_v25  ;;  %3359 = vmatprep.subr.bf16.mxu1 %v7479_v41  ;;  %v8527_v41 = vld [vmem:[#allocation10 + $0x2a0] ss:$8 sps:$4 sm:$0xff]  }
 0x285   :  { %4637 = vmatprep.subr.bf16.mxu0 %v8484_v7  ;;  %9840 = vst [vmem:[#allocation33_spill] sm:$0xff] %v8527_v41  ;;  %v8810_v7 = vld [vmem:[#allocation10 + $0x3c4] ss:$8 sps:$4 sm:$0xff]  }
 0x286   :  { %9878 = vst [vmem:[#allocation70_spill] sm:$0xff] %v8810_v7 }
 0x287   :  { %v2209_v46 = vpop.f32.mrb[16].mxu0  ;;  %3360 = vmatpush1.bf16.msra.mxu1 %v7477_v27  ;;  %v7503_v27 = vld [vmem:[#allocation6 + $0xc24] ss:$8 sps:$4 sm:$0xff]  }
 0x288   :  { %v2210_v34 = vadd.f32 %v2209_v46, %v8317_v33  ;;  %v2211_v50 = vpop.f32.mrb[17].mxu0  ;;  %4638 = vmatpush1.bf16.msra.mxu0 %v8493_v58  ;;  %3361 = vmatprep.subr.bf16.mxu1 %v7485_v61  ;;  %v3402_v61 = vsel %vm3400_vm11, %v6761_v28, %v6762_v17  ;;  %v8805_v58 = vld [vmem:[#allocation10 + $0x3b0] ss:$8 sps:$4 sm:$0xff]  }
 0x289   :  { %v2213_v8 = vpop.f32.mrb[18].mxu0  ;;  %4639 = vmatprep.subr.bf16.mxu0 %v8496_v53  ;;  %v8520_v11 = vadd.f32 %v2211_v50, %v8313_v6  ;;  %v8532_v50 = vld [vmem:[#allocation10 + $0x2b4] ss:$8 sps:$4 sm:$0xff]   ;;  %9877 = vst [vmem:[#allocation69_spill] sm:$0xff] %v8805_v58 }
 0x28a   :  { %v8506_v10 = vmax.f32 %v2210_v34, 0.0  ;;  %v2214_v45 = vpop.f32.mrb[19].mxu0  ;;  %9841 = vst [vmem:[#allocation34_spill] sm:$0xff] %v8532_v50 }
 0x28b   :  { %3362 = vmatpush1.bf16.msra.mxu1 %v7483_v0  ;;  %9839 = vst [vmem:[#allocation32_spill] sm:$0xff] %v8520_v11 }
 0x28c   :  { %4640 = vmatpush1.bf16.msra.mxu0 %v8501_v39  ;;  %3555 = vrot.lane.b32.xlu0 %v8506_v10, %s7983_s30  ;;  %v6783_v4 = vpack.i.bf16 %v8506_v10, %v9647_v3  ;;  %v8672_v3 = vld [vmem:[#allocation10 + $0x334] ss:$8 sps:$4 sm:$0xff]  }
 0x28d   :  { %3363 = vmatprep.subr.bf16.mxu1 %v7491_v22  ;;  %4641 = vmatprep.subr.bf16.mxu0 %v8504_v62  ;;  %v9646_v22 = vmax.f32 %v8520_v11, 0.0  ;;  %9857 = vst [vmem:[#allocation50_spill] sm:$0xff] %v8672_v3  ;;  %v8691_v11 = vld [vmem:[#allocation10 + $0x340] ss:$8 sps:$4 sm:$0xff]  }
 0x28e   :  { %6784 = vrot.lane.b32.xlu1 %v6783_v4, %s7983_s30  ;;  %9860 = vst [vmem:[#allocation53_spill] sm:$0xff] %v8691_v11 }
 0x28f   :  { %v2444_v2 = vpop.f32.mrb[16].mxu1  ;;  %3364 = vmatpush1.bf16.msra.mxu1 %v7489_v24 }
 0x290   :  { %v2445_v35 = vadd.f32 %v2444_v2, %v8317_v33  ;;  %v6755_v36 = vpop.permute.xlu1 %6754  ;;  %4642 = vmatpush1.bf16.msra.mxu0 %v8514_v26  ;;  %v8525_v40 = vpop.permute.xlu0 %6769  ;;  %3365 = vmatprep.subr.bf16.mxu1 %v7497_v47  ;;  %v7501_v47 = vld [vmem:[#allocation6 + $0xc20] ss:$8 sps:$4 sm:$0xff]   ;;  %v8780_v26 = vld [vmem:[#allocation10 + $0xd0] ss:$8 sps:$4 sm:$0xff]  }
 0x291   :  { %v6757_v46 = vunpack.i.h.bf16 %v6755_v36  ;;  %v6756_v0 = vunpack.i.l.bf16 %v6755_v36  ;;  %v6771_v34 = vunpack.i.l.bf16 %v8525_v40  ;;  %4643 = vmatprep.subr.bf16.mxu0 %v8517_v29  ;;  %v8534_v8 = vpop.f32.mrb[17].mxu1  ;;  %v8771_v29 = vld [vmem:[#allocation10 + $0xd4] ss:$8 sps:$4 sm:$0xff]  }
 0x292   :  { %v8537_v9 = vmax.f32 %v2445_v35, 0.0  ;;  %v2448_v45 = vpop.f32.mrb[18].mxu1  ;;  %v8547_v35 = vld [vmem:[#allocation10 + $0x2b0] ss:$8 sps:$4 sm:$0xff]  }
 0x293   :  { %v3462_v24 = vsel %vm3400_vm11, %v6756_v0, %v6757_v46  ;;  %v3401_v4 = vsel %vm3400_vm11, %v6771_v34, %v6761_v28  ;;  %3366 = vmatpush1.bf16.msra.mxu1 %v7495_v31  ;;  %v2449_v17 = vpop.f32.mrb[19].mxu1  ;;  %9842 = vst [vmem:[#allocation35_spill] sm:$0xff] %v8547_v35  ;;  %v7509_v45 = vld [vmem:[#allocation6 + $0xc34] ss:$8 sps:$4 sm:$0xff]   ;;  %v3406_v28 = vmax.f32 %v364_v23, %v3402_v61  ;;  %v7507_v23 = vld [vmem:[#allocation6 + $0xc30] ss:$8 sps:$4 sm:$0xff]  }
 0x294   :  { %v3405_v2 = vmax.f32 %v363_v57, %v3401_v4  ;;  %v3194_v36 = vpop.permute.xlu1 %3193  ;;  %4644 = vmatpush1.bf16.msra.mxu0 %v8527_v41  ;;  %v6788_v18 = vpack.i.bf16 %v8537_v9, %v9646_v22  ;;  %3367 = vmatprep.subr.bf16.mxu1 %v7503_v27  ;;  %v3466_v42 = vmax.f32 %v1048_v43, %v3462_v24  ;;  %v8556_v57 = vld [vmem:[#allocation10 + $0x2c4] ss:$8 sps:$4 sm:$0xff]   ;;  %v8585_v4 = vld [vmem:[#allocation10 + $0x14] ss:$8 sps:$4 sm:$0xff]   ;;  %v6772_v17 = vunpack.i.h.bf16 %v8525_v40  ;;  %v8769_v41 = vld [vmem:[#allocation10 + $0x390] ss:$8 sps:$4 sm:$0xff]  }
 0x295   :  { %v3198_v31 = vsel %vm2962_vm9, %v3194_v36, %v8486_v54  ;;  %4645 = vmatprep.subr.bf16.mxu0 %v8532_v50  ;;  %9843 = vst [vmem:[#allocation36_spill] sm:$0xff] %v8556_v57  ;;  %3575 = vrot.lane.b32.xlu0 %v8537_v9, %s7983_s30  ;;  %v8569_v43 = vld [vmem:[#allocation10 + $0x4] ss:$8 sps:$4 sm:$0xff]   ;;  %v3654_v61 = vmax.f32 %v3406_v28, %v8461_v37  ;;  %v8583_v37 = vld [vmem:[#allocation10 + $0x2d0] ss:$8 sps:$4 sm:$0xff]   ;;  %9873 = vst [vmem:[#allocation65_spill] sm:$0xff] %v8769_v41 }
 0x296   :  { %6789 = vrot.lane.b32.xlu1 %v6788_v18, %s7983_s30  ;;  %6400 = vmatprep.mubr.msk.bf16.mxu1 %vm318_vm0, %v3198_v31  ;;  %v8563_v14 = vmax.f32 %v3405_v2, %v8454_v56  ;;  %v3670_v54 = vmax.f32 %v8465_v16, %v3466_v42  ;;  %v8575_v56 = vld [vmem:[#allocation10 + $0x2d4] ss:$8 sps:$4 sm:$0xff]   ;;  %v8579_v16 = vld [vmem:[#allocation10] ss:$8 sps:$4 sm:$0xff]   ;;  %9846 = vst [vmem:[#allocation39_spill] sm:$0xff] %v8583_v37 }
 0x297   :  { %3368 = vmatpush1.bf16.msra.mxu1 %v7501_v47  ;;  %9845 = vst [vmem:[#allocation38_spill] sm:$0xff] %v8575_v56  ;;  %v3894_v24 = vpack.c.bf16 %v3654_v61, %v3654_v61  ;;  %v3461_v47 = vsel %vm3400_vm11, %v8479_v38, %v6756_v0  ;;  %v8604_v0 = vld [vmem:[#allocation10 + $0x2e0] ss:$8 sps:$4 sm:$0xff]   ;;  %v8669_v22 = vld [vmem:[#allocation10 + $0x64] ss:$8 sps:$4 sm:$0xff]  }
 0x298   :  { %v3192_v27 = vpop.permute.xlu1 %3191  ;;  %4646 = vmatpush1.bf16.msra.mxu0 %v8547_v35  ;;  %3369 = vmatprep.subr.bf16.mxu1 %v7509_v45  ;;  %v8572_v18 = vpack.c.bf16 %v3670_v54, %v3670_v54  ;;  %v8591_v45 = vld [vmem:[#allocation10 + $0x2e4] ss:$8 sps:$4 sm:$0xff]   ;;  %v3465_v38 = vmax.f32 %v8347_v63, %v3461_v47  ;;  %9848 = vst [vmem:[#allocation41_spill] sm:$0xff] %v8604_v0  ;;  %v8633_v47 = vld [vmem:[#allocation10 + $0x30] ss:$8 sps:$4 sm:$0xff]   ;;  %v3496_v35 = vpop.permute.xlu0 %3495 }
 0x299   :  { %4647 = vmatprep.subr.bf16.mxu0 %v8556_v57  ;;  %v3197_v46 = vsel %vm2962_vm9, %v3192_v27, %v3194_v36  ;;  %9847 = vst [vmem:[#allocation40_spill] sm:$0xff] %v8591_v45  ;;  %v8606_v54 = vld [vmem:[#allocation10 + $0x24] ss:$8 sps:$4 sm:$0xff]   ;;  %v8609_v27 = vld [vmem:[#allocation10 + $0x2f4] ss:$8 sps:$4 sm:$0xff]  }
 0x29a   :  { %4655 = vmatprep.mubr.bf16.mxu0 %v8572_v18  ;;  %9849 = vst [vmem:[#allocation42_spill] sm:$0xff] %v8609_v27  ;;  %v3669_v12 = vmax.f32 %v8457_v49, %v3465_v38  ;;  %v8644_v49 = vld [vmem:[#allocation10 + $0x314] ss:$8 sps:$4 sm:$0xff]   ;;  %v8764_v50 = vld [vmem:[#allocation10 + $0xc0] ss:$8 sps:$4 sm:$0xff]  }
 0x29b   :  { %3370 = vmatpush1.bf16.msra.mxu1 %v7507_v23  ;;  %v8596_v23 = vld [vmem:[#allocation10 + $0x10] ss:$8 sps:$4 sm:$0xff]   ;;  %9853 = vst [vmem:[#allocation46_spill] sm:$0xff] %v8644_v49 }
 0x29c   :  { %v6765_v34 = vpop.permute.xlu1 %6764  ;;  %4648 = vmatpush1.bf16.msra.mxu0 %v8567_v48  ;;  %4541 = vmatprep.subr.bf16.mxu1 %v8569_v43 }
 0x29d   :  { %v6767_v2 = vunpack.i.h.bf16 %v6765_v34  ;;  %v6766_v36 = vunpack.i.l.bf16 %v6765_v34  ;;  %4649 = vmatprep.subr.bf16.mxu0 %v8575_v56  ;;  %v8625_v34 = vld [vmem:[#allocation10 + $0x34] ss:$8 sps:$4 sm:$0xff]  }
 0x29e   :  { %3376 = vmatmul.mubr.bf16.vlgmr.msra.gmra.mrb[24].mxu1 %v3197_v46  ;;  %v8623_v46 = vld [vmem:[#allocation10 + $0x2f0] ss:$8 sps:$4 sm:$0xff]   ;;  %v8728_v56 = vld [vmem:[#allocation10 + $0x374] ss:$8 sps:$4 sm:$0xff]  }
 0x29f   :  { %v3481_v28 = vsel %vm3400_vm11, %v6772_v17, %v6766_v36  ;;  %v3482_v31 = vsel %vm3400_vm11, %v6766_v36, %v6767_v2  ;;  %4542 = vmatpush1.bf16.msra.mxu1 %v8579_v16  ;;  %4573 = vmatprep.mubr.bf16.mxu1 %v3894_v24  ;;  %9850 = vst [vmem:[#allocation43_spill] sm:$0xff] %v8623_v46  ;;  %v8637_v17 = vld [vmem:[#allocation10 + $0x300] ss:$8 sps:$4 sm:$0xff]   ;;  %v8642_v36 = vld [vmem:[#allocation10 + $0x44] ss:$8 sps:$4 sm:$0xff]   ;;  %9866 = vst [vmem:[#allocation59_spill] sm:$0xff] %v8728_v56 }
 0x2a0   :  { %v8600_v40 = vmax.f32 %v8392_v59, %v3481_v28  ;;  %4650 = vmatpush1.bf16.msra.mxu0 %v8583_v37  ;;  %4543 = vmatprep.subr.bf16.mxu1 %v8585_v4  ;;  %v8613_v61 = vmax.f32 %v1277_v20, %v3482_v31  ;;  %v8619_v59 = vld [vmem:[#allocation10 + $0x20] ss:$8 sps:$4 sm:$0xff]   ;;  %v8629_v20 = vld [vmem:[#allocation10 + $0x304] ss:$8 sps:$4 sm:$0xff]   ;;  %9852 = vst [vmem:[#allocation45_spill] sm:$0xff] %v8637_v17 }
 0x2a1   :  { %4651 = vmatprep.subr.bf16.mxu0 %v8591_v45  ;;  %9851 = vst [vmem:[#allocation44_spill] sm:$0xff] %v8629_v20  ;;  %v8639_v2 = vpack.c.bf16 %v3669_v12, %v3669_v12  ;;  %v8654_v31 = vld [vmem:[#allocation10 + $0x310] ss:$8 sps:$4 sm:$0xff]   ;;  %v8660_v12 = vld [vmem:[#allocation10 + $0x324] ss:$8 sps:$4 sm:$0xff]  }
 0x2a2   :  { %v8616_v63 = vmax.f32 %v3465_v38, %v8600_v40  ;;  %v3678_v24 = vmax.f32 %v3466_v42, %v8613_v61  ;;  %v8650_v42 = vld [vmem:[#allocation10 + $0x40] ss:$8 sps:$4 sm:$0xff]   ;;  %9854 = vst [vmem:[#allocation47_spill] sm:$0xff] %v8654_v31  ;;  %v8656_v38 = vld [vmem:[#allocation10 + $0x54] ss:$8 sps:$4 sm:$0xff]   ;;  %9855 = vst [vmem:[#allocation48_spill] sm:$0xff] %v8660_v12 }
 0x2a3   :  { %4544 = vmatpush1.bf16.msra.mxu1 %v8596_v23  ;;  %v8723_v45 = vld [vmem:[#allocation10 + $0x360] ss:$8 sps:$4 sm:$0xff]  }
 0x2a4   :  { %4652 = vmatpush1.bf16.msra.mxu0 %v8604_v0  ;;  %4545 = vmatprep.subr.bf16.mxu1 %v8606_v54  ;;  %v8646_v28 = vpack.c.bf16 %v3678_v24, %v3678_v24  ;;  %v8663_v24 = vld [vmem:[#allocation10 + $0x50] ss:$8 sps:$4 sm:$0xff]   ;;  %9865 = vst [vmem:[#allocation58_spill] sm:$0xff] %v8723_v45 }
 0x2a5   :  { %4653 = vmatprep.subr.bf16.mxu0 %v8609_v27  ;;  %v8715_v27 = vld [vmem:[#allocation10 + $0x90] ss:$8 sps:$4 sm:$0xff]  }
 0x2a7   :  { %4546 = vmatpush1.bf16.msra.mxu1 %v8619_v59 }
 0x2a8   :  { %4654 = vmatpush1.bf16.msra.mxu0 %v8623_v46  ;;  %4547 = vmatprep.subr.bf16.mxu1 %v8625_v34 }
 0x2a9   :  { %4664 = vmatprep.subr.bf16.mxu0 %v8629_v20  ;;  %v8709_v20 = vld [vmem:[#allocation10 + $0x94] ss:$8 sps:$4 sm:$0xff]  }
 0x2ab   :  { %4548 = vmatpush1.bf16.msra.mxu1 %v8633_v47  ;;  %4656 = vmatmul.mubr.bf16.vlgmr.msra.gmra.mrb[28].mxu0 %v8639_v2 }
 0x2ac   :  { %4665 = vmatpush1.bf16.msra.mxu0 %v8637_v17  ;;  %4696 = vmatprep.mubr.bf16.mxu0 %v8646_v28  ;;  %v8707_v17 = vld [vmem:[#allocation10 + $0x350] ss:$8 sps:$4 sm:$0xff]  }
 0x2ad   :  { %4549 = vmatprep.subr.bf16.mxu1 %v8642_v36  ;;  %4666 = vmatprep.subr.bf16.mxu0 %v8644_v49  ;;  %v8696_v49 = vld [vmem:[#allocation10 + $0x354] ss:$8 sps:$4 sm:$0xff]   ;;  %9863 = vst [vmem:[#allocation56_spill] sm:$0xff] %v8707_v17 }
 0x2ae   :  { %9861 = vst [vmem:[#allocation54_spill] sm:$0xff] %v8696_v49 }
 0x2af   :  { %4550 = vmatpush1.bf16.msra.mxu1 %v8650_v42 }
 0x2b0   :  { %4667 = vmatpush1.bf16.msra.mxu0 %v8654_v31  ;;  %4551 = vmatprep.subr.bf16.mxu1 %v8656_v38  ;;  %v8684_v31 = vld [vmem:[#allocation10 + $0x344] ss:$8 sps:$4 sm:$0xff]  }
 0x2b1   :  { %4668 = vmatprep.subr.bf16.mxu0 %v8660_v12  ;;  %9859 = vst [vmem:[#allocation52_spill] sm:$0xff] %v8684_v31  ;;  %v8687_v12 = vld [vmem:[#allocation10 + $0x70] ss:$8 sps:$4 sm:$0xff]  }
 0x2b3   :  { %4552 = vmatpush1.bf16.msra.mxu1 %v8663_v24 }
 0x2b4   :  { %4669 = vmatpush1.bf16.msra.mxu0 %v8667_v15  ;;  %4553 = vmatprep.subr.bf16.mxu1 %v8669_v22  ;;  %v8693_v15 = vld [vmem:[#allocation10 + $0x84] ss:$8 sps:$4 sm:$0xff]  }
 0x2b5   :  { %4670 = vmatprep.subr.bf16.mxu0 %v8672_v3  ;;  %v8699_v3 = vld [vmem:[#allocation10 + $0x80] ss:$8 sps:$4 sm:$0xff]  }
 0x2b7   :  { %4554 = vmatpush1.bf16.msra.mxu1 %v8675_v21 }
 0x2b8   :  { %4671 = vmatpush1.bf16.msra.mxu0 %v8679_v52  ;;  %4555 = vmatprep.subr.bf16.mxu1 %v8681_v51  ;;  %v8705_v52 = vadd.f32 %v8534_v8, %v8313_v6 }
 0x2b9   :  { %4672 = vmatprep.subr.bf16.mxu0 %v8684_v31  ;;  %v8712_v31 = vld [vmem:[#allocation10 + $0x364] ss:$8 sps:$4 sm:$0xff]  }
 0x2ba   :  { %9862 = vst [vmem:[#allocation55_spill] sm:$0xff] %v8705_v52  ;;  %9864 = vst [vmem:[#allocation57_spill] sm:$0xff] %v8712_v31 }
 0x2bb   :  { %4556 = vmatpush1.bf16.msra.mxu1 %v8687_v12 }
 0x2bc   :  { %4673 = vmatpush1.bf16.msra.mxu0 %v8691_v11  ;;  %4557 = vmatprep.subr.bf16.mxu1 %v8693_v15 }
 0x2bd   :  { %4674 = vmatprep.subr.bf16.mxu0 %v8696_v49  ;;  %v8725_v49 = vld [vmem:[#allocation10 + $0xa4] ss:$8 sps:$4 sm:$0xff]  }
 0x2bf   :  { %v2679_v46 = vpop.f32.mrb[20].mxu0  ;;  %4558 = vmatpush1.bf16.msra.mxu1 %v8699_v3 }
 0x2c0   :  { %v2680_v0 = vadd.f32 %v2679_v46, %v8317_v33  ;;  %4675 = vmatpush1.bf16.msra.mxu0 %v8707_v17  ;;  %v8720_v8 = vpop.f32.mrb[21].mxu0  ;;  %4559 = vmatprep.subr.bf16.mxu1 %v8709_v20  ;;  %v8733_v46 = vld [vmem:[#allocation10 + $0xa0] ss:$8 sps:$4 sm:$0xff]   ;;  %v9868_v17 = vmax.f32 %v8705_v52, 0.0 }
 0x2c1   :  { %v2683_v37 = vpop.f32.mrb[22].mxu0  ;;  %4676 = vmatprep.subr.bf16.mxu0 %v8712_v31  ;;  %v8742_v31 = vld [vmem:[#allocation10 + $0xb4] ss:$8 sps:$4 sm:$0xff]   ;;  %v8755_v52 = vld [vmem:[#allocation10 + $0x380] ss:$8 sps:$4 sm:$0xff]  }
 0x2c2   :  { %v8730_v48 = vmax.f32 %v2680_v0, 0.0  ;;  %v2684_v11 = vpop.f32.mrb[23].mxu0  ;;  %v8740_v37 = vld [vmem:[#allocation10 + $0x370] ss:$8 sps:$4 sm:$0xff]   ;;  %9871 = vst [vmem:[#allocation63_spill] sm:$0xff] %v8755_v52 }
 0x2c3   :  { %4560 = vmatpush1.bf16.msra.mxu1 %v8715_v27  ;;  %9869 = vst [vmem:[#allocation61_spill] sm:$0xff] %v8740_v37  ;;  %v8747_v11 = vld [vmem:[#allocation10 + $0x384] ss:$8 sps:$4 sm:$0xff]   ;;  %v8751_v0 = vld [vmem:[#allocation10 + $0xb0] ss:$8 sps:$4 sm:$0xff]  }
 0x2c4   :  { %9867 = vst [vmem:[#allocation60_spill] sm:$0xff] %v8730_v48  ;;  %4677 = vmatpush1.bf16.msra.mxu0 %v8723_v45  ;;  %v6793_v57 = vpack.i.bf16 %v8730_v48, %v9868_v17  ;;  %4561 = vmatprep.subr.bf16.mxu1 %v8725_v49  ;;  %9870 = vst [vmem:[#allocation62_spill] sm:$0xff] %v8747_v11  ;;  %v8757_v45 = vld [vmem:[#allocation10 + $0xc4] ss:$8 sps:$4 sm:$0xff]  }
 0x2c5   :  { %4678 = vmatprep.subr.bf16.mxu0 %v8728_v56  ;;  %3595 = vrot.lane.b32.xlu0 %v8730_v48, %s7983_s30  ;;  %v8760_v48 = vld [vmem:[#allocation10 + $0x394] ss:$8 sps:$4 sm:$0xff]  }
 0x2c6   :  { %6794 = vrot.lane.b32.xlu1 %v6793_v57, %s7983_s30  ;;  %9872 = vst [vmem:[#allocation64_spill] sm:$0xff] %v8760_v48  ;;  %v3516_v62 = vpop.permute.xlu0 %3515 }
 0x2c7   :  { %4562 = vmatpush1.bf16.msra.mxu1 %v8733_v46 }
 0x2c8   :  { %v6775_v17 = vpop.permute.xlu1 %6774  ;;  %4679 = vmatpush1.bf16.msra.mxu0 %v8740_v37  ;;  %4563 = vmatprep.subr.bf16.mxu1 %v8742_v31 }
 0x2c9   :  { %v6776_v56 = vunpack.i.l.bf16 %v6775_v17  ;;  %4680 = vmatprep.subr.bf16.mxu0 %v8747_v11  ;;  %v8774_v11 = vld [vmem:[#allocation10 + $0x3a4] ss:$8 sps:$4 sm:$0xff]  }
 0x2ca   :  { %9874 = vst [vmem:[#allocation66_spill] sm:$0xff] %v8774_v11 }
 0x2cb   :  { %v3501_v57 = vsel %vm3400_vm11, %v3496_v35, %v6776_v56  ;;  %4564 = vmatpush1.bf16.msra.mxu1 %v8751_v0 }
 0x2cc   :  { %v3505_v37 = vmax.f32 %v8406_v13, %v3501_v57  ;;  %4681 = vmatpush1.bf16.msra.mxu0 %v8755_v52  ;;  %4565 = vmatprep.subr.bf16.mxu1 %v8757_v45  ;;  %v8786_v57 = vld [vmem:[#allocation10 + $0x3a0] ss:$8 sps:$4 sm:$0xff]   ;;  %v8788_v52 = vld [vmem:[#allocation10 + $0xe4] ss:$8 sps:$4 sm:$0xff]  }
 0x2cd   :  { %4682 = vmatprep.subr.bf16.mxu0 %v8760_v48  ;;  %9875 = vst [vmem:[#allocation67_spill] sm:$0xff] %v8786_v57 }
 0x2ce   :  { %v8777_v35 = vmax.f32 %v8600_v40, %v3505_v37  ;;  %v8792_v40 = vld [vmem:[#allocation10 + $0x3b4] ss:$8 sps:$4 sm:$0xff]  }
 0x2cf   :  { %4566 = vmatpush1.bf16.msra.mxu1 %v8764_v50  ;;  %9876 = vst [vmem:[#allocation68_spill] sm:$0xff] %v8792_v40 }
 0x2d0   :  { %v8782_v13 = vpop.permute.xlu1 %6779  ;;  %4683 = vmatpush1.bf16.msra.mxu0 %v8769_v41  ;;  %4567 = vmatprep.subr.bf16.mxu1 %v8771_v29  ;;  %v8798_v41 = vld [vmem:[#allocation10 + $0xe0] ss:$8 sps:$4 sm:$0xff]  }
 0x2d1   :  { %v9730_v48 = vunpack.i.l.bf16 %v8782_v13  ;;  %4684 = vmatprep.subr.bf16.mxu0 %v8774_v11  ;;  %v8807_v11 = vld [vmem:[#allocation10 + $0xf4] ss:$8 sps:$4 sm:$0xff]  }
 0x2d3   :  { %v3521_v39 = vsel %vm3400_vm11, %v3516_v62, %v9730_v48  ;;  %4568 = vmatpush1.bf16.msra.mxu1 %v8780_v26  ;;  %v8816_v48 = vld [vmem:[#allocation10 + $0xf0] ss:$8 sps:$4 sm:$0xff]  }
 0x2d4   :  { %v8801_v53 = vmax.f32 %v8425_v60, %v3521_v39  ;;  %4685 = vmatpush1.bf16.msra.mxu0 %v8786_v57  ;;  %4569 = vmatprep.subr.bf16.mxu1 %v8788_v52  ;;  %v8820_v60 = vld [vmem:[#allocation10 + $0x3c0] ss:$8 sps:$4 sm:$0xff]   ;;  %v8823_v39 = vld [vmem:[#allocation10 + $0x3d4] ss:$8 sps:$4 sm:$0xff]   ;;  %v8830_v57 = vld [vmem:[#allocation10 + $0x3d0] ss:$8 sps:$4 sm:$0xff]  }
 0x2d5   :  { %4686 = vmatprep.subr.bf16.mxu0 %v8792_v40  ;;  %9879 = vst [vmem:[#allocation71_spill] sm:$0xff] %v8820_v60  ;;  %9880 = vst [vmem:[#allocation72_spill] sm:$0xff] %v8823_v39  ;;  %v6777_v40 = vunpack.i.h.bf16 %v6775_v17  ;;  %v8843_v17 = vld [vmem:[#allocation10 + $0x3f4] ss:$8 sps:$4 sm:$0xff]  }
 0x2d6   :  { %v8813_v62 = vmax.f32 %v3505_v37, %v8801_v53  ;;  %v3893_v37 = vpack.c.bf16 %v8563_v14, %v8563_v14  ;;  %v8840_v14 = vld [vmem:[#allocation10 + $0x3e0] ss:$8 sps:$4 sm:$0xff]  }
 0x2d7   :  { %4570 = vmatpush1.bf16.msra.mxu1 %v8798_v41 }
 0x2d8   :  { %4687 = vmatpush1.bf16.msra.mxu0 %v8805_v58  ;;  %4571 = vmatprep.subr.bf16.mxu1 %v8807_v11  ;;  %v8833_v58 = vld [vmem:[#allocation10 + $0x3e4] ss:$8 sps:$4 sm:$0xff]  }
 0x2d9   :  { %4688 = vmatprep.subr.bf16.mxu0 %v8810_v7  ;;  %v3502_v7 = vsel %vm3400_vm11, %v6776_v56, %v6777_v40  ;;  %v8977_v40 = vld [vmem:[#allocation10 + $0x120] ss:$8 sps:$4 sm:$0xff]  }
 0x2da   :  { %9884 = vst [vmem:[#allocation73_spill] sm:$0xff] %v8977_v40 }
 0x2db   :  { %4572 = vmatpush1.bf16.msra.mxu1 %v8816_v48 }
 0x2dc   :  { %4689 = vmatpush1.bf16.msra.mxu0 %v8820_v60  ;;  %4725 = vmatprep.subr.bf16.mxu1 %v8569_v43 }
 0x2dd   :  { %4690 = vmatprep.subr.bf16.mxu0 %v8823_v39  ;;  %v9881_v39 = vmax.f32 %v8421_v44, 0.0  ;;  %v8862_v44 = vpack.c.bf16 %v8616_v63, %v8616_v63  ;;  %v3536_v63 = vpop.permute.xlu0 %3535 }
 0x2de   :  { %4574 = vmatmul.mubr.bf16.vlgmr.msra.gmra.mrb[28].mxu1 %v3893_v37 }
 0x2df   :  { %4726 = vmatpush1.bf16.msra.mxu1 %v8579_v16  ;;  %4757 = vmatprep.mubr.bf16.mxu1 %v8572_v18  ;;  %v8847_v60 = vmax.f32 %v9881_v39, %v3502_v7  ;;  %v8852_v18 = vld [vmem:[#allocation10 + $0x3f0] ss:$8 sps:$4 sm:$0xff]   ;;  %v8986_v39 = vpack.c.bf16 %v8777_v35, %v8777_v35  ;;  %v9001_v35 = vld [vmem:[#allocation10 + $0x140] ss:$8 sps:$4 sm:$0xff]  }
 0x2e0   :  { %4691 = vmatpush1.bf16.msra.mxu0 %v8830_v57  ;;  %4727 = vmatprep.subr.bf16.mxu1 %v8585_v4 }
 0x2e1   :  { %4692 = vmatprep.subr.bf16.mxu0 %v8833_v58  ;;  %v3686_v56 = vmax.f32 %v8613_v61, %v8847_v60 }
 0x2e3   :  { %4728 = vmatpush1.bf16.msra.mxu1 %v8596_v23  ;;  %v8865_v7 = vpack.c.bf16 %v3686_v56, %v3686_v56  ;;  %v8991_v56 = vld [vmem:[#allocation10 + $0x130] ss:$8 sps:$4 sm:$0xff]  }
 0x2e4   :  { %4693 = vmatpush1.bf16.msra.mxu0 %v8840_v14  ;;  %4729 = vmatprep.subr.bf16.mxu1 %v8606_v54  ;;  %9886 = vst [vmem:[#allocation75_spill] sm:$0xff] %v8991_v56 }
 0x2e5   :  { %4694 = vmatprep.subr.bf16.mxu0 %v8843_v17 }
 0x2e7   :  { %4730 = vmatpush1.bf16.msra.mxu1 %v8619_v59 }
 0x2e8   :  { %4695 = vmatpush1.bf16.msra.mxu0 %v8852_v18  ;;  %4731 = vmatprep.subr.bf16.mxu1 %v8625_v34 }
 0x2e9   :  { %4909 = vmatprep.subr.bf16.mxu0 %v8569_v43 }
 0x2eb   :  { %4697 = vmatmul.mubr.bf16.vlgmr.msra.gmra.mrb[28].mxu0 %v8862_v44  ;;  %4732 = vmatpush1.bf16.msra.mxu1 %v8633_v47 }
 0x2ec   :  { %4910 = vmatpush1.bf16.msra.mxu0 %v8579_v16  ;;  %4941 = vmatprep.mubr.bf16.mxu0 %v8865_v7 }
 0x2ed   :  { %4733 = vmatprep.subr.bf16.mxu1 %v8642_v36  ;;  %4911 = vmatprep.subr.bf16.mxu0 %v8585_v4 }
 0x2ef   :  { %4734 = vmatpush1.bf16.msra.mxu1 %v8650_v42 }
 0x2f0   :  { %4912 = vmatpush1.bf16.msra.mxu0 %v8596_v23  ;;  %4735 = vmatprep.subr.bf16.mxu1 %v8656_v38 }
 0x2f1   :  { %4913 = vmatprep.subr.bf16.mxu0 %v8606_v54 }
 0x2f3   :  { %4736 = vmatpush1.bf16.msra.mxu1 %v8663_v24 }
 0x2f4   :  { %4914 = vmatpush1.bf16.msra.mxu0 %v8619_v59  ;;  %4737 = vmatprep.subr.bf16.mxu1 %v8669_v22 }
 0x2f5   :  { %4915 = vmatprep.subr.bf16.mxu0 %v8625_v34 }
 0x2f7   :  { %4738 = vmatpush1.bf16.msra.mxu1 %v8675_v21  ;;  %v8882_v43 = vpop.f32.mrb[24].mxu0 }
 0x2f8   :  { %4916 = vmatpush1.bf16.msra.mxu0 %v8633_v47  ;;  %v8885_v16 = vpop.f32.mrb[25].mxu0  ;;  %4739 = vmatprep.subr.bf16.mxu1 %v8681_v51 }
 0x2f9   :  { %v3147_v4 = vpop.f32.mrb[26].mxu0  ;;  %4917 = vmatprep.subr.bf16.mxu0 %v8642_v36 }
 0x2fa   :  { %v3148_v23 = vpop.f32.mrb[27].mxu0  ;;  %v9005_v4 = vld [vmem:[#allocation10 + $0x154] ss:$8 sps:$4 sm:$0xff]  }
 0x2fb   :  { %4740 = vmatpush1.bf16.msra.mxu1 %v8687_v12  ;;  %v9009_v23 = vld [vmem:[#allocation10 + $0x150] ss:$8 sps:$4 sm:$0xff]  }
 0x2fc   :  { %4918 = vmatpush1.bf16.msra.mxu0 %v8650_v42  ;;  %4741 = vmatprep.subr.bf16.mxu1 %v8693_v15  ;;  %v8954_v42 = vld [vmem:[#allocation10 + $0x100] ss:$8 sps:$4 sm:$0xff]  }
 0x2fd   :  { %4919 = vmatprep.subr.bf16.mxu0 %v8656_v38  ;;  %v8959_v38 = vld [vmem:[#allocation10 + $0x114] ss:$8 sps:$4 sm:$0xff]  }
 0x2ff   :  { %4742 = vmatpush1.bf16.msra.mxu1 %v8699_v3 }
 0x300   :  { %v8894_v54 = vpop.permute.xlu1 %6784  ;;  %4920 = vmatpush1.bf16.msra.mxu0 %v8663_v24  ;;  %4743 = vmatprep.subr.bf16.mxu1 %v8709_v20  ;;  %v8967_v24 = vld [vmem:[#allocation10 + $0x110] ss:$8 sps:$4 sm:$0xff]  }
 0x301   :  { %v9744_v61 = vunpack.i.l.bf16 %v8894_v54  ;;  %4921 = vmatprep.subr.bf16.mxu0 %v8669_v22 }
 0x303   :  { %v3541_v59 = vsel %vm3400_vm11, %v3536_v63, %v9744_v61  ;;  %4744 = vmatpush1.bf16.msra.mxu1 %v8715_v27  ;;  %v9013_v63 = vld [vmem:[#allocation10 + $0x164] ss:$8 sps:$4 sm:$0xff]   ;;  %v9039_v61 = vld [vmem:[#allocation10 + $0x170] ss:$8 sps:$4 sm:$0xff]  }
 0x304   :  { %v3545_v34 = vmax.f32 %v8440_v1, %v3541_v59  ;;  %4922 = vmatpush1.bf16.msra.mxu0 %v8675_v21  ;;  %4745 = vmatprep.subr.bf16.mxu1 %v8725_v49  ;;  %v3556_v21 = vpop.permute.xlu0 %3555  ;;  %v9017_v59 = vld [vmem:[#allocation10 + $0x160] ss:$8 sps:$4 sm:$0xff]   ;;  %9890 = vst [vmem:[#allocation79_spill] sm:$0xff] %v9039_v61 }
 0x305   :  { %4923 = vmatprep.subr.bf16.mxu0 %v8681_v51 }
 0x306   :  { %v8909_v47 = vmax.f32 %v8801_v53, %v3545_v34 }
 0x307   :  { %4746 = vmatpush1.bf16.msra.mxu1 %v8733_v46 }
 0x308   :  { %v8912_v22 = vpop.permute.xlu1 %6789  ;;  %4924 = vmatpush1.bf16.msra.mxu0 %v8687_v12  ;;  %4747 = vmatprep.subr.bf16.mxu1 %v8742_v31 }
 0x309   :  { %v9743_v36 = vunpack.i.l.bf16 %v8912_v22  ;;  %4925 = vmatprep.subr.bf16.mxu0 %v8693_v15  ;;  %v6782_v15 = vunpack.i.h.bf16 %v8782_v13 }
 0x30b   :  { %v3561_v51 = vsel %vm3400_vm11, %v3556_v21, %v9743_v36  ;;  %4748 = vmatpush1.bf16.msra.mxu1 %v8751_v0 }
 0x30c   :  { %v8923_v1 = vmax.f32 %v8506_v10, %v3561_v51  ;;  %4926 = vmatpush1.bf16.msra.mxu0 %v8699_v3  ;;  %4749 = vmatprep.subr.bf16.mxu1 %v8757_v45  ;;  %v8946_v3 = vld [vmem:[#allocation10 + $0x104] ss:$8 sps:$4 sm:$0xff]   ;;  %v9882_v10 = vunpack.i.l.bf16 %v8782_v13  ;;  %v9027_v51 = vld [vmem:[#allocation10 + $0x174] ss:$8 sps:$4 sm:$0xff]  }
 0x30d   :  { %4927 = vmatprep.subr.bf16.mxu0 %v8709_v20  ;;  %v8971_v13 = vld [vmem:[#allocation10 + $0x124] ss:$8 sps:$4 sm:$0xff]   ;;  %9888 = vst [vmem:[#allocation77_spill] sm:$0xff] %v9027_v51 }
 0x30e   :  { %v8929_v53 = vmax.f32 %v3545_v34, %v8923_v1  ;;  %v3522_v20 = vsel %vm3400_vm11, %v9882_v10, %v6782_v15  ;;  %v9022_v34 = vadd.f32 %v8720_v8, %v8313_v6 }
 0x30f   :  { %4750 = vmatpush1.bf16.msra.mxu1 %v8764_v50 }
 0x310   :  { %4928 = vmatpush1.bf16.msra.mxu0 %v8715_v27  ;;  %4751 = vmatprep.subr.bf16.mxu1 %v8771_v29 }
 0x311   :  { %4929 = vmatprep.subr.bf16.mxu0 %v8725_v49 }
 0x313   :  { %4752 = vmatpush1.bf16.msra.mxu1 %v8780_v26 }
 0x314   :  { %4930 = vmatpush1.bf16.msra.mxu0 %v8733_v46  ;;  %4753 = vmatprep.subr.bf16.mxu1 %v8788_v52 }
 0x315   :  { %4931 = vmatprep.subr.bf16.mxu0 %v8742_v31 }
 0x317   :  { %4754 = vmatpush1.bf16.msra.mxu1 %v8798_v41 }
 0x318   :  { %4932 = vmatpush1.bf16.msra.mxu0 %v8751_v0  ;;  %4755 = vmatprep.subr.bf16.mxu1 %v8807_v11 }
 0x319   :  { %4933 = vmatprep.subr.bf16.mxu0 %v8757_v45 }
 0x31b   :  { %4756 = vmatpush1.bf16.msra.mxu1 %v8816_v48 }
 0x31c   :  { %4934 = vmatpush1.bf16.msra.mxu0 %v8764_v50  ;;  %4766 = vmatprep.subr.bf16.mxu1 %v8946_v3 }
 0x31d   :  { %4935 = vmatprep.subr.bf16.mxu0 %v8771_v29 }
 0x31e   :  { %4758 = vmatmul.mubr.bf16.vlgmr.msra.gmra.mrb[32].mxu1 %v8639_v2  ;;  %v9883_v2 = vmax.f32 %v8433_v5, 0.0  ;;  %v8981_v5 = vld [vmem:[#allocation10 + $0x134] ss:$8 sps:$4 sm:$0xff]  }
 0x31f   :  { %4767 = vmatpush1.bf16.msra.mxu1 %v8954_v42  ;;  %4798 = vmatprep.mubr.bf16.mxu1 %v8646_v28  ;;  %9885 = vst [vmem:[#allocation74_spill] sm:$0xff] %v8981_v5 }
 0x320   :  { %4936 = vmatpush1.bf16.msra.mxu0 %v8780_v26  ;;  %4768 = vmatprep.subr.bf16.mxu1 %v8959_v38  ;;  %v8965_v12 = vmax.f32 %v9883_v2, %v3522_v20  ;;  %v3576_v20 = vpop.permute.xlu0 %3575 }
 0x321   :  { %4937 = vmatprep.subr.bf16.mxu0 %v8788_v52 }
 0x322   :  { %v3694_v28 = vmax.f32 %v8847_v60, %v8965_v12  ;;  %v8997_v60 = vld [vmem:[#allocation10 + $0x144] ss:$8 sps:$4 sm:$0xff]  }
 0x323   :  { %4769 = vmatpush1.bf16.msra.mxu1 %v8967_v24  ;;  %9887 = vst [vmem:[#allocation76_spill] sm:$0xff] %v8997_v60 }
 0x324   :  { %4938 = vmatpush1.bf16.msra.mxu0 %v8798_v41  ;;  %4770 = vmatprep.subr.bf16.mxu1 %v8971_v13  ;;  %v8989_v37 = vpack.c.bf16 %v3694_v28, %v3694_v28 }
 0x325   :  { %4939 = vmatprep.subr.bf16.mxu0 %v8807_v11 }
 0x327   :  { %4771 = vmatpush1.bf16.msra.mxu1 %v8977_v40 }
 0x328   :  { %4940 = vmatpush1.bf16.msra.mxu0 %v8816_v48  ;;  %4772 = vmatprep.subr.bf16.mxu1 %v8981_v5 }
 0x329   :  { %4950 = vmatprep.subr.bf16.mxu0 %v8946_v3 }
 0x32b   :  { %4773 = vmatpush1.bf16.msra.mxu1 %v8991_v56  ;;  %4942 = vmatmul.mubr.bf16.vlgmr.msra.gmra.mrb[32].mxu0 %v8986_v39 }
 0x32c   :  { %4951 = vmatpush1.bf16.msra.mxu0 %v8954_v42  ;;  %4982 = vmatprep.mubr.bf16.mxu0 %v8989_v37 }
 0x32d   :  { %4774 = vmatprep.subr.bf16.mxu1 %v8997_v60  ;;  %4952 = vmatprep.subr.bf16.mxu0 %v8959_v38 }
 0x32f   :  { %4775 = vmatpush1.bf16.msra.mxu1 %v9001_v35 }
 0x330   :  { %4953 = vmatpush1.bf16.msra.mxu0 %v8967_v24  ;;  %4776 = vmatprep.subr.bf16.mxu1 %v9005_v4 }
 0x331   :  { %4954 = vmatprep.subr.bf16.mxu0 %v8971_v13 }
 0x333   :  { %4777 = vmatpush1.bf16.msra.mxu1 %v9009_v23 }
 0x334   :  { %4955 = vmatpush1.bf16.msra.mxu0 %v8977_v40  ;;  %4778 = vmatprep.subr.bf16.mxu1 %v9013_v63 }
 0x335   :  { %4956 = vmatprep.subr.bf16.mxu0 %v8981_v5  ;;  %v9753_v5 = vmax.f32 %v9022_v34, 0.0 }
 0x337   :  { %4779 = vmatpush1.bf16.msra.mxu1 %v9017_v59 }
 0x338   :  { %v9024_v21 = vpop.permute.xlu1 %6794  ;;  %4957 = vmatpush1.bf16.msra.mxu0 %v8991_v56  ;;  %4780 = vmatprep.subr.bf16.mxu1 %v9027_v51 }
 0x339   :  { %v9755_v15 = vunpack.i.l.bf16 %v9024_v21  ;;  %v2908_v10 = vpop.f32.mrb[20].mxu1  ;;  %4958 = vmatprep.subr.bf16.mxu0 %v8997_v60  ;;  %v3144_v60 = vadd.f32 %v8882_v43, %v8317_v33 }
 0x33a   :  { %v2909_v2 = vadd.f32 %v2908_v10, %v8317_v33  ;;  %v2910_v28 = vpop.f32.mrb[21].mxu1 }
 0x33b   :  { %v3581_v8 = vsel %vm3400_vm11, %v3576_v20, %v9755_v15  ;;  %v9037_v36 = vadd.f32 %v2910_v28, %v8313_v6  ;;  %4781 = vmatpush1.bf16.msra.mxu1 %v9039_v61  ;;  %v2912_v56 = vpop.f32.mrb[22].mxu1  ;;  %v9051_v20 = vld [vmem:[#allocation10 + $0x184] ss:$8 sps:$4 sm:$0xff]   ;;  %v9098_v15 = vld [vmem:[#allocation10 + $0x1b0] ss:$8 sps:$4 sm:$0xff]  }
 0x33c   :  { %v9046_v10 = vmax.f32 %v8537_v9, %v3581_v8  ;;  %v9048_v40 = vmax.f32 %v2909_v2, 0.0  ;;  %4959 = vmatpush1.bf16.msra.mxu0 %v9001_v35  ;;  %9891 = vst [vmem:[#allocation80_spill] sm:$0xff] %v9051_v20  ;;  %4782 = vmatprep.subr.bf16.mxu1 %v9051_v20  ;;  %v2913_v28 = vpop.f32.mrb[23].mxu1  ;;  %v9065_v2 = vld [vmem:[#allocation10 + $0x180] ss:$8 sps:$4 sm:$0xff]   ;;  %v9068_v8 = vmax.f32 %v3144_v60, 0.0 }
 0x33d   :  { %9889 = vst [vmem:[#allocation78_spill] sm:$0xff] %v9037_v36  ;;  %4960 = vmatprep.subr.bf16.mxu0 %v9005_v4  ;;  %v9754_v56 = vmax.f32 %v9037_v36, 0.0  ;;  %9892 = vst [vmem:[#allocation81_spill] sm:$0xff] %v9065_v2  ;;  %v9072_v28 = vld [vmem:[#allocation10 + $0x194] ss:$8 sps:$4 sm:$0xff]  }
 0x33e   :  { %3615 = vrot.lane.b32.xlu0 %v9048_v40, %s7983_s30  ;;  %v6798_v9 = vpack.i.bf16 %v9048_v40, %v9753_v5  ;;  %v9063_v43 = vmax.f32 %v8923_v1, %v9046_v10  ;;  %9893 = vst [vmem:[#allocation82_spill] sm:$0xff] %v9072_v28  ;;  %v9081_v5 = vld [vmem:[#allocation10 + $0x190] ss:$8 sps:$4 sm:$0xff]   ;;  %v9086_v60 = vld [vmem:[#allocation10 + $0x1a4] ss:$8 sps:$4 sm:$0xff]   ;;  %9898 = vst [vmem:[#allocation87_spill] sm:$0xff] %v9098_v15 }
 0x33f   :  { %4783 = vmatpush1.bf16.msra.mxu1 %v9065_v2  ;;  %v6803_v1 = vpack.i.bf16 %v9068_v8, %v9754_v56  ;;  %9894 = vst [vmem:[#allocation83_spill] sm:$0xff] %v9081_v5  ;;  %9895 = vst [vmem:[#allocation84_spill] sm:$0xff] %v9086_v60  ;;  %v9094_v56 = vld [vmem:[#allocation10 + $0x1b4] ss:$8 sps:$4 sm:$0xff]   ;;  %v9106_v36 = vld [vmem:[#allocation10 + $0x1c0] ss:$8 sps:$4 sm:$0xff]  }
 0x340   :  { %4961 = vmatpush1.bf16.msra.mxu0 %v9009_v23  ;;  %6799 = vrot.lane.b32.xlu1 %v6798_v9, %s7983_s30  ;;  %v9090_v9 = vld [vmem:[#allocation10 + $0x1a0] ss:$8 sps:$4 sm:$0xff]   ;;  %9897 = vst [vmem:[#allocation86_spill] sm:$0xff] %v9094_v56  ;;  %9900 = vst [vmem:[#allocation89_spill] sm:$0xff] %v9106_v36 }
 0x341   :  { %4784 = vmatprep.subr.bf16.mxu1 %v9072_v28  ;;  %4962 = vmatprep.subr.bf16.mxu0 %v9013_v63  ;;  %9896 = vst [vmem:[#allocation85_spill] sm:$0xff] %v9090_v9 }
 0x342   :  { %3635 = vrot.lane.b32.xlu0 %v9068_v8, %s7983_s30 }
 0x343   :  { %4785 = vmatpush1.bf16.msra.mxu1 %v9081_v5 }
 0x344   :  { %4963 = vmatpush1.bf16.msra.mxu0 %v9017_v59  ;;  %6804 = vrot.lane.b32.xlu1 %v6803_v1, %s7983_s30  ;;  %v9102_v1 = vld [vmem:[#allocation10 + $0x1c4] ss:$8 sps:$4 sm:$0xff]  }
 0x345   :  { %4786 = vmatprep.subr.bf16.mxu1 %v9086_v60  ;;  %4964 = vmatprep.subr.bf16.mxu0 %v9027_v51  ;;  %9899 = vst [vmem:[#allocation88_spill] sm:$0xff] %v9102_v1  ;;  %v9143_v51 = vld [vmem:[#allocation10 + $0x200] ss:$8 sps:$4 sm:$0xff]  }
 0x346   :  { %9909 = vst [vmem:[#allocation97_spill] sm:$0xff] %v9143_v51 }
 0x347   :  { %4787 = vmatpush1.bf16.msra.mxu1 %v9090_v9 }
 0x348   :  { %4965 = vmatpush1.bf16.msra.mxu0 %v9039_v61  ;;  %4788 = vmatprep.subr.bf16.mxu1 %v9094_v56  ;;  %v9110_v61 = vld [vmem:[#allocation10 + $0x1d4] ss:$8 sps:$4 sm:$0xff]  }
 0x349   :  { %4966 = vmatprep.subr.bf16.mxu0 %v9051_v20  ;;  %9901 = vst [vmem:[#allocation90_spill] sm:$0xff] %v9110_v61  ;;  %v9114_v20 = vld [vmem:[#allocation10 + $0x1d0] ss:$8 sps:$4 sm:$0xff]  }
 0x34a   :  { %9902 = vst [vmem:[#allocation91_spill] sm:$0xff] %v9114_v20 }
 0x34b   :  { %4789 = vmatpush1.bf16.msra.mxu1 %v9098_v15 }
 0x34c   :  { %4967 = vmatpush1.bf16.msra.mxu0 %v9065_v2  ;;  %4790 = vmatprep.subr.bf16.mxu1 %v9102_v1  ;;  %v9118_v2 = vld [vmem:[#allocation10 + $0x1e4] ss:$8 sps:$4 sm:$0xff]  }
 0x34d   :  { %4968 = vmatprep.subr.bf16.mxu0 %v9072_v28  ;;  %9903 = vst [vmem:[#allocation92_spill] sm:$0xff] %v9118_v2  ;;  %v9122_v28 = vld [vmem:[#allocation10 + $0x1e0] ss:$8 sps:$4 sm:$0xff]  }
 0x34e   :  { %9904 = vst [vmem:[#allocation93_spill] sm:$0xff] %v9122_v28 }
 0x34f   :  { %4791 = vmatpush1.bf16.msra.mxu1 %v9106_v36 }
 0x350   :  { %4969 = vmatpush1.bf16.msra.mxu0 %v9081_v5  ;;  %4792 = vmatprep.subr.bf16.mxu1 %v9110_v61  ;;  %v9126_v5 = vld [vmem:[#allocation10 + $0x1f4] ss:$8 sps:$4 sm:$0xff]  }
 0x351   :  { %4970 = vmatprep.subr.bf16.mxu0 %v9086_v60  ;;  %9905 = vst [vmem:[#allocation94_spill] sm:$0xff] %v9126_v5  ;;  %v9131_v60 = vld [vmem:[#allocation10 + $0x1f0] ss:$8 sps:$4 sm:$0xff]  }
 0x352   :  { %9906 = vst [vmem:[#allocation95_spill] sm:$0xff] %v9131_v60 }
 0x353   :  { %4793 = vmatpush1.bf16.msra.mxu1 %v9114_v20 }
 0x354   :  { %4971 = vmatpush1.bf16.msra.mxu0 %v9090_v9  ;;  %4794 = vmatprep.subr.bf16.mxu1 %v9118_v2  ;;  %v6787_v9 = vunpack.i.h.bf16 %v8894_v54 }
 0x355   :  { %4972 = vmatprep.subr.bf16.mxu0 %v9094_v56  ;;  %v9135_v56 = vld [vmem:[#allocation10 + $0x204] ss:$8 sps:$4 sm:$0xff]  }
 0x356   :  { %9907 = vst [vmem:[#allocation96_spill] sm:$0xff] %v9135_v56 }
 0x357   :  { %4795 = vmatpush1.bf16.msra.mxu1 %v9122_v28 }
 0x358   :  { %4973 = vmatpush1.bf16.msra.mxu0 %v9098_v15  ;;  %4796 = vmatprep.subr.bf16.mxu1 %v9126_v5  ;;  %v9908_v15 = vunpack.i.l.bf16 %v8894_v54  ;;  %v9156_v54 = vld [vmem:[#allocation10 + $0x210] ss:$8 sps:$4 sm:$0xff]  }
 0x359   :  { %4974 = vmatprep.subr.bf16.mxu0 %v9102_v1  ;;  %9912 = vst [vmem:[#allocation99_spill] sm:$0xff] %v9156_v54 }
 0x35a   :  { %v3542_v1 = vsel %vm3400_vm11, %v9908_v15, %v6787_v9  ;;  %v9160_v15 = vld [vmem:[#allocation10 + $0x224] ss:$8 sps:$4 sm:$0xff]   ;;  %v9166_v9 = vld [vmem:[#allocation10 + $0x220] ss:$8 sps:$4 sm:$0xff]  }
 0x35b   :  { %4797 = vmatpush1.bf16.msra.mxu1 %v9131_v60  ;;  %9913 = vst [vmem:[#allocation100_spill] sm:$0xff] %v9160_v15  ;;  %9914 = vst [vmem:[#allocation101_spill] sm:$0xff] %v9166_v9 }
 0x35c   :  { %4975 = vmatpush1.bf16.msra.mxu0 %v9106_v36  ;;  %4807 = vmatprep.subr.bf16.mxu1 %v9135_v56  ;;  %v9148_v36 = vld [vmem:[#allocation10 + $0x214] ss:$8 sps:$4 sm:$0xff]  }
 0x35d   :  { %4976 = vmatprep.subr.bf16.mxu0 %v9110_v61  ;;  %9910 = vst [vmem:[#allocation98_spill] sm:$0xff] %v9148_v36 }
 0x35e   :  { %4799 = vmatmul.mubr.bf16.vlgmr.msra.gmra.mrb[32].mxu1 %v8862_v44  ;;  %v9911_v44 = vmax.f32 %v8491_v55, 0.0  ;;  %v9170_v55 = vld [vmem:[#allocation10 + $0x234] ss:$8 sps:$4 sm:$0xff]  }
 0x35f   :  { %4808 = vmatpush1.bf16.msra.mxu1 %v9143_v51  ;;  %4839 = vmatprep.mubr.bf16.mxu1 %v8865_v7  ;;  %9915 = vst [vmem:[#allocation102_spill] sm:$0xff] %v9170_v55 }
 0x360   :  { %4977 = vmatpush1.bf16.msra.mxu0 %v9114_v20  ;;  %4809 = vmatprep.subr.bf16.mxu1 %v9148_v36  ;;  %v9154_v61 = vmax.f32 %v9911_v44, %v3542_v1  ;;  %v9175_v1 = vpack.c.bf16 %v8813_v62, %v8813_v62  ;;  %v9193_v62 = vadd.f32 %v8885_v16, %v8313_v6  ;;  %v9202_v6 = vld [vmem:[#allocation10 + $0x264] ss:$8 sps:$4 sm:$0xff]  }
 0x361   :  { %4978 = vmatprep.subr.bf16.mxu0 %v9118_v2  ;;  %9919 = vst [vmem:[#allocation106_spill] sm:$0xff] %v9202_v6  ;;  %v9967_v20 = vld [vmem:[#allocation61_spill] sm:$0xff] }
 0x362   :  { %v3702_v7 = vmax.f32 %v8965_v12, %v9154_v61  ;;  %v9186_v12 = vld [vmem:[#allocation10 + $0x244] ss:$8 sps:$4 sm:$0xff]   ;;  %9918 = vst [vmem:[#allocation105_spill] sm:$0xff] %v9193_v62 }
 0x363   :  { %4810 = vmatpush1.bf16.msra.mxu1 %v9156_v54  ;;  %9917 = vst [vmem:[#allocation104_spill] sm:$0xff] %v9186_v12 }
 0x364   :  { %4979 = vmatpush1.bf16.msra.mxu0 %v9122_v28  ;;  %4811 = vmatprep.subr.bf16.mxu1 %v9160_v15  ;;  %v9178_v44 = vpack.c.bf16 %v3702_v7, %v3702_v7 }
 0x365   :  { %4980 = vmatprep.subr.bf16.mxu0 %v9126_v5  ;;  %v9180_v5 = vld [vmem:[#allocation10 + $0x230] ss:$8 sps:$4 sm:$0xff]  }
 0x366   :  { %9916 = vst [vmem:[#allocation103_spill] sm:$0xff] %v9180_v5 }
 0x367   :  { %4812 = vmatpush1.bf16.msra.mxu1 %v9166_v9 }
 0x368   :  { %4981 = vmatpush1.bf16.msra.mxu0 %v9131_v60  ;;  %4813 = vmatprep.subr.bf16.mxu1 %v9170_v55 }
 0x369   :  { %4991 = vmatprep.subr.bf16.mxu0 %v9135_v56 }
 0x36b   :  { %4814 = vmatpush1.bf16.msra.mxu1 %v9180_v5  ;;  %4983 = vmatmul.mubr.bf16.vlgmr.msra.gmra.mrb[32].mxu0 %v9175_v1 }
 0x36c   :  { %4992 = vmatpush1.bf16.msra.mxu0 %v9143_v51  ;;  %5023 = vmatprep.mubr.bf16.mxu0 %v9178_v44 }
 0x36d   :  { %4815 = vmatprep.subr.bf16.mxu1 %v9186_v12  ;;  %4993 = vmatprep.subr.bf16.mxu0 %v9148_v36  ;;  %v9793_v36 = vmax.f32 %v9193_v62, 0.0  ;;  %v9934_v62 = vld [vmem:[#allocation34_spill] sm:$0xff] }
 0x36f   :  { %4816 = vmatpush1.bf16.msra.mxu1 %v8471_v30 }
 0x370   :  { %4994 = vmatpush1.bf16.msra.mxu0 %v9156_v54  ;;  %4817 = vmatprep.subr.bf16.mxu1 %v8473_v19  ;;  %v9962_v54 = vld [vmem:[#allocation58_spill] sm:$0xff] }
 0x371   :  { %v3377_v7 = vpop.f32.mrb[24].mxu1  ;;  %4995 = vmatprep.subr.bf16.mxu0 %v9160_v15 }
 0x372   :  { %v3378_v51 = vadd.f32 %v3377_v7, %v8317_v33  ;;  %v3379_v56 = vpop.f32.mrb[25].mxu1  ;;  %v9920_v33 = vld [vmem:[#allocation25_spill] sm:$0xff] }
 0x373   :  { %4818 = vmatpush1.bf16.msra.mxu1 %v8476_v32  ;;  %v3381_v60 = vpop.f32.mrb[26].mxu1  ;;  %v9921_v32 = vld [vmem:[#allocation26_spill] sm:$0xff]  ;;  %v9923_v56 = vld [vmem:[#allocation27_spill] sm:$0xff] }
 0x374   :  { %v3384_v30 = vmax.f32 %v3378_v51, 0.0  ;;  %4996 = vmatpush1.bf16.msra.mxu0 %v9166_v9  ;;  %4819 = vmatprep.subr.bf16.mxu1 %v9202_v6  ;;  %v3382_v16 = vpop.f32.mrb[27].mxu1  ;;  %v9214_v51 = vld [vmem:[#allocation10 + $0x240] ss:$8 sps:$4 sm:$0xff]   ;;  %v9218_v60 = vld [vmem:[#allocation10 + $0x254] ss:$8 sps:$4 sm:$0xff]  }
 0x375   :  { %4997 = vmatprep.subr.bf16.mxu0 %v9170_v55  ;;  %9922 = vst [vmem:[#allocation25_spill] sm:$0xff] %v9214_v51  ;;  %9924 = vst [vmem:[#allocation26_spill] sm:$0xff] %v9218_v60  ;;  %v9222_v7 = vld [vmem:[#allocation10 + $0x250] ss:$8 sps:$4 sm:$0xff]   ;;  %v9961_v55 = vld [vmem:[#allocation60_spill] sm:$0xff] }
 0x376   :  { %v6808_v19 = vpack.i.bf16 %v3384_v30, %v9793_v36  ;;  %9926 = vst [vmem:[#allocation27_spill] sm:$0xff] %v9222_v7  ;;  %v9927_v30 = vld [vmem:[#allocation29_spill] sm:$0xff]  ;;  %v9928_v16 = vld [vmem:[#allocation30_spill] sm:$0xff] }
 0x377   :  { %4820 = vmatpush1.bf16.msra.mxu1 %v8482_v25  ;;  %v9925_v25 = vld [vmem:[#allocation28_spill] sm:$0xff]  ;;  %v9236_v36 = vld [vmem:[#allocation10 + $0x270] ss:$8 sps:$4 sm:$0xff]  }
 0x378   :  { %6809 = vrot.lane.b32.xlu1 %v6808_v19, %s7983_s30  ;;  %4998 = vmatpush1.bf16.msra.mxu0 %v9180_v5  ;;  %v9228_v19 = vld [vmem:[#allocation10 + $0x260] ss:$8 sps:$4 sm:$0xff]   ;;  %9933 = vst [vmem:[#allocation30_spill] sm:$0xff] %v9236_v36 }
 0x379   :  { %4821 = vmatprep.subr.bf16.mxu1 %v9920_v33  ;;  %4999 = vmatprep.subr.bf16.mxu0 %v9186_v12  ;;  %9929 = vst [vmem:[#allocation28_spill] sm:$0xff] %v9228_v19  ;;  %v9930_v33 = vld [vmem:[#allocation31_spill] sm:$0xff] }
 0x37b   :  { %4822 = vmatpush1.bf16.msra.mxu1 %v9921_v32  ;;  %v9232_v32 = vld [vmem:[#allocation10 + $0x274] ss:$8 sps:$4 sm:$0xff]  }
 0x37c   :  { %5000 = vmatpush1.bf16.msra.mxu0 %v9214_v51  ;;  %4823 = vmatprep.subr.bf16.mxu1 %v9923_v56  ;;  %9931 = vst [vmem:[#allocation29_spill] sm:$0xff] %v9232_v32  ;;  %v9932_v56 = vld [vmem:[#allocation33_spill] sm:$0xff]  ;;  %v9944_v51 = vld [vmem:[#allocation43_spill] sm:$0xff] }
 0x37d   :  { %5001 = vmatprep.subr.bf16.mxu0 %v9218_v60  ;;  %v9939_v60 = vld [vmem:[#allocation38_spill] sm:$0xff] }
 0x37f   :  { %4824 = vmatpush1.bf16.msra.mxu1 %v9925_v25 }
 0x380   :  { %5002 = vmatpush1.bf16.msra.mxu0 %v9222_v7  ;;  %4825 = vmatprep.subr.bf16.mxu1 %v9927_v30  ;;  %v9936_v7 = vld [vmem:[#allocation35_spill] sm:$0xff] }
 0x381   :  { %5003 = vmatprep.subr.bf16.mxu0 %v9202_v6  ;;  %v9240_v6 = vld [vmem:[#allocation10 + $0x284] ss:$8 sps:$4 sm:$0xff]  }
 0x382   :  { %9935 = vst [vmem:[#allocation31_spill] sm:$0xff] %v9240_v6 }
 0x383   :  { %4826 = vmatpush1.bf16.msra.mxu1 %v9928_v16 }
 0x384   :  { %5004 = vmatpush1.bf16.msra.mxu0 %v9228_v19  ;;  %4827 = vmatprep.subr.bf16.mxu1 %v9930_v33  ;;  %v9937_v19 = vld [vmem:[#allocation36_spill] sm:$0xff] }
 0x385   :  { %5005 = vmatprep.subr.bf16.mxu0 %v9232_v32  ;;  %v9938_v32 = vld [vmem:[#allocation37_spill] sm:$0xff] }
 0x387   :  { %4828 = vmatpush1.bf16.msra.mxu1 %v9932_v56 }
 0x388   :  { %5006 = vmatpush1.bf16.msra.mxu0 %v9236_v36  ;;  %4829 = vmatprep.subr.bf16.mxu1 %v9934_v62  ;;  %v9940_v36 = vld [vmem:[#allocation39_spill] sm:$0xff] }
 0x389   :  { %5007 = vmatprep.subr.bf16.mxu0 %v9240_v6  ;;  %v9941_v6 = vld [vmem:[#allocation40_spill] sm:$0xff] }
 0x38b   :  { %4830 = vmatpush1.bf16.msra.mxu1 %v9936_v7 }
 0x38c   :  { %5008 = vmatpush1.bf16.msra.mxu0 %v9925_v25  ;;  %4831 = vmatprep.subr.bf16.mxu1 %v9937_v19  ;;  %v9942_v25 = vld [vmem:[#allocation41_spill] sm:$0xff] }
 0x38d   :  { %5009 = vmatprep.subr.bf16.mxu0 %v9927_v30  ;;  %v9943_v30 = vld [vmem:[#allocation42_spill] sm:$0xff] }
 0x38f   :  { %4832 = vmatpush1.bf16.msra.mxu1 %v9938_v32 }
 0x390   :  { %5010 = vmatpush1.bf16.msra.mxu0 %v9928_v16  ;;  %4833 = vmatprep.subr.bf16.mxu1 %v9939_v60  ;;  %v6792_v16 = vunpack.i.h.bf16 %v8912_v22 }
 0x391   :  { %5011 = vmatprep.subr.bf16.mxu0 %v9930_v33  ;;  %v9945_v33 = vld [vmem:[#allocation44_spill] sm:$0xff] }
 0x393   :  { %4834 = vmatpush1.bf16.msra.mxu1 %v9940_v36 }
 0x394   :  { %5012 = vmatpush1.bf16.msra.mxu0 %v9932_v56  ;;  %4835 = vmatprep.subr.bf16.mxu1 %v9941_v6  ;;  %v9947_v56 = vld [vmem:[#allocation45_spill] sm:$0xff] }
 0x395   :  { %5013 = vmatprep.subr.bf16.mxu0 %v9934_v62  ;;  %v9946_v62 = vunpack.i.l.bf16 %v8912_v22  ;;  %v9952_v22 = vld [vmem:[#allocation48_spill] sm:$0xff] }
 0x397   :  { %4836 = vmatpush1.bf16.msra.mxu1 %v9942_v25 }
 0x398   :  { %5014 = vmatpush1.bf16.msra.mxu0 %v9936_v7  ;;  %4837 = vmatprep.subr.bf16.mxu1 %v9943_v30  ;;  %v3562_v7 = vsel %vm3400_vm11, %v9946_v62, %v6792_v16 }
 0x399   :  { %5015 = vmatprep.subr.bf16.mxu0 %v9937_v19  ;;  %v9948_v19 = vld [vmem:[#allocation46_spill] sm:$0xff] }
 0x39b   :  { %4838 = vmatpush1.bf16.msra.mxu1 %v9944_v51 }
 0x39c   :  { %5016 = vmatpush1.bf16.msra.mxu0 %v9938_v32  ;;  %4848 = vmatprep.subr.bf16.mxu1 %v9945_v33  ;;  %v9949_v32 = vld [vmem:[#allocation32_spill] sm:$0xff] }
 0x39d   :  { %5017 = vmatprep.subr.bf16.mxu0 %v9939_v60  ;;  %v9950_v12 = vmax.f32 %v9949_v32, 0.0  ;;  %v9951_v60 = vld [vmem:[#allocation47_spill] sm:$0xff]  ;;  %v3596_v32 = vpop.permute.xlu0 %3595 }
 0x39e   :  { %4840 = vmatmul.mubr.bf16.vlgmr.msra.gmra.mrb[32].mxu1 %v8986_v39 }
 0x39f   :  { %4849 = vmatpush1.bf16.msra.mxu1 %v9947_v56  ;;  %4880 = vmatprep.mubr.bf16.mxu1 %v8989_v37  ;;  %v9275_v5 = vmax.f32 %v9950_v12, %v3562_v7  ;;  %v9954_v37 = vld [vmem:[#allocation50_spill] sm:$0xff]  ;;  %v9288_v12 = vpack.c.bf16 %v8909_v47, %v8909_v47 }
 0x3a0   :  { %5018 = vmatpush1.bf16.msra.mxu0 %v9940_v36  ;;  %4850 = vmatprep.subr.bf16.mxu1 %v9948_v19  ;;  %v9953_v36 = vld [vmem:[#allocation49_spill] sm:$0xff]  ;;  %v9958_v47 = vld [vmem:[#allocation54_spill] sm:$0xff] }
 0x3a1   :  { %5019 = vmatprep.subr.bf16.mxu0 %v9941_v6  ;;  %v3710_v39 = vmax.f32 %v9154_v61, %v9275_v5  ;;  %v9956_v61 = vld [vmem:[#allocation52_spill] sm:$0xff] }
 0x3a3   :  { %4851 = vmatpush1.bf16.msra.mxu1 %v9951_v60  ;;  %v9291_v6 = vpack.c.bf16 %v3710_v39, %v3710_v39 }
 0x3a4   :  { %5020 = vmatpush1.bf16.msra.mxu0 %v9942_v25  ;;  %4852 = vmatprep.subr.bf16.mxu1 %v9952_v22  ;;  %v9955_v25 = vld [vmem:[#allocation51_spill] sm:$0xff] }
 0x3a5   :  { %5021 = vmatprep.subr.bf16.mxu0 %v9943_v30 }
 0x3a7   :  { %4853 = vmatpush1.bf16.msra.mxu1 %v9953_v36 }
 0x3a8   :  { %5022 = vmatpush1.bf16.msra.mxu0 %v9944_v51  ;;  %4854 = vmatprep.subr.bf16.mxu1 %v9954_v37  ;;  %v9957_v51 = vld [vmem:[#allocation53_spill] sm:$0xff] }
 0x3a9   :  { %5032 = vmatprep.subr.bf16.mxu0 %v9945_v33 }
 0x3ab   :  { %4855 = vmatpush1.bf16.msra.mxu1 %v9955_v25  ;;  %5024 = vmatmul.mubr.bf16.vlgmr.msra.gmra.mrb[32].mxu0 %v9288_v12 }
 0x3ac   :  { %5033 = vmatpush1.bf16.msra.mxu0 %v9947_v56  ;;  %5064 = vmatprep.mubr.bf16.mxu0 %v9291_v6  ;;  %v9959_v56 = vld [vmem:[#allocation56_spill] sm:$0xff] }
 0x3ad   :  { %4856 = vmatprep.subr.bf16.mxu1 %v9956_v61  ;;  %5034 = vmatprep.subr.bf16.mxu0 %v9948_v19  ;;  %v9960_v19 = vld [vmem:[#allocation57_spill] sm:$0xff] }
 0x3af   :  { %4857 = vmatpush1.bf16.msra.mxu1 %v9957_v51 }
 0x3b0   :  { %5035 = vmatpush1.bf16.msra.mxu0 %v9951_v60  ;;  %4858 = vmatprep.subr.bf16.mxu1 %v9958_v47 }
 0x3b1   :  { %v4575_v30 = vpop.f32.mrb[28].mxu1  ;;  %5036 = vmatprep.subr.bf16.mxu0 %v9952_v22  ;;  %v3745_v22 = vld [vmem:[#allocation11] sm:$0x3] }
 0x3b2   :  { %v4577_v16 = vpop.f32.mrb[29].mxu1  ;;  %v9303_v33 = vpop.permute.xlu1 %6799 }
 0x3b3   :  { %v9825_v62 = vunpack.i.l.bf16 %v9303_v33  ;;  %v4579_v7 = vpop.f32.mrb[30].mxu1  ;;  %4859 = vmatpush1.bf16.msra.mxu1 %v9959_v56 }
 0x3b4   :  { %v4580_v39 = vpop.f32.mrb[31].mxu1  ;;  %5037 = vmatpush1.bf16.msra.mxu0 %v9953_v36  ;;  %4860 = vmatprep.subr.bf16.mxu1 %v9960_v19  ;;  %v9963_v36 = vld [vmem:[#allocation59_spill] sm:$0xff] }
 0x3b5   :  { %v3601_v60 = vsel %vm3400_vm11, %v3596_v32, %v9825_v62  ;;  %5038 = vmatprep.subr.bf16.mxu0 %v9954_v37  ;;  %v3616_v39 = vpop.permute.xlu0 %3615  ;;  %v9964_v32 = vld [vmem:[#allocation24_spill] sm:$0xff] }
 0x3b6   :  { %v3605_v9 = vmax.f32 %v9961_v55, %v3601_v60  ;;  %v9314_v15 = vpop.permute.xlu1 %6804  ;;  %v9965_v62 = vsub.s32 0, %v9964_v32  ;;  %v9966_v60 = vsub.s32 1, %v9964_v32 }
 0x3b7   :  { %v9830_v7 = vunpack.i.l.bf16 %v9314_v15  ;;  %4861 = vmatpush1.bf16.msra.mxu1 %v9962_v54 }
 0x3b8   :  { %5039 = vmatpush1.bf16.msra.mxu0 %v9955_v25  ;;  %4862 = vmatprep.subr.bf16.mxu1 %v9963_v36  ;;  %v9321_v28 = vmax.f32 %v9046_v10, %v3605_v9  ;;  %v9325_v37 = vrot.slane %v3745_v22, %v9965_v62  ;;  %v9333_v2 = vrot.slane %v3745_v22, %v9966_v60  ;;  %v9968_v10 = vld [vmem:[#allocation62_spill] sm:$0xff] }
 0x3b9   :  { %v3621_v55 = vsel %vm3400_vm11, %v3616_v39, %v9830_v7  ;;  %5040 = vmatprep.subr.bf16.mxu0 %v9956_v61  ;;  %v9970_v7 = vld [vmem:[#allocation64_spill] sm:$0xff] }
 0x3ba   :  { %v9336_v25 = vmax.f32 %v9048_v40, %v3621_v55  ;;  %v4576_v39 = vadd.f32 %v4575_v30, %v9325_v37  ;;  %v4578_v61 = vadd.f32 %v4577_v16, %v9333_v2  ;;  %v9969_v55 = vld [vmem:[#allocation63_spill] sm:$0xff]  ;;  %v9971_v30 = vld [vmem:[#allocation65_spill] sm:$0xff] }
 0x3bb   :  { %4863 = vmatpush1.bf16.msra.mxu1 %v9967_v20  ;;  %v9973_v16 = vld [vmem:[#allocation67_spill] sm:$0xff] }
 0x3bc   :  { %5041 = vmatpush1.bf16.msra.mxu0 %v9957_v51  ;;  %4864 = vmatprep.subr.bf16.mxu1 %v9968_v10  ;;  %v9342_v62 = vmax.f32 %v3605_v9, %v9336_v25 }
 0x3bd   :  { %5042 = vmatprep.subr.bf16.mxu0 %v9958_v47  ;;  %v9972_v47 = vld [vmem:[#allocation66_spill] sm:$0xff] }
 0x3be   :  { %v4698_v22 = vpop.f32.mrb[28].mxu0 }
 0x3bf   :  { %v9347_v32 = vadd.f32 %v4698_v22, %v4576_v39  ;;  %v4700_v40 = vpop.f32.mrb[29].mxu0  ;;  %4865 = vmatpush1.bf16.msra.mxu1 %v9969_v55  ;;  %v9974_v39 = vld [vmem:[#allocation68_spill] sm:$0xff] }
 0x3c0   :  { %v9350_v60 = vadd.f32 %v4700_v40, %v4578_v61  ;;  %v4702_v51 = vpop.f32.mrb[30].mxu0  ;;  %5043 = vmatpush1.bf16.msra.mxu0 %v9959_v56  ;;  %4866 = vmatprep.subr.bf16.mxu1 %v9970_v7  ;;  %v9975_v56 = vld [vmem:[#allocation69_spill] sm:$0xff]  ;;  %v7708_v22 = vld [vmem:[#allocation10] ss:$8 sps:$4 sm:$0xff]  }
 0x3c1   :  { %v4703_v9 = vpop.f32.mrb[31].mxu0  ;;  %5044 = vmatprep.subr.bf16.mxu0 %v9960_v19  ;;  %v9976_v19 = vld [vmem:[#allocation70_spill] sm:$0xff] }
 0x3c2   :  { %v7709_v40 = vld [vmem:[#allocation10 + $0x14] ss:$8 sps:$4 sm:$0xff]  }
 0x3c3   :  { %4867 = vmatpush1.bf16.msra.mxu1 %v9971_v30 }
 0x3c4   :  { %5045 = vmatpush1.bf16.msra.mxu0 %v9962_v54  ;;  %4868 = vmatprep.subr.bf16.mxu1 %v9972_v47  ;;  %v9977_v54 = vld [vmem:[#allocation71_spill] sm:$0xff] }
 0x3c5   :  { %5046 = vmatprep.subr.bf16.mxu0 %v9963_v36  ;;  %v9978_v36 = vld [vmem:[#allocation72_spill] sm:$0xff] }
 0x3c7   :  { %4869 = vmatpush1.bf16.msra.mxu1 %v9973_v16 }
 0x3c8   :  { %5047 = vmatpush1.bf16.msra.mxu0 %v9967_v20  ;;  %4870 = vmatprep.subr.bf16.mxu1 %v9974_v39  ;;  %v6797_v20 = vunpack.i.h.bf16 %v9024_v21 }
 0x3c9   :  { %5048 = vmatprep.subr.bf16.mxu0 %v9968_v10  ;;  %v9979_v10 = vunpack.i.l.bf16 %v9024_v21  ;;  %v7711_v21 = vld [vmem:[#allocation10 + $0x24] ss:$8 sps:$4 sm:$0xff]  }
 0x3cb   :  { %4871 = vmatpush1.bf16.msra.mxu1 %v9975_v56  ;;  %v3582_v61 = vsel %vm3400_vm11, %v9979_v10, %v6797_v20  ;;  %v7719_v20 = vld [vmem:[#allocation10 + $0x64] ss:$8 sps:$4 sm:$0xff]   ;;  %v7721_v10 = vld [vmem:[#allocation10 + $0x74] ss:$8 sps:$4 sm:$0xff]  }
 0x3cc   :  { %5049 = vmatpush1.bf16.msra.mxu0 %v9969_v55  ;;  %4872 = vmatprep.subr.bf16.mxu1 %v9976_v19  ;;  %v9980_v55 = vld [vmem:[#allocation55_spill] sm:$0xff] }
 0x3cd   :  { %5050 = vmatprep.subr.bf16.mxu0 %v9970_v7  ;;  %v7707_v7 = vld [vmem:[#allocation10 + $0x4] ss:$8 sps:$4 sm:$0xff]   ;;  %v9981_v51 = vmax.f32 %v9980_v55, 0.0 }
 0x3ce   :  { %v10002_v55 = vld [vmem:[#allocation92_spill] sm:$0xff] }
 0x3cf   :  { %4873 = vmatpush1.bf16.msra.mxu1 %v9977_v54  ;;  %v9392_v9 = vmax.f32 %v9981_v51, %v3582_v61  ;;  %v7723_v61 = vld [vmem:[#allocation10 + $0x84] ss:$8 sps:$4 sm:$0xff]  }
 0x3d0   :  { %5051 = vmatpush1.bf16.msra.mxu0 %v9971_v30  ;;  %4874 = vmatprep.subr.bf16.mxu1 %v9978_v36  ;;  %v7710_v30 = vld [vmem:[#allocation10 + $0x10] ss:$8 sps:$4 sm:$0xff]  }
 0x3d1   :  { %5052 = vmatprep.subr.bf16.mxu0 %v9972_v47  ;;  %v10003_v51 = vld [vmem:[#allocation93_spill] sm:$0xff] }
 0x3d3   :  { %4875 = vmatpush1.bf16.msra.mxu1 %v8830_v57 }
 0x3d4   :  { %5053 = vmatpush1.bf16.msra.mxu0 %v9973_v16  ;;  %4876 = vmatprep.subr.bf16.mxu1 %v8833_v58  ;;  %v3636_v16 = vpop.permute.xlu0 %3635 }
 0x3d5   :  { %5054 = vmatprep.subr.bf16.mxu0 %v9974_v39 }
 0x3d7   :  { %4877 = vmatpush1.bf16.msra.mxu1 %v8840_v14 }
 0x3d8   :  { %5055 = vmatpush1.bf16.msra.mxu0 %v9975_v56  ;;  %4878 = vmatprep.subr.bf16.mxu1 %v8843_v17  ;;  %v7716_v56 = vld [vmem:[#allocation10 + $0x40] ss:$8 sps:$4 sm:$0xff]  }
 0x3d9   :  { %5056 = vmatprep.subr.bf16.mxu0 %v9976_v19  ;;  %v7717_v19 = vld [vmem:[#allocation10 + $0x54] ss:$8 sps:$4 sm:$0xff]  }
 0x3db   :  { %4879 = vmatpush1.bf16.msra.mxu1 %v8852_v18 }
 0x3dc   :  { %5057 = vmatpush1.bf16.msra.mxu0 %v9977_v54  ;;  %5093 = vmatprep.subr.bf16.mxu1 %v7707_v7 }
 0x3dd   :  { %5058 = vmatprep.subr.bf16.mxu0 %v9978_v36  ;;  %v7718_v36 = vld [vmem:[#allocation10 + $0x50] ss:$8 sps:$4 sm:$0xff]  }
 0x3de   :  { %4881 = vmatmul.mubr.bf16.vlgmr.msra.gmra.mrb[32].mxu1 %v9175_v1  ;;  %v3718_v1 = vmax.f32 %v9275_v5, %v9392_v9  ;;  %v7714_v5 = vld [vmem:[#allocation10 + $0x30] ss:$8 sps:$4 sm:$0xff]  }
 0x3df   :  { %5094 = vmatpush1.bf16.msra.mxu1 %v7708_v22  ;;  %5125 = vmatprep.mubr.bf16.mxu1 %v9178_v44  ;;  %v9401_v44 = vpack.c.bf16 %v8929_v53, %v8929_v53  ;;  %v7715_v53 = vld [vmem:[#allocation10 + $0x44] ss:$8 sps:$4 sm:$0xff]  }
 0x3e0   :  { %5059 = vmatpush1.bf16.msra.mxu0 %v8830_v57  ;;  %5095 = vmatprep.subr.bf16.mxu1 %v7709_v40  ;;  %v7712_v57 = vld [vmem:[#allocation10 + $0x20] ss:$8 sps:$4 sm:$0xff]  }
 0x3e1   :  { %5060 = vmatprep.subr.bf16.mxu0 %v8833_v58  ;;  %v7713_v58 = vld [vmem:[#allocation10 + $0x34] ss:$8 sps:$4 sm:$0xff]  }
 0x3e3   :  { %5096 = vmatpush1.bf16.msra.mxu1 %v7710_v30 }
 0x3e4   :  { %5061 = vmatpush1.bf16.msra.mxu0 %v8840_v14  ;;  %5097 = vmatprep.subr.bf16.mxu1 %v7711_v21  ;;  %v9405_v14 = vpack.c.bf16 %v3718_v1, %v3718_v1  ;;  %v10006_v1 = vld [vmem:[#allocation96_spill] sm:$0xff] }
 0x3e5   :  { %5062 = vmatprep.subr.bf16.mxu0 %v8843_v17 }
 0x3e7   :  { %5098 = vmatpush1.bf16.msra.mxu1 %v7712_v57 }
 0x3e8   :  { %5063 = vmatpush1.bf16.msra.mxu0 %v8852_v18  ;;  %5099 = vmatprep.subr.bf16.mxu1 %v7713_v58 }
 0x3e9   :  { %5277 = vmatprep.subr.bf16.mxu0 %v7707_v7  ;;  %v7720_v7 = vld [vmem:[#allocation10 + $0x60] ss:$8 sps:$4 sm:$0xff]  }
 0x3ea   :  { %v9403_v47 = vpop.permute.xlu1 %6809 }
 0x3eb   :  { %v6811_v17 = vunpack.i.l.bf16 %v9403_v47  ;;  %5065 = vmatmul.mubr.bf16.vlgmr.msra.gmra.mrb[32].mxu0 %v9401_v44  ;;  %5100 = vmatpush1.bf16.msra.mxu1 %v7714_v5 }
 0x3ec   :  { %5278 = vmatpush1.bf16.msra.mxu0 %v7708_v22  ;;  %5309 = vmatprep.mubr.bf16.mxu0 %v9405_v14  ;;  %v7725_v22 = vld [vmem:[#allocation10 + $0x94] ss:$8 sps:$4 sm:$0xff]  }
 0x3ed   :  { %v3641_v18 = vsel %vm3400_vm11, %v3636_v16, %v6811_v17  ;;  %5101 = vmatprep.subr.bf16.mxu1 %v7715_v53  ;;  %5279 = vmatprep.subr.bf16.mxu0 %v7709_v40  ;;  %v7726_v40 = vld [vmem:[#allocation10 + $0x90] ss:$8 sps:$4 sm:$0xff]  }
 0x3ee   :  { %v3645_v39 = vmax.f32 %v9068_v8, %v3641_v18  ;;  %v7722_v8 = vld [vmem:[#allocation10 + $0x70] ss:$8 sps:$4 sm:$0xff]  }
 0x3ef   :  { %5102 = vmatpush1.bf16.msra.mxu1 %v7716_v56  ;;  %v10009_v16 = vld [vmem:[#allocation98_spill] sm:$0xff] }
 0x3f0   :  { %5280 = vmatpush1.bf16.msra.mxu0 %v7710_v30  ;;  %5103 = vmatprep.subr.bf16.mxu1 %v7717_v19  ;;  %v9415_v54 = vmax.f32 %v9336_v25, %v3645_v39  ;;  %v7724_v25 = vld [vmem:[#allocation10 + $0x80] ss:$8 sps:$4 sm:$0xff]   ;;  %v6807_v30 = vunpack.i.h.bf16 %v9314_v15  ;;  %v10010_v18 = vld [vmem:[#allocation78_spill] sm:$0xff] }
 0x3f1   :  { %5281 = vmatprep.subr.bf16.mxu0 %v7711_v21  ;;  %v10005_v21 = vld [vmem:[#allocation95_spill] sm:$0xff] }
 0x3f3   :  { %5104 = vmatpush1.bf16.msra.mxu1 %v7718_v36 }
 0x3f4   :  { %5282 = vmatpush1.bf16.msra.mxu0 %v7712_v57  ;;  %5105 = vmatprep.subr.bf16.mxu1 %v7719_v20  ;;  %v10007_v57 = vunpack.i.l.bf16 %v9314_v15  ;;  %v10013_v15 = vld [vmem:[#allocation100_spill] sm:$0xff] }
 0x3f5   :  { %5283 = vmatprep.subr.bf16.mxu0 %v7713_v58 }
 0x3f6   :  { %v3622_v58 = vsel %vm3400_vm11, %v10007_v57, %v6807_v30  ;;  %v7752_v30 = vld [vmem:[#allocation10 + $0x344] ss:$8 sps:$4 sm:$0xff]  }
 0x3f7   :  { %5106 = vmatpush1.bf16.msra.mxu1 %v7720_v7 }
 0x3f8   :  { %5284 = vmatpush1.bf16.msra.mxu0 %v7714_v5  ;;  %5107 = vmatprep.subr.bf16.mxu1 %v7721_v10  ;;  %v10008_v5 = vld [vmem:[#allocation97_spill] sm:$0xff] }
 0x3f9   :  { %5285 = vmatprep.subr.bf16.mxu0 %v7715_v53  ;;  %v10011_v53 = vmax.f32 %v10010_v18, 0.0  ;;  %v7755_v18 = vld [vmem:[#allocation10 + $0x350] ss:$8 sps:$4 sm:$0xff]  }
 0x3fb   :  { %5108 = vmatpush1.bf16.msra.mxu1 %v7722_v8  ;;  %v9532_v39 = vmax.f32 %v10011_v53, %v3622_v58 }
 0x3fc   :  { %5286 = vmatpush1.bf16.msra.mxu0 %v7716_v56  ;;  %5109 = vmatprep.subr.bf16.mxu1 %v7723_v61  ;;  %v10012_v56 = vld [vmem:[#allocation99_spill] sm:$0xff] }
 0x3fd   :  { %5287 = vmatprep.subr.bf16.mxu0 %v7717_v19  ;;  %v10015_v19 = vld [vmem:[#allocation102_spill] sm:$0xff] }
 0x3ff   :  { %5110 = vmatpush1.bf16.msra.mxu1 %v7724_v25 }
 0x400   :  { %5288 = vmatpush1.bf16.msra.mxu0 %v7718_v36  ;;  %5111 = vmatprep.subr.bf16.mxu1 %v7725_v22  ;;  %v9545_v36 = vpack.c.bf16 %v9321_v28, %v9321_v28  ;;  %v10019_v28 = vld [vmem:[#allocation26_spill] sm:$0xff] }
 0x401   :  { %5289 = vmatprep.subr.bf16.mxu0 %v7719_v20 }
 0x403   :  { %5112 = vmatpush1.bf16.msra.mxu1 %v8715_v27  ;;  %v7727_v27 = vld [vmem:[#allocation10 + $0xa4] ss:$8 sps:$4 sm:$0xff]  }
 0x404   :  { %5290 = vmatpush1.bf16.msra.mxu0 %v7720_v7  ;;  %5113 = vmatprep.subr.bf16.mxu1 %v8725_v49  ;;  %v7728_v49 = vld [vmem:[#allocation10 + $0xa0] ss:$8 sps:$4 sm:$0xff]  }
 0x405   :  { %5291 = vmatprep.subr.bf16.mxu0 %v7721_v10  ;;  %v10016_v7 = vld [vmem:[#allocation103_spill] sm:$0xff]  ;;  %v10017_v10 = vld [vmem:[#allocation104_spill] sm:$0xff] }
 0x407   :  { %5114 = vmatpush1.bf16.msra.mxu1 %v8733_v46  ;;  %v6802_v46 = vunpack.i.h.bf16 %v9303_v33 }
 0x408   :  { %5292 = vmatpush1.bf16.msra.mxu0 %v7722_v8  ;;  %5115 = vmatprep.subr.bf16.mxu1 %v8742_v31  ;;  %v10018_v8 = vld [vmem:[#allocation25_spill] sm:$0xff] }
 0x409   :  { %5293 = vmatprep.subr.bf16.mxu0 %v7723_v61  ;;  %v10020_v61 = vld [vmem:[#allocation27_spill] sm:$0xff] }
 0x40b   :  { %5116 = vmatpush1.bf16.msra.mxu1 %v8751_v0 }
 0x40c   :  { %5294 = vmatpush1.bf16.msra.mxu0 %v7724_v25  ;;  %5117 = vmatprep.subr.bf16.mxu1 %v8757_v45  ;;  %v10021_v25 = vld [vmem:[#allocation106_spill] sm:$0xff] }
 0x40d   :  { %5295 = vmatprep.subr.bf16.mxu0 %v7725_v22  ;;  %v10022_v22 = vld [vmem:[#allocation28_spill] sm:$0xff] }
 0x40f   :  { %5118 = vmatpush1.bf16.msra.mxu1 %v8764_v50 }
 0x410   :  { %5296 = vmatpush1.bf16.msra.mxu0 %v7726_v40  ;;  %5119 = vmatprep.subr.bf16.mxu1 %v8771_v29  ;;  %v10023_v40 = vld [vmem:[#allocation29_spill] sm:$0xff] }
 0x411   :  { %5297 = vmatprep.subr.bf16.mxu0 %v7727_v27  ;;  %v10024_v27 = vld [vmem:[#allocation30_spill] sm:$0xff] }
 0x413   :  { %5120 = vmatpush1.bf16.msra.mxu1 %v8780_v26 }
 0x414   :  { %5298 = vmatpush1.bf16.msra.mxu0 %v7728_v49  ;;  %5121 = vmatprep.subr.bf16.mxu1 %v8788_v52  ;;  %v10025_v49 = vld [vmem:[#allocation31_spill] sm:$0xff] }
 0x415   :  { %5299 = vmatprep.subr.bf16.mxu0 %v8742_v31  ;;  %v9982_v31 = vunpack.i.l.bf16 %v9303_v33  ;;  %v10001_v33 = vld [vmem:[#allocation91_spill] sm:$0xff] }
 0x417   :  { %5122 = vmatpush1.bf16.msra.mxu1 %v8798_v41 }
 0x418   :  { %5300 = vmatpush1.bf16.msra.mxu0 %v8751_v0  ;;  %5123 = vmatprep.subr.bf16.mxu1 %v8807_v11  ;;  %v3602_v0 = vsel %vm3400_vm11, %v9982_v31, %v6802_v46  ;;  %v7729_v46 = vld [vmem:[#allocation10 + $0x280] ss:$8 sps:$4 sm:$0xff]   ;;  %v7730_v31 = vld [vmem:[#allocation10 + $0x294] ss:$8 sps:$4 sm:$0xff]  }
 0x419   :  { %5301 = vmatprep.subr.bf16.mxu0 %v8757_v45 }
 0x41b   :  { %5124 = vmatpush1.bf16.msra.mxu1 %v8816_v48 }
 0x41c   :  { %5302 = vmatpush1.bf16.msra.mxu0 %v8764_v50  ;;  %5134 = vmatprep.subr.bf16.mxu1 %v8946_v3  ;;  %v9983_v50 = vmax.f32 %v9022_v34, 0.0  ;;  %v9461_v34 = vpack.c.bf16 %v9063_v43, %v9063_v43  ;;  %v9994_v43 = vld [vmem:[#allocation84_spill] sm:$0xff] }
 0x41d   :  { %5303 = vmatprep.subr.bf16.mxu0 %v8771_v29 }
 0x41e   :  { %5126 = vmatmul.mubr.bf16.vlgmr.msra.gmra.mrb[36].mxu1 %v9288_v12  ;;  %v9448_v45 = vmax.f32 %v9983_v50, %v3602_v0  ;;  %v9986_v12 = vld [vmem:[#allocation75_spill] sm:$0xff]  ;;  %v7731_v0 = vld [vmem:[#allocation10 + $0x290] ss:$8 sps:$4 sm:$0xff]  }
 0x41f   :  { %5135 = vmatpush1.bf16.msra.mxu1 %v8954_v42  ;;  %5166 = vmatprep.mubr.bf16.mxu1 %v9291_v6  ;;  %v10000_v6 = vld [vmem:[#allocation90_spill] sm:$0xff]  ;;  %v7732_v50 = vld [vmem:[#allocation10 + $0x2a4] ss:$8 sps:$4 sm:$0xff]  }
 0x420   :  { %5304 = vmatpush1.bf16.msra.mxu0 %v8780_v26  ;;  %5136 = vmatprep.subr.bf16.mxu1 %v8959_v38  ;;  %v3726_v29 = vmax.f32 %v9392_v9, %v9448_v45  ;;  %v9984_v26 = vld [vmem:[#allocation73_spill] sm:$0xff]  ;;  %v10004_v9 = vld [vmem:[#allocation94_spill] sm:$0xff] }
 0x421   :  { %5305 = vmatprep.subr.bf16.mxu0 %v8788_v52  ;;  %v9985_v52 = vld [vmem:[#allocation74_spill] sm:$0xff] }
 0x423   :  { %5137 = vmatpush1.bf16.msra.mxu1 %v8967_v24 }
 0x424   :  { %5306 = vmatpush1.bf16.msra.mxu0 %v8798_v41  ;;  %5138 = vmatprep.subr.bf16.mxu1 %v8971_v13  ;;  %v9464_v41 = vpack.c.bf16 %v3726_v29, %v3726_v29  ;;  %v7734_v29 = vld [vmem:[#allocation10 + $0x2b4] ss:$8 sps:$4 sm:$0xff]  }
 0x425   :  { %5307 = vmatprep.subr.bf16.mxu0 %v8807_v11  ;;  %v9987_v11 = vld [vmem:[#allocation76_spill] sm:$0xff] }
 0x427   :  { %5139 = vmatpush1.bf16.msra.mxu1 %v9984_v26 }
 0x428   :  { %5308 = vmatpush1.bf16.msra.mxu0 %v8816_v48  ;;  %5140 = vmatprep.subr.bf16.mxu1 %v9985_v52  ;;  %v9988_v48 = vld [vmem:[#allocation77_spill] sm:$0xff] }
 0x429   :  { %5318 = vmatprep.subr.bf16.mxu0 %v8946_v3  ;;  %v9989_v3 = vld [vmem:[#allocation79_spill] sm:$0xff] }
 0x42b   :  { %5141 = vmatpush1.bf16.msra.mxu1 %v9986_v12  ;;  %5310 = vmatmul.mubr.bf16.vlgmr.msra.gmra.mrb[36].mxu0 %v9461_v34 }
 0x42c   :  { %5319 = vmatpush1.bf16.msra.mxu0 %v8954_v42  ;;  %5350 = vmatprep.mubr.bf16.mxu0 %v9464_v41  ;;  %v9990_v42 = vld [vmem:[#allocation80_spill] sm:$0xff] }
 0x42d   :  { %5142 = vmatprep.subr.bf16.mxu1 %v9987_v11  ;;  %5320 = vmatprep.subr.bf16.mxu0 %v8959_v38  ;;  %v9991_v38 = vld [vmem:[#allocation81_spill] sm:$0xff] }
 0x42f   :  { %5143 = vmatpush1.bf16.msra.mxu1 %v9001_v35 }
 0x430   :  { %5321 = vmatpush1.bf16.msra.mxu0 %v8967_v24  ;;  %5144 = vmatprep.subr.bf16.mxu1 %v9005_v4  ;;  %v9992_v24 = vld [vmem:[#allocation82_spill] sm:$0xff] }
 0x431   :  { %5322 = vmatprep.subr.bf16.mxu0 %v8971_v13  ;;  %v9993_v13 = vld [vmem:[#allocation83_spill] sm:$0xff] }
 0x433   :  { %5145 = vmatpush1.bf16.msra.mxu1 %v9009_v23 }
 0x434   :  { %5323 = vmatpush1.bf16.msra.mxu0 %v9984_v26  ;;  %5146 = vmatprep.subr.bf16.mxu1 %v9013_v63  ;;  %v7735_v26 = vld [vmem:[#allocation10 + $0x2b0] ss:$8 sps:$4 sm:$0xff]  }
 0x435   :  { %5324 = vmatprep.subr.bf16.mxu0 %v9985_v52  ;;  %v7736_v52 = vld [vmem:[#allocation10 + $0x2c4] ss:$8 sps:$4 sm:$0xff]  }
 0x437   :  { %5147 = vmatpush1.bf16.msra.mxu1 %v9017_v59 }
 0x438   :  { %5325 = vmatpush1.bf16.msra.mxu0 %v9986_v12  ;;  %5148 = vmatprep.subr.bf16.mxu1 %v9988_v48  ;;  %v7737_v12 = vld [vmem:[#allocation10 + $0x2c0] ss:$8 sps:$4 sm:$0xff]  }
 0x439   :  { %5326 = vmatprep.subr.bf16.mxu0 %v9987_v11  ;;  %v7738_v11 = vld [vmem:[#allocation10 + $0x2d4] ss:$8 sps:$4 sm:$0xff]  }
 0x43b   :  { %5149 = vmatpush1.bf16.msra.mxu1 %v9989_v3 }
 0x43c   :  { %5327 = vmatpush1.bf16.msra.mxu0 %v9001_v35  ;;  %5150 = vmatprep.subr.bf16.mxu1 %v9990_v42  ;;  %v9995_v35 = vld [vmem:[#allocation85_spill] sm:$0xff] }
 0x43d   :  { %5328 = vmatprep.subr.bf16.mxu0 %v9005_v4  ;;  %v9996_v4 = vld [vmem:[#allocation86_spill] sm:$0xff] }
 0x43f   :  { %5151 = vmatpush1.bf16.msra.mxu1 %v9991_v38 }
 0x440   :  { %5329 = vmatpush1.bf16.msra.mxu0 %v9009_v23  ;;  %5152 = vmatprep.subr.bf16.mxu1 %v9992_v24  ;;  %v9997_v23 = vld [vmem:[#allocation87_spill] sm:$0xff] }
 0x441   :  { %5330 = vmatprep.subr.bf16.mxu0 %v9013_v63  ;;  %v9998_v63 = vld [vmem:[#allocation88_spill] sm:$0xff] }
 0x443   :  { %5153 = vmatpush1.bf16.msra.mxu1 %v9993_v13 }
 0x444   :  { %5331 = vmatpush1.bf16.msra.mxu0 %v9017_v59  ;;  %5154 = vmatprep.subr.bf16.mxu1 %v9994_v43  ;;  %v9999_v59 = vld [vmem:[#allocation89_spill] sm:$0xff] }
 0x445   :  { %5332 = vmatprep.subr.bf16.mxu0 %v9988_v48  ;;  %v7739_v48 = vld [vmem:[#allocation10 + $0x2d0] ss:$8 sps:$4 sm:$0xff]  }
 0x447   :  { %5155 = vmatpush1.bf16.msra.mxu1 %v9995_v35 }
 0x448   :  { %5333 = vmatpush1.bf16.msra.mxu0 %v9989_v3  ;;  %5156 = vmatprep.subr.bf16.mxu1 %v9996_v4  ;;  %v7740_v3 = vld [vmem:[#allocation10 + $0x2e4] ss:$8 sps:$4 sm:$0xff]  }
 0x449   :  { %5334 = vmatprep.subr.bf16.mxu0 %v9990_v42  ;;  %v7741_v42 = vld [vmem:[#allocation10 + $0x2e0] ss:$8 sps:$4 sm:$0xff]  }
 0x44b   :  { %5157 = vmatpush1.bf16.msra.mxu1 %v9997_v23 }
 0x44c   :  { %5335 = vmatpush1.bf16.msra.mxu0 %v9991_v38  ;;  %5158 = vmatprep.subr.bf16.mxu1 %v9998_v63  ;;  %v7742_v38 = vld [vmem:[#allocation10 + $0x2f4] ss:$8 sps:$4 sm:$0xff]  }
 0x44d   :  { %5336 = vmatprep.subr.bf16.mxu0 %v9992_v24  ;;  %v6812_v24 = vunpack.i.h.bf16 %v9403_v47 }
 0x44f   :  { %5159 = vmatpush1.bf16.msra.mxu1 %v9999_v59 }
 0x450   :  { %5337 = vmatpush1.bf16.msra.mxu0 %v9993_v13  ;;  %5160 = vmatprep.subr.bf16.mxu1 %v10000_v6  ;;  %v7743_v13 = vld [vmem:[#allocation10 + $0x2f0] ss:$8 sps:$4 sm:$0xff]  }
 0x451   :  { %5338 = vmatprep.subr.bf16.mxu0 %v9994_v43  ;;  %v7744_v43 = vld [vmem:[#allocation10 + $0x304] ss:$8 sps:$4 sm:$0xff]  }
 0x453   :  { %5161 = vmatpush1.bf16.msra.mxu1 %v10001_v33 }
 0x454   :  { %5339 = vmatpush1.bf16.msra.mxu0 %v9995_v35  ;;  %5162 = vmatprep.subr.bf16.mxu1 %v10002_v55  ;;  %v3642_v35 = vsel %vm3400_vm11, %v6811_v17, %v6812_v24  ;;  %v7749_v17 = vld [vmem:[#allocation10 + $0x320] ss:$8 sps:$4 sm:$0xff]  }
 0x455   :  { %5340 = vmatprep.subr.bf16.mxu0 %v9996_v4  ;;  %v7745_v4 = vld [vmem:[#allocation10 + $0x300] ss:$8 sps:$4 sm:$0xff]  }
 0x456   :  { %v7773_v24 = vld [vmem:[#allocation10 + $0x3e0] ss:$8 sps:$4 sm:$0xff]  }
 0x457   :  { %5163 = vmatpush1.bf16.msra.mxu1 %v10003_v51 }
 0x458   :  { %5341 = vmatpush1.bf16.msra.mxu0 %v9997_v23  ;;  %5164 = vmatprep.subr.bf16.mxu1 %v10004_v9  ;;  %v7746_v23 = vld [vmem:[#allocation10 + $0x314] ss:$8 sps:$4 sm:$0xff]  }
 0x459   :  { %5342 = vmatprep.subr.bf16.mxu0 %v9998_v63  ;;  %v10026_v63 = vld [vmem:[#allocation105_spill] sm:$0xff] }
 0x45b   :  { %5165 = vmatpush1.bf16.msra.mxu1 %v10005_v21 }
 0x45c   :  { %5343 = vmatpush1.bf16.msra.mxu0 %v9999_v59  ;;  %5175 = vmatprep.subr.bf16.mxu1 %v10006_v1  ;;  %v10027_v59 = vmax.f32 %v10026_v63, 0.0  ;;  %v7621_v63 = vld [vmem:[#allocation13 + $0x8] sm:$0xff]  }
 0x45d   :  { %5344 = vmatprep.subr.bf16.mxu0 %v10000_v6 }
 0x45e   :  { %5167 = vmatmul.mubr.bf16.vlgmr.msra.gmra.mrb[36].mxu1 %v9401_v44  ;;  %v3734_v44 = vmax.f32 %v9448_v45, %v9532_v39  ;;  %v7733_v45 = vld [vmem:[#allocation10 + $0x2a0] ss:$8 sps:$4 sm:$0xff]   ;;  %v3646_v6 = vmax.f32 %v10027_v59, %v3642_v35  ;;  %v7775_v35 = vld [vmem:[#allocation10 + $0x3f0] ss:$8 sps:$4 sm:$0xff]  }
 0x45f   :  { %5176 = vmatpush1.bf16.msra.mxu1 %v10008_v5  ;;  %5207 = vmatprep.mubr.bf16.mxu1 %v9405_v14  ;;  %v10014_v14 = vld [vmem:[#allocation101_spill] sm:$0xff] }
 0x460   :  { %5345 = vmatpush1.bf16.msra.mxu0 %v10001_v33  ;;  %5177 = vmatprep.subr.bf16.mxu1 %v10009_v16  ;;  %v5274_v20 = vpack.c.bf16 %v3734_v44, %v3734_v44  ;;  %v7747_v33 = vld [vmem:[#allocation10 + $0x310] ss:$8 sps:$4 sm:$0xff]   ;;  %v3742_v47 = vmax.f32 %v9532_v39, %v3646_v6  ;;  %v4705_v44 = vmax.f32 %v9347_v32, 0.0  ;;  %v7634_v32 = vld [vmem:[#allocation13 + $0xc0] sm:$0xff]  }
 0x461   :  { %5346 = vmatprep.subr.bf16.mxu0 %v10002_v55  ;;  %v7748_v55 = vld [vmem:[#allocation10 + $0x324] ss:$8 sps:$4 sm:$0xff]   ;;  %v7622_v59 = vld [vmem:[#allocation13 + $0x50] sm:$0xff]  }
 0x462   :  { %v7623_v6 = vld [vmem:[#allocation13 + $0x10] sm:$0xff]  }
 0x463   :  { %5178 = vmatpush1.bf16.msra.mxu1 %v10012_v56 }
 0x464   :  { %5347 = vmatpush1.bf16.msra.mxu0 %v10003_v51  ;;  %5179 = vmatprep.subr.bf16.mxu1 %v10013_v15  ;;  %v5276_v51 = vpack.c.bf16 %v3742_v47, %v3742_v47  ;;  %v7626_v47 = vld [vmem:[#allocation13 + $0x60] sm:$0xff]  }
 0x465   :  { %5348 = vmatprep.subr.bf16.mxu0 %v10004_v9  ;;  %v7751_v9 = vld [vmem:[#allocation10 + $0x330] ss:$8 sps:$4 sm:$0xff]  }
 0x467   :  { %5180 = vmatpush1.bf16.msra.mxu1 %v10014_v14 }
 0x468   :  { %5349 = vmatpush1.bf16.msra.mxu0 %v10005_v21  ;;  %5181 = vmatprep.subr.bf16.mxu1 %v10015_v19  ;;  %v7753_v21 = vld [vmem:[#allocation10 + $0x340] ss:$8 sps:$4 sm:$0xff]  }
 0x469   :  { %5359 = vmatprep.subr.bf16.mxu0 %v10006_v1  ;;  %v7754_v1 = vld [vmem:[#allocation10 + $0x354] ss:$8 sps:$4 sm:$0xff]  }
 0x46b   :  { %5182 = vmatpush1.bf16.msra.mxu1 %v10016_v7  ;;  %5351 = vmatmul.mubr.bf16.vlgmr.msra.gmra.mrb[36].mxu0 %v9545_v36 }
 0x46c   :  { %5360 = vmatpush1.bf16.msra.mxu0 %v10008_v5  ;;  %5391 = vmatprep.mubr.bf16.mxu0 %v5274_v20  ;;  %v7757_v20 = vld [vmem:[#allocation10 + $0x360] ss:$8 sps:$4 sm:$0xff]  }
 0x46d   :  { %5183 = vmatprep.subr.bf16.mxu1 %v10017_v10  ;;  %5361 = vmatprep.subr.bf16.mxu0 %v10009_v16 }
 0x46f   :  { %5184 = vmatpush1.bf16.msra.mxu1 %v10018_v8 }
 0x470   :  { %5362 = vmatpush1.bf16.msra.mxu0 %v10012_v56  ;;  %5185 = vmatprep.subr.bf16.mxu1 %v10019_v28  ;;  %v7756_v56 = vld [vmem:[#allocation10 + $0x364] ss:$8 sps:$4 sm:$0xff]  }
 0x471   :  { %5363 = vmatprep.subr.bf16.mxu0 %v10013_v15 }
 0x473   :  { %5186 = vmatpush1.bf16.msra.mxu1 %v10020_v61 }
 0x474   :  { %5364 = vmatpush1.bf16.msra.mxu0 %v10014_v14  ;;  %5187 = vmatprep.subr.bf16.mxu1 %v10021_v25  ;;  %v4706_v14 = vmax.f32 %v9350_v60, 0.0 }
 0x475   :  { %5365 = vmatprep.subr.bf16.mxu0 %v10015_v19 }
 0x477   :  { %5188 = vmatpush1.bf16.msra.mxu1 %v10022_v22 }
 0x478   :  { %5366 = vmatpush1.bf16.msra.mxu0 %v10016_v7  ;;  %5189 = vmatprep.subr.bf16.mxu1 %v10023_v40  ;;  %v7758_v7 = vld [vmem:[#allocation10 + $0x374] ss:$8 sps:$4 sm:$0xff]  }
 0x479   :  { %5367 = vmatprep.subr.bf16.mxu0 %v10017_v10  ;;  %v6823_v10 = vpack.i.bf16 %v4706_v14, %v4705_v44 }
 0x47b   :  { %5190 = vmatpush1.bf16.msra.mxu1 %v10024_v27 }
 0x47c   :  { %5368 = vmatpush1.bf16.msra.mxu0 %v10018_v8  ;;  %5191 = vmatprep.subr.bf16.mxu1 %v10025_v49  ;;  %v7759_v8 = vld [vmem:[#allocation10 + $0x370] ss:$8 sps:$4 sm:$0xff]  }
 0x47d   :  { %5369 = vmatprep.subr.bf16.mxu0 %v10019_v28  ;;  %v7760_v28 = vld [vmem:[#allocation10 + $0x384] ss:$8 sps:$4 sm:$0xff]  }
 0x47f   :  { %5192 = vmatpush1.bf16.msra.mxu1 %v7729_v46 }
 0x480   :  { %5370 = vmatpush1.bf16.msra.mxu0 %v10020_v61  ;;  %5193 = vmatprep.subr.bf16.mxu1 %v7730_v31 }
 0x481   :  { %5371 = vmatprep.subr.bf16.mxu0 %v10021_v25 }
 0x483   :  { %5194 = vmatpush1.bf16.msra.mxu1 %v7731_v0 }
 0x484   :  { %5372 = vmatpush1.bf16.msra.mxu0 %v10022_v22  ;;  %5195 = vmatprep.subr.bf16.mxu1 %v7732_v50  ;;  %v7761_v22 = vld [vmem:[#allocation10 + $0x380] ss:$8 sps:$4 sm:$0xff]  }
 0x485   :  { %5373 = vmatprep.subr.bf16.mxu0 %v10023_v40 }
 0x487   :  { %5196 = vmatpush1.bf16.msra.mxu1 %v7733_v45 }
 0x488   :  { %5374 = vmatpush1.bf16.msra.mxu0 %v10024_v27  ;;  %5197 = vmatprep.subr.bf16.mxu1 %v7734_v29 }
 0x489   :  { %5375 = vmatprep.subr.bf16.mxu0 %v10025_v49  ;;  %v7762_v49 = vld [vmem:[#allocation10 + $0x394] ss:$8 sps:$4 sm:$0xff]  }
 0x48b   :  { %5198 = vmatpush1.bf16.msra.mxu1 %v7735_v26 }
 0x48c   :  { %5376 = vmatpush1.bf16.msra.mxu0 %v7729_v46  ;;  %5199 = vmatprep.subr.bf16.mxu1 %v7736_v52 }
 0x48d   :  { %5377 = vmatprep.subr.bf16.mxu0 %v7730_v31 }
 0x48f   :  { %5200 = vmatpush1.bf16.msra.mxu1 %v7737_v12 }
 0x490   :  { %5378 = vmatpush1.bf16.msra.mxu0 %v7731_v0  ;;  %5201 = vmatprep.subr.bf16.mxu1 %v7738_v11 }
 0x491   :  { %5379 = vmatprep.subr.bf16.mxu0 %v7732_v50  ;;  %v7763_v50 = vld [vmem:[#allocation10 + $0x390] ss:$8 sps:$4 sm:$0xff]  }
 0x493   :  { %5202 = vmatpush1.bf16.msra.mxu1 %v7739_v48 }
 0x494   :  { %5380 = vmatpush1.bf16.msra.mxu0 %v7733_v45  ;;  %5203 = vmatprep.subr.bf16.mxu1 %v7740_v3 }
 0x495   :  { %5381 = vmatprep.subr.bf16.mxu0 %v7734_v29  ;;  %v7764_v29 = vld [vmem:[#allocation10 + $0x3a4] ss:$8 sps:$4 sm:$0xff]  }
 0x497   :  { %5204 = vmatpush1.bf16.msra.mxu1 %v7741_v42 }
 0x498   :  { %5382 = vmatpush1.bf16.msra.mxu0 %v7735_v26  ;;  %5205 = vmatprep.subr.bf16.mxu1 %v7742_v38  ;;  %v7765_v26 = vld [vmem:[#allocation10 + $0x3a0] ss:$8 sps:$4 sm:$0xff]  }
 0x499   :  { %5383 = vmatprep.subr.bf16.mxu0 %v7736_v52  ;;  %v7766_v52 = vld [vmem:[#allocation10 + $0x3b4] ss:$8 sps:$4 sm:$0xff]  }
 0x49b   :  { %5206 = vmatpush1.bf16.msra.mxu1 %v7743_v13 }
 0x49c   :  { %5384 = vmatpush1.bf16.msra.mxu0 %v7737_v12  ;;  %5216 = vmatprep.subr.bf16.mxu1 %v7744_v43  ;;  %v7767_v12 = vld [vmem:[#allocation10 + $0x3b0] ss:$8 sps:$4 sm:$0xff]  }
 0x49d   :  { %5385 = vmatprep.subr.bf16.mxu0 %v7738_v11  ;;  %v7768_v11 = vld [vmem:[#allocation10 + $0x3c4] ss:$8 sps:$4 sm:$0xff]  }
 0x49e   :  { %5208 = vmatmul.mubr.bf16.vlgmr.msra.gmra.mrb[36].mxu1 %v9461_v34  ;;  %v7750_v34 = vld [vmem:[#allocation10 + $0x334] ss:$8 sps:$4 sm:$0xff]  }
 0x49f   :  { %5217 = vmatpush1.bf16.msra.mxu1 %v7745_v4  ;;  %5248 = vmatprep.mubr.bf16.mxu1 %v9464_v41  ;;  %v5273_v41 = vpack.c.bf16 %v9342_v62, %v9342_v62 }
 0x4a0   :  { %5386 = vmatpush1.bf16.msra.mxu0 %v7739_v48  ;;  %5218 = vmatprep.subr.bf16.mxu1 %v7746_v23  ;;  %v7769_v48 = vld [vmem:[#allocation10 + $0x3c0] ss:$8 sps:$4 sm:$0xff]  }
 0x4a1   :  { %5387 = vmatprep.subr.bf16.mxu0 %v7740_v3  ;;  %v7770_v3 = vld [vmem:[#allocation10 + $0x3d4] ss:$8 sps:$4 sm:$0xff]  }
 0x4a3   :  { %5219 = vmatpush1.bf16.msra.mxu1 %v7747_v33 }
 0x4a4   :  { %5388 = vmatpush1.bf16.msra.mxu0 %v7741_v42  ;;  %5220 = vmatprep.subr.bf16.mxu1 %v7748_v55  ;;  %v7771_v42 = vld [vmem:[#allocation10 + $0x3d0] ss:$8 sps:$4 sm:$0xff]  }
 0x4a5   :  { %5389 = vmatprep.subr.bf16.mxu0 %v7742_v38  ;;  %v7772_v38 = vld [vmem:[#allocation10 + $0x3e4] ss:$8 sps:$4 sm:$0xff]  }
 0x4a7   :  { %5221 = vmatpush1.bf16.msra.mxu1 %v7749_v17 }
 0x4a8   :  { %5390 = vmatpush1.bf16.msra.mxu0 %v7743_v13  ;;  %5222 = vmatprep.subr.bf16.mxu1 %v7750_v34  ;;  %v7774_v13 = vld [vmem:[#allocation10 + $0x3f4] ss:$8 sps:$4 sm:$0xff]  }
 0x4a9   :  { %5400 = vmatprep.subr.bf16.mxu0 %v7744_v43  ;;  %v7618_v43 = vld [vmem:[#allocation13 + $0x40] sm:$0xff]  }
 0x4ab   :  { %5223 = vmatpush1.bf16.msra.mxu1 %v7751_v9  ;;  %5392 = vmatmul.mubr.bf16.vlgmr.msra.gmra.mrb[36].mxu0 %v5273_v41  ;;  %v7629_v41 = vld [vmem:[#allocation13 + $0x28] sm:$0xff]  }
 0x4ac   :  { %5401 = vmatpush1.bf16.msra.mxu0 %v7745_v4  ;;  %5432 = vmatprep.mubr.bf16.mxu0 %v5276_v51  ;;  %v7619_v4 = vld [vmem:[#allocation13] sm:$0xff]   ;;  %v7630_v51 = vld [vmem:[#allocation13 + $0x70] sm:$0xff]  }
 0x4ad   :  { %5224 = vmatprep.subr.bf16.mxu1 %v7752_v30  ;;  %5402 = vmatprep.subr.bf16.mxu0 %v7746_v23  ;;  %v7620_v23 = vld [vmem:[#allocation13 + $0x48] sm:$0xff]  }
 0x4af   :  { %5225 = vmatpush1.bf16.msra.mxu1 %v7753_v21 }
 0x4b0   :  { %5403 = vmatpush1.bf16.msra.mxu0 %v7747_v33  ;;  %5226 = vmatprep.subr.bf16.mxu1 %v7754_v1  ;;  %v7624_v33 = vld [vmem:[#allocation13 + $0x58] sm:$0xff]  }
 0x4b1   :  { %v4882_v57 = vpop.f32.mrb[32].mxu1  ;;  %5404 = vmatprep.subr.bf16.mxu0 %v7748_v55  ;;  %v7625_v55 = vld [vmem:[#allocation13 + $0x18] sm:$0xff]  }
 0x4b2   :  { %v9587_v58 = vadd.f32 %v4882_v57, %v9325_v37  ;;  %v4884_v62 = vpop.f32.mrb[33].mxu1 }
 0x4b3   :  { %v6649_v5 = vadd.f32 %v4884_v62, %v9333_v2  ;;  %v4886_v16 = vpop.f32.mrb[34].mxu1  ;;  %5227 = vmatpush1.bf16.msra.mxu1 %v7755_v18 }
 0x4b4   :  { %v4889_v53 = vmax.f32 %v9587_v58, 0.0  ;;  %v4887_v39 = vpop.f32.mrb[35].mxu1  ;;  %5405 = vmatpush1.bf16.msra.mxu0 %v7749_v17  ;;  %5228 = vmatprep.subr.bf16.mxu1 %v7756_v56  ;;  %v7627_v17 = vld [vmem:[#allocation13 + $0x20] sm:$0xff]   ;;  %v7638_v58 = vld [vmem:[#allocation13 + $0xd0] sm:$0xff]  }
 0x4b5   :  { %v4890_v15 = vmax.f32 %v6649_v5, 0.0  ;;  %5406 = vmatprep.subr.bf16.mxu0 %v7750_v34  ;;  %v7628_v34 = vld [vmem:[#allocation13 + $0x68] sm:$0xff]  }
 0x4b7   :  { %v6813_v19 = vpack.i.bf16 %v4890_v15, %v4889_v53  ;;  %5229 = vmatpush1.bf16.msra.mxu1 %v7757_v20 }
 0x4b8   :  { %5407 = vmatpush1.bf16.msra.mxu0 %v7751_v9  ;;  %5230 = vmatprep.subr.bf16.mxu1 %v7758_v7  ;;  %v7631_v9 = vld [vmem:[#allocation13 + $0x30] sm:$0xff]  }
 0x4b9   :  { %6814 = vrot.lane.b32.xlu1 %v6813_v19, %s7985_s0  ;;  %5408 = vmatprep.subr.bf16.mxu0 %v7752_v30  ;;  %v7632_v30 = vld [vmem:[#allocation13 + $0x78] sm:$0xff]  }
 0x4bb   :  { %5231 = vmatpush1.bf16.msra.mxu1 %v7759_v8 }
 0x4bc   :  { %5409 = vmatpush1.bf16.msra.mxu0 %v7753_v21  ;;  %5232 = vmatprep.subr.bf16.mxu1 %v7760_v28  ;;  %v7633_v21 = vld [vmem:[#allocation13 + $0x38] sm:$0xff]  }
 0x4bd   :  { %6824 = vrot.lane.b32.xlu1 %v6823_v10, %s7985_s0  ;;  %5410 = vmatprep.subr.bf16.mxu0 %v7754_v1 }
 0x4be   :  { %v5066_v60 = vpop.f32.mrb[32].mxu0 }
 0x4bf   :  { %v9600_v61 = vadd.f32 %v5066_v60, %v9325_v37  ;;  %v5068_v25 = vpop.f32.mrb[33].mxu0  ;;  %5233 = vmatpush1.bf16.msra.mxu1 %v7761_v22 }
 0x4c0   :  { %v6651_v40 = vadd.f32 %v5068_v25, %v9333_v2  ;;  %v5070_v27 = vpop.f32.mrb[34].mxu0  ;;  %5411 = vmatpush1.bf16.msra.mxu0 %v7755_v18  ;;  %5234 = vmatprep.subr.bf16.mxu1 %v7762_v49 }
 0x4c1   :  { %v5073_v46 = vmax.f32 %v9600_v61, 0.0  ;;  %v5071_v31 = vpop.f32.mrb[35].mxu0  ;;  %5412 = vmatprep.subr.bf16.mxu0 %v7756_v56  ;;  %v7640_v61 = vld [vmem:[#allocation13 + $0xd8] sm:$0xff]  }
 0x4c2   :  { %v5074_v0 = vmax.f32 %v6651_v40, 0.0  ;;  %v7637_v40 = vld [vmem:[#allocation13 + $0x88] sm:$0xff]   ;;  %v7641_v27 = vld [vmem:[#allocation13 + $0x98] sm:$0xff]   ;;  %v7643_v31 = vld [vmem:[#allocation13 + $0xa0] sm:$0xff]  }
 0x4c3   :  { %5235 = vmatpush1.bf16.msra.mxu1 %v7763_v50 }
 0x4c4   :  { %v6818_v45 = vpack.i.bf16 %v5074_v0, %v5073_v46  ;;  %5413 = vmatpush1.bf16.msra.mxu0 %v7757_v20  ;;  %5236 = vmatprep.subr.bf16.mxu1 %v7764_v29 }
 0x4c5   :  { %5414 = vmatprep.subr.bf16.mxu0 %v7758_v7 }
 0x4c6   :  { %6819 = vrot.lane.b32.xlu0 %v6818_v45, %s7985_s0  ;;  %v7644_v45 = vld [vmem:[#allocation13 + $0xe8] sm:$0xff]  }
 0x4c7   :  { %5237 = vmatpush1.bf16.msra.mxu1 %v7765_v26 }
 0x4c8   :  { %5415 = vmatpush1.bf16.msra.mxu0 %v7759_v8  ;;  %5238 = vmatprep.subr.bf16.mxu1 %v7766_v52 }
 0x4c9   :  { %5416 = vmatprep.subr.bf16.mxu0 %v7760_v28 }
 0x4cb   :  { %5239 = vmatpush1.bf16.msra.mxu1 %v7767_v12 }
 0x4cc   :  { %5417 = vmatpush1.bf16.msra.mxu0 %v7761_v22  ;;  %5240 = vmatprep.subr.bf16.mxu1 %v7768_v11  ;;  %v7636_v22 = vld [vmem:[#allocation13 + $0xc8] sm:$0xff]  }
 0x4cd   :  { %5418 = vmatprep.subr.bf16.mxu0 %v7762_v49  ;;  %v7642_v49 = vld [vmem:[#allocation13 + $0xe0] sm:$0xff]  }
 0x4cf   :  { %5241 = vmatpush1.bf16.msra.mxu1 %v7769_v48 }
 0x4d0   :  { %5419 = vmatpush1.bf16.msra.mxu0 %v7763_v50  ;;  %5242 = vmatprep.subr.bf16.mxu1 %v7770_v3 }
 0x4d1   :  { %5420 = vmatprep.subr.bf16.mxu0 %v7764_v29 }
 0x4d3   :  { %5243 = vmatpush1.bf16.msra.mxu1 %v7771_v42 }
 0x4d4   :  { %5421 = vmatpush1.bf16.msra.mxu0 %v7765_v26  ;;  %5244 = vmatprep.subr.bf16.mxu1 %v7772_v38 }
 0x4d5   :  { %5422 = vmatprep.subr.bf16.mxu0 %v7766_v52 }
 0x4d7   :  { %5245 = vmatpush1.bf16.msra.mxu1 %v7773_v24 }
 0x4d8   :  { %5423 = vmatpush1.bf16.msra.mxu0 %v7767_v12  ;;  %5246 = vmatprep.subr.bf16.mxu1 %v7774_v13 }
 0x4d9   :  { %5424 = vmatprep.subr.bf16.mxu0 %v7768_v11 }
 0x4db   :  { %5247 = vmatpush1.bf16.msra.mxu1 %v7775_v35 }
 0x4dc   :  { %5425 = vmatpush1.bf16.msra.mxu0 %v7769_v48  ;;  %6571 = vmatprep.subr.bf16.mxu1 %v7618_v43 }
 0x4dd   :  { %5426 = vmatprep.subr.bf16.mxu0 %v7770_v3  ;;  %v7645_v3 = vld [vmem:[#allocation13 + $0xa8] sm:$0xff]  }
 0x4de   :  { %5249 = vmatmul.mubr.bf16.vlgmr.msra.gmra.mrb[36].mxu1 %v9545_v36  ;;  %v5275_v36 = vpack.c.bf16 %v9415_v54, %v9415_v54 }
 0x4df   :  { %6572 = vmatpush3.bf16.msra.mxu1 %v7619_v4 }
 0x4e0   :  { %5427 = vmatpush1.bf16.msra.mxu0 %v7771_v42  ;;  %6573 = vmatprep.subr.bf16.mxu1 %v7620_v23  ;;  %v7646_v42 = vld [vmem:[#allocation13 + $0xf0] sm:$0xff]  }
 0x4e1   :  { %5428 = vmatprep.subr.bf16.mxu0 %v7772_v38  ;;  %v7647_v38 = vld [vmem:[#allocation13 + $0xb0] sm:$0xff]  }
 0x4e3   :  { %6574 = vmatpush3.bf16.msra.mxu1 %v7621_v63 }
 0x4e4   :  { %5429 = vmatpush1.bf16.msra.mxu0 %v7773_v24  ;;  %6575 = vmatprep.subr.bf16.mxu1 %v7622_v59  ;;  %v7648_v24 = vld [vmem:[#allocation13 + $0xf8] sm:$0xff]  }
 0x4e5   :  { %5430 = vmatprep.subr.bf16.mxu0 %v7774_v13  ;;  %v7649_v13 = vld [vmem:[#allocation13 + $0xb8] sm:$0xff]  }
 0x4e7   :  { %6576 = vmatpush3.bf16.msra.mxu1 %v7623_v6 }
 0x4e8   :  { %5431 = vmatpush1.bf16.msra.mxu0 %v7775_v35  ;;  %6577 = vmatprep.subr.bf16.mxu1 %v7624_v33 }
 0x4eb   :  { %5433 = vmatmul.mubr.bf16.vlgmr.msra.gmra.mrb[36].mxu0 %v5275_v36  ;;  %6578 = vmatpush3.bf16.msra.mxu1 %v7625_v55 }
 0x4ec   :  { %6579 = vmatprep.subr.bf16.mxu1 %v7626_v47  ;;  %v7986_v47 = vmov 0.0  }
 0x4ef   :  { %6580 = vmatpush3.bf16.msra.mxu1 %v7627_v17 }
 0x4f0   :  { %6581 = vmatprep.subr.bf16.mxu1 %v7628_v34 }
 0x4f3   :  { %6582 = vmatpush3.bf16.msra.mxu1 %v7629_v41 }
 0x4f4   :  { %6583 = vmatprep.subr.bf16.mxu1 %v7630_v51 }
 0x4f7   :  { %6584 = vmatpush3.bf16.msra.mxu1 %v7631_v9 }
 0x4f8   :  { %6585 = vmatprep.subr.bf16.mxu1 %v7632_v30 }
 0x4fb   :  { %6586 = vmatpush3.bf16.msra.mxu1 %v7633_v21 }
 0x4fc   :  { %6593 = vmatprep.subr.bf16.mxu1 %v7634_v32 }
 0x52b   :  { %v6815_v1 = vpop.permute.xlu1 %6814 }
 0x52c   :  { %v6817_v5 = vunpack.i.h.bf16 %v6815_v1  ;;  %v6816_v16 = vunpack.i.l.bf16 %v6815_v1 }
 0x52e   :  { %v5465_v39 = vsel %vm318_vm0, %v6816_v16, %v6817_v5 }
 0x52f   :  { %v6825_v57 = vpop.permute.xlu1 %6824  ;;  %v5467_v7 = vmax.f32 %v4889_v53, %v5465_v39  ;;  %v7639_v53 = vld [vmem:[#allocation13 + $0x90] sm:$0xff]  }
 0x530   :  { %v6827_v54 = vunpack.i.h.bf16 %v6825_v57  ;;  %v6826_v62 = vunpack.i.l.bf16 %v6825_v57 }
 0x532   :  { %v5453_v18 = vsel %vm318_vm0, %v6826_v62, %v6827_v54 }
 0x533   :  { %v5455_v15 = vmax.f32 %v4705_v44, %v5453_v18  ;;  %v7635_v44 = vld [vmem:[#allocation13 + $0x80] sm:$0xff]  }
 0x535   :  { %v5507_v8 = vmax.f32 %v5455_v15, %v5467_v7 }
 0x537   :  { %v5525_v25 = vpack.c.bf16 %v5507_v8, %v5507_v8  ;;  %v7656_v8 = vld [vmem:[#allocation16 + $0x30] sm:$0xff]  }
 0x538   :  { %v6820_v56 = vpop.permute.xlu0 %6819 }
 0x539   :  { %v6822_v14 = vunpack.i.h.bf16 %v6820_v56  ;;  %v6821_v19 = vunpack.i.l.bf16 %v6820_v56  ;;  %v7650_v56 = vld [vmem:[#allocation16] sm:$0xff]  }
 0x53b   :  { %v5477_v20 = vsel %vm318_vm0, %v6821_v19, %v6822_v14  ;;  %v7651_v14 = vld [vmem:[#allocation16 + $0x8] sm:$0xff]   ;;  %v7652_v19 = vld [vmem:[#allocation16 + $0x10] sm:$0xff]  }
 0x53c   :  { %v9619_v10 = vmax.f32 %v5073_v46, %v5477_v20  ;;  %v7653_v20 = vld [vmem:[#allocation16 + $0x18] sm:$0xff]  }
 0x53e   :  { %v5511_v28 = vmax.f32 %v5467_v7, %v9619_v10  ;;  %v7654_v7 = vld [vmem:[#allocation16 + $0x20] sm:$0xff]  }
 0x540   :  { %v5526_v60 = vpack.c.bf16 %v5511_v28, %v5511_v28  ;;  %v7657_v28 = vld [vmem:[#allocation16 + $0x38] sm:$0xff]  }
 0x542   :  { %5824 = vmatprep.mubr.bf16.mxu1 %v5526_v60  ;;  %v6529_v60 = vld [vmem:[#allocation14] ss:$0 sm:$0xff] }
 0x543   :  { %5825 = vmatmul.mubr.bf16.vlgmr.msra.gmra.mrb[40].mxu1 %v5525_v25 }
 0x544   :  { %6594 = vmatpush3.bf16.msra.mxu1 %v7635_v44 }
 0x545   :  { %6595 = vmatprep.subr.bf16.mxu1 %v7636_v22 }
 0x548   :  { %6596 = vmatpush3.bf16.msra.mxu1 %v7637_v40 }
 0x549   :  { %6597 = vmatprep.subr.bf16.mxu1 %v7638_v58 }
 0x54c   :  { %6598 = vmatpush3.bf16.msra.mxu1 %v7639_v53 }
 0x54d   :  { %6599 = vmatprep.subr.bf16.mxu1 %v7640_v61 }
 0x550   :  { %6600 = vmatpush3.bf16.msra.mxu1 %v7641_v27 }
 0x551   :  { %6601 = vmatprep.subr.bf16.mxu1 %v7642_v49  ;;  %v6562_v49 = vld [vmem:[#allocation17] ss:$0 sm:$0xff] }
 0x554   :  { %6602 = vmatpush3.bf16.msra.mxu1 %v7643_v31 }
 0x555   :  { %6603 = vmatprep.subr.bf16.mxu1 %v7644_v45 }
 0x558   :  { %6604 = vmatpush3.bf16.msra.mxu1 %v7645_v3 }
 0x559   :  { %6605 = vmatprep.subr.bf16.mxu1 %v7646_v42 }
 0x55c   :  { %6606 = vmatpush3.bf16.msra.mxu1 %v7647_v38 }
 0x55d   :  { %6607 = vmatprep.subr.bf16.mxu1 %v7648_v24 }
 0x560   :  { %6608 = vmatpush3.bf16.msra.mxu1 %v7649_v13 }
 0x561   :  { %6624 = vmatprep.subr.bf16.mxu1 %v7986_v47 }
 0x5b1   :  { %v5250_v46 = vpop.f32.mrb[36].mxu1 }
 0x5b2   :  { %v6652_v0 = vadd.f32 %v5250_v46, %v9325_v37  ;;  %v5252_v50 = vpop.f32.mrb[37].mxu1 }
 0x5b3   :  { %v6653_v29 = vadd.f32 %v5252_v50, %v9333_v2  ;;  %v5254_v26 = vpop.f32.mrb[38].mxu1 }
 0x5b4   :  { %v5257_v52 = vmax.f32 %v6652_v0, 0.0  ;;  %v5255_v12 = vpop.f32.mrb[39].mxu1 }
 0x5b5   :  { %v5258_v11 = vmax.f32 %v6653_v29, 0.0 }
 0x5b7   :  { %v6828_v48 = vpack.i.bf16 %v5258_v11, %v5257_v52 }
 0x5b9   :  { %6829 = vrot.lane.b32.xlu0 %v6828_v48, %s7985_s0 }
 0x5be   :  { %v5434_v43 = vpop.f32.mrb[36].mxu0 }
 0x5bf   :  { %v6654_v35 = vadd.f32 %v5434_v43, %v9325_v37  ;;  %v5436_v4 = vpop.f32.mrb[37].mxu0 }
 0x5c0   :  { %v6655_v23 = vadd.f32 %v5436_v4, %v9333_v2  ;;  %v5438_v63 = vpop.f32.mrb[38].mxu0 }
 0x5c1   :  { %v5441_v59 = vmax.f32 %v6654_v35, 0.0  ;;  %v5439_v6 = vpop.f32.mrb[39].mxu0 }
 0x5c2   :  { %v5442_v33 = vmax.f32 %v6655_v23, 0.0 }
 0x5c4   :  { %v6833_v55 = vpack.i.bf16 %v5442_v33, %v5441_v59 }
 0x5c6   :  { %6834 = vrot.lane.b32.xlu1 %v6833_v55, %s7985_s0 }
 0x616   :  { %v6587_v36 = vpop.f32.mrb[40].mxu1 }
 0x617   :  { %v6588_v17 = vpop.f32.mrb[41].mxu1 }
 0x618   :  { %v6589_v34 = vadd.f32 %v6588_v17, %v6587_v36  ;;  %v6590_v41 = vpop.f32.mrb[42].mxu1 }
 0x619   :  { %v6591_v51 = vpop.f32.mrb[43].mxu1 }
 0x61a   :  { %v5827_v44 = vadd.f32 %v6589_v34, %v6529_v60 }
 0x62b   :  { %v6830_v9 = vpop.permute.xlu0 %6829 }
 0x62c   :  { %v6832_v37 = vunpack.i.h.bf16 %v6830_v9  ;;  %v6831_v30 = vunpack.i.l.bf16 %v6830_v9 }
 0x62e   :  { %v5489_v2 = vsel %vm318_vm0, %v6831_v30, %v6832_v37 }
 0x62f   :  { %v5491_v1 = vmax.f32 %v5257_v52, %v5489_v2 }
 0x631   :  { %v5515_v16 = vmax.f32 %v9619_v10, %v5491_v1  ;;  %v7655_v10 = vld [vmem:[#allocation16 + $0x28] sm:$0xff]  }
 0x633   :  { %v5527_v15 = vpack.c.bf16 %v5515_v16, %v5515_v16 }
 0x638   :  { %v6835_v21 = vpop.permute.xlu1 %6834 }
 0x639   :  { %v6837_v57 = vunpack.i.h.bf16 %v6835_v21  ;;  %v6836_v54 = vunpack.i.l.bf16 %v6835_v21 }
 0x63b   :  { %v5501_v62 = vsel %vm318_vm0, %v6836_v54, %v6837_v57 }
 0x63c   :  { %v5503_v5 = vmax.f32 %v5441_v59, %v5501_v62 }
 0x63e   :  { %v5519_v18 = vmax.f32 %v5491_v1, %v5503_v5 }
 0x640   :  { %v5528_v39 = vpack.c.bf16 %v5519_v18, %v5519_v18 }
 0x642   :  { %5864 = vmatprep.mubr.bf16.mxu1 %v5528_v39 }
 0x643   :  { %5865 = vmatmul.mubr.bf16.vlgmr.msra.gmra.mrb[44].mxu1 %v5527_v15 }
 0x644   :  { %6625 = vmatpush3.bf16.msra.mxu1 %v7650_v56  ;;  %6640 = vmatprep.mubr.msk.bf16.mxu1 %vm7987_vm13, %v7986_v47 }
 0x645   :  { %6626 = vmatprep.subr.bf16.mxu1 %v7986_v47 }
 0x648   :  { %6627 = vmatpush3.bf16.msra.mxu1 %v7651_v14 }
 0x649   :  { %6628 = vmatprep.subr.bf16.mxu1 %v7986_v47 }
 0x64c   :  { %6629 = vmatpush3.bf16.msra.mxu1 %v7652_v19 }
 0x64d   :  { %6630 = vmatprep.subr.bf16.mxu1 %v7986_v47 }
 0x650   :  { %6631 = vmatpush3.bf16.msra.mxu1 %v7653_v20 }
 0x651   :  { %6632 = vmatprep.subr.bf16.mxu1 %v7986_v47 }
 0x654   :  { %6633 = vmatpush3.bf16.msra.mxu1 %v7654_v7 }
 0x655   :  { %6634 = vmatprep.subr.bf16.mxu1 %v7986_v47 }
 0x658   :  { %6635 = vmatpush3.bf16.msra.mxu1 %v7655_v10 }
 0x659   :  { %6636 = vmatprep.subr.bf16.mxu1 %v7986_v47 }
 0x65c   :  { %6637 = vmatpush3.bf16.msra.mxu1 %v7656_v8 }
 0x65d   :  { %6638 = vmatprep.subr.bf16.mxu1 %v7986_v47 }
 0x660   :  { %6639 = vmatpush3.bf16.msra.mxu1 %v7657_v28 }
 0x716   :  { %v6609_v25 = vpop.f32.mrb[44].mxu1 }
 0x717   :  { %v6610_v32 = vpop.f32.mrb[45].mxu1 }
 0x718   :  { %v6611_v22 = vadd.f32 %v6610_v32, %v6609_v25  ;;  %v6612_v40 = vpop.f32.mrb[46].mxu1 }
 0x719   :  { %v6613_v58 = vpop.f32.mrb[47].mxu1 }
 0x71a   :  { %v5867_v53 = vadd.f32 %v6611_v22, %v5827_v44 }
 0x71c   :  { %v5872_v61 = vmax.f32 %v5867_v53, 0.0 }
 0x71e   :  { %v5873_v27 = vpack.c.bf16 %v5872_v61, %v5872_v61 }
 0x720   :  { %6641 = vmatmul.mubr.bf16.vlgmr.msra.gmra.mrb[48].mxu1 %v5873_v27 }
 0x7f3   :  { %v5979_v46 = vpop.f32.mrb[48].mxu1 }
 0x7f4   :  { %v5980_v31 = vadd.f32 %v6562_v49, %v5979_v46  ;;  %v6642_v0 = vpop.f32.mrb[49].mxu1 }
 0x7f5   :  { %v5982_v50 = vpop.f32.mrb[50].mxu1 }
 0x7f6   :  { %5985 = vst [vmem:[%s9643_s9] sm:$0xff] %v5980_v31  ;;  %v6643_v45 = vpop.f32.mrb[51].mxu1 }
 0x7f7   :  { %5990 = vsyncpa [#allocation7], 1 }
 0x7f8   :  { %5991 = vsyncpa [#allocation9], 1 }
 0x7f9   :  { %5992 = vsyncpa [#allocation12], 1 }
 0x7fa   :  { %5993 = vsyncpa [#allocation15], 1 }
 0x7fb   :  { %5994 = vsyncpa [#allocation18], 1 }

</bundles_post_ra>
